<compile_context>
chip_gen: v7x
topology: tpu7x:2x2x1
jax: 0.10.0
libtpu: 0.0.40
codegen_flags: <defaults>
</compile_context>

<pallas_src>
import math

import jax
import jax.numpy as jnp
from jax import lax
from jax.experimental import pallas as pl
from jax.experimental.pallas import tpu as pltpu


# ----------------------------- parameters --------------------------------- #
def _fuse_bn(w, b, gamma, beta, mean, var, eps=1e-5):
    """Fold an eval-mode BatchNorm into the preceding conv (exact)."""
    scale = gamma / jnp.sqrt(var + eps)
    return w * scale[None, None, None, :], (b - mean) * scale + beta


def init_params(key, in_channel):
    C, Cc, Ch = in_channel, 2 * in_channel, in_channel // 2
    ks = jax.random.split(key, 6)

    def winit(k, cin, cout):
        return jax.random.normal(k, (3, 3, cin, cout), jnp.float32) / math.sqrt(9.0 * cin)

    w1 = winit(ks[0], Cc, C)
    b1 = 0.1 * jax.random.normal(ks[1], (C,), jnp.float32)
    w2 = winit(ks[2], C, Ch)
    b2 = 0.1 * jax.random.normal(ks[3], (Ch,), jnp.float32)
    w3 = winit(ks[4], Ch, 2)
    b3 = 0.1 * jax.random.normal(ks[5], (2,), jnp.float32)

    # deterministic eval-mode BatchNorm stats / affine params
    def bn(c, off):
        i = jnp.arange(c, dtype=jnp.float32)
        gamma = 1.0 + 0.1 * jnp.sin(i + off)
        beta = 0.05 * jnp.cos(i + off)
        mean = 0.02 * jnp.sin(2.0 * i + off)
        var = 1.0 + 0.1 * jnp.cos(i + off) ** 2
        return gamma, beta, mean, var

    w1f, b1f = _fuse_bn(w1, b1, *bn(C, 0.0))
    w2f, b2f = _fuse_bn(w2, b2, *bn(Ch, 1.0))
    return dict(w1=w1f, b1=b1f, w2=w2f, b2=b2f, w3=w3, b3=b3)


def _round_up(x, m):
    return ((x + m - 1) // m) * m


# ------------------------------ Pallas kernel ------------------------------ #
def _make_kernel(C, Wp, M, L):
    taps = [(ky, kx) for ky in range(3) for kx in range(3)]

    def kernel(xcat_ref, w1_ref, b1_ref, w2_ref, b2_ref, w3_ref, b3_ref,
               mask_ref, out_ref, p1, p2):
        mask = mask_ref[...]                                       # (1, L)

        def conv(src_ref, w_ref, b_ref, relu):
            # 3x3 conv = 9 accumulated (Cout, Cin) x (Cin, L) MXU matmuls,
            # each reading a statically-shifted lane window of the source.
            acc = None
            for k, (ky, kx) in enumerate(taps):
                off = M + (ky - 1) * Wp + (kx - 1)                 # static offset
                s = src_ref[:, pl.ds(off, L)]                      # (Cin_pad, L)
                y = jnp.dot(w_ref[k], s,
                            preferred_element_type=jnp.float32,
                            precision=lax.Precision.HIGHEST)       # full-f32 MXU
                acc = y if acc is None else acc + y
            acc = acc + b_ref[...]
            if relu:
                acc = jnp.maximum(acc, 0.0)
            return acc

        def store_padded(dst_ref, h):
            # write h into the interior and zero the 128-wide margins;
            # every store is lane- and sublane-aligned.
            zeros = jnp.zeros((dst_ref.shape[0], M), jnp.float32)
            dst_ref[:, pl.ds(0, M)] = zeros
            dst_ref[:, pl.ds(M + L, M)] = zeros
            dst_ref[:, pl.ds(M, L)] = h

        # conv1 (+folded BN) + ReLU; halo/tail re-zeroed (mask) so p1 is a
        # valid zero-padded feature map for the next conv.
        store_padded(p1, conv(xcat_ref, w1_ref, b1_ref, relu=True) * mask)
        # conv2 (+folded BN) + ReLU
        store_padded(p2, conv(p1, w2_ref, b2_ref, relu=True) * mask)
        # conv3 -> 2 attention logits -> exact sigmoid (rows 0,1 are real)
        z = conv(p2, w3_ref, b3_ref, relu=False)                   # (8, L)
        attn = 1.0 / (1.0 + jnp.exp(-z))

        xl = xcat_ref[pl.ds(0, C), pl.ds(M, L)]                    # (C, L)
        xg = xcat_ref[pl.ds(C, C), pl.ds(M, L)]                    # (C, L)
        out = xl * attn[0:1, :] + xg * attn[1:2, :]
        out_ref[...] = out.astype(out_ref.dtype)

    return kernel


def selective_feature_fusion(x_local, x_global, params):
    N, C, H, W = x_local.shape
    Ch = C // 2
    Hp, Wp = H + 2, W + 2
    Lp = Hp * Wp                              # real padded-spatial lanes / image
    L = _round_up(Lp, 128)                    # lane-aligned compute width
    M = _round_up(Wp + 1, 128)                # halo margin (keeps tap windows in-bounds)
    Lm = L + 2 * M
    out_dtype = x_local.dtype

    P_in = _round_up(2 * C, 8)                # conv1 input rows  (sublane padded)
    P_c1 = _round_up(C, 8)                    # conv1 output rows
    P_c2 = _round_up(Ch, 8)                   # conv2 output rows
    P_c3 = 8                                  # conv3 output rows (2 real)

    # ---- layout plumbing: NCHW -> per-image lane-dense padded slabs -------- #
    x = jnp.concatenate([x_local, x_global], axis=1).astype(jnp.float32)
    x = jnp.pad(x, ((0, 0), (0, 0), (1, 1), (1, 1)))               # spatial halo
    x = x.reshape(N, 2 * C, Lp)
    x = jnp.pad(x, ((0, 0), (0, P_in - 2 * C), (M, Lm - M - Lp)))  # sublane + lane pad
    xcat = x.reshape(N * P_in, Lm)

    def tap_weights(w, rows, cols):           # (3,3,Cin,Cout) -> (9, rows, cols)
        kh, kw, cin, cout = w.shape
        wt = jnp.transpose(w, (0, 1, 3, 2)).reshape(kh * kw, cout, cin)
        return jnp.pad(wt.astype(jnp.float32),
                       ((0, 0), (0, rows - cout), (0, cols - cin)))

    def pad_bias(b, rows):
        return jnp.pad(b.astype(jnp.float32), (0, rows - b.shape[0])).reshape(rows, 1)

    w1t = tap_weights(params["w1"], P_c1, P_in)
    w2t = tap_weights(params["w2"], P_c2, P_c1)
    w3t = tap_weights(params["w3"], P_c3, P_c2)
    b1p = pad_bias(params["b1"], P_c1)
    b2p = pad_bias(params["b2"], P_c2)
    b3p = pad_bias(params["b3"], P_c3)

    # interior mask: 1 at real pixels, 0 at the halo ring and alignment tail
    yy = jnp.arange(Hp)[:, None]
    xx = jnp.arange(Wp)[None, :]
    m2d = ((yy >= 1) & (yy <= H) & (xx >= 1) & (xx <= W)).astype(jnp.float32)
    mask = jnp.pad(m2d.reshape(1, Lp), ((0, 0), (0, L - Lp)))

    kernel = _make_kernel(C, Wp, M, L)

    def const(shape):
        return pl.BlockSpec(shape, lambda i, _n=len(shape): (0,) * _n)

    out3 = pl.pallas_call(
        kernel,
        out_shape=jax.ShapeDtypeStruct((N, C, L), out_dtype),
        grid=(N,),                                    # one image per grid step
        in_specs=[pl.BlockSpec((P_in, Lm), lambda i: (i, 0)),
                  const(w1t.shape), const(b1p.shape),
                  const(w2t.shape), const(b2p.shape),
                  const(w3t.shape), const(b3p.shape),
                  const(mask.shape)],
        out_specs=pl.BlockSpec((None, C, L), lambda i: (i, 0, 0)),
        scratch_shapes=[pltpu.VMEM((P_c1, Lm), jnp.float32),   # padded conv1 output
                        pltpu.VMEM((P_c2, Lm), jnp.float32)],  # padded conv2 output
        compiler_params=pltpu.CompilerParams(
            dimension_semantics=("parallel",)),
    )(xcat, w1t, b1p, w2t, b2p, w3t, b3p, mask)

    # strip alignment tail + halo; no transpose needed (N-major layout).
    out = out3[:, :, :Lp].reshape(N, C, Hp, Wp)[:, :, 1:H + 1, 1:W + 1]
    return out.astype(out_dtype)


# ---------------------------- pure-JAX reference --------------------------- #
def ref_forward(xl, xg, p):
    def conv(x, w, b):
        y = lax.conv_general_dilated(
            x, w, window_strides=(1, 1), padding="SAME",
            dimension_numbers=("NCHW", "HWIO", "NCHW"),
            precision=lax.Precision.HIGHEST)
        return y + b[None, :, None, None]

    x = jnp.concatenate([xl, xg], axis=1)
    x = jax.nn.relu(conv(x, p["w1"], p["b1"]))
    x = jax.nn.relu(conv(x, p["w2"], p["b2"]))
    x = conv(x, p["w3"], p["b3"])
    attn = jax.nn.sigmoid(x)
    return xl * attn[:, 0:1] + xg * attn[:, 1:2]


# --------------------------------- main ------------------------------------ #
if __name__ == "__main__":
    in_channel, N, H, W = 4, 2, 16, 16

    key = jax.random.PRNGKey(0)
    kp, kl, kg = jax.random.split(key, 3)
    params = init_params(kp, in_channel)
    x_local = jax.random.normal(kl, (N, in_channel, H, W), jnp.float32)
    x_global = jax.random.normal(kg, (N, in_channel, H, W), jnp.float32)

    out = jax.block_until_ready(selective_feature_fusion(x_local, x_global, params))
    ref = jax.block_until_ready(ref_forward(x_local, x_global, params))

    if not bool(jnp.allclose(out, ref, atol=2e-3, rtol=2e-3)):
        err = float(jnp.max(jnp.abs(out - ref)))
        raise AssertionError(
            f"Pallas output does not match JAX reference (max abs err {err:.3e})")

    print("KERNEL_OK")
</pallas_src>

<mosaic_0001>
module attributes {stable_mosaic.version = 11 : i64} {
  func.func @kernel(%arg0: i32, %arg1: memref<8x640xf32, #tpu.memory_space<vmem>>, %arg2: memref<9x8x8xf32, #tpu.memory_space<vmem>>, %arg3: memref<8x1xf32, #tpu.memory_space<vmem>>, %arg4: memref<9x8x8xf32, #tpu.memory_space<vmem>>, %arg5: memref<8x1xf32, #tpu.memory_space<vmem>>, %arg6: memref<9x8x8xf32, #tpu.memory_space<vmem>>, %arg7: memref<8x1xf32, #tpu.memory_space<vmem>>, %arg8: memref<1x384xf32, #tpu.memory_space<vmem>>, %arg9: memref<1x4x384xf32, #tpu.memory_space<vmem>>, %arg10: memref<8x640xf32, #tpu.memory_space<vmem>>, %arg11: memref<8x640xf32, #tpu.memory_space<vmem>>) attributes {dimension_semantics = [#tpu.dimension_semantics<parallel>], iteration_bounds = array<i64: 2>, scalar_prefetch = 0 : i64, scratch_operands = 2 : i64, tpu.core_type = #tpu.core_type<tc>, window_params = [{transform_indices = @transform_0, window_bounds = array<i64: 8, 640>}, {pipeline_mode = #tpu.pipeline_mode<synchronous>, transform_indices = @transform_1, window_bounds = array<i64: 9, 8, 8>}, {pipeline_mode = #tpu.pipeline_mode<synchronous>, transform_indices = @transform_2, window_bounds = array<i64: 8, 1>}, {pipeline_mode = #tpu.pipeline_mode<synchronous>, transform_indices = @transform_3, window_bounds = array<i64: 9, 8, 8>}, {pipeline_mode = #tpu.pipeline_mode<synchronous>, transform_indices = @transform_4, window_bounds = array<i64: 8, 1>}, {pipeline_mode = #tpu.pipeline_mode<synchronous>, transform_indices = @transform_5, window_bounds = array<i64: 9, 8, 8>}, {pipeline_mode = #tpu.pipeline_mode<synchronous>, transform_indices = @transform_6, window_bounds = array<i64: 8, 1>}, {pipeline_mode = #tpu.pipeline_mode<synchronous>, transform_indices = @transform_7, window_bounds = array<i64: 1, 384>}, {transform_indices = @transform_8, window_bounds = array<i64: 1, 4, 384>}]} {
    %c0 = arith.constant 0 : index
    %c0_0 = arith.constant 0 : index
    %0 = vector.load %arg8[%c0, %c0_0] : memref<1x384xf32, #tpu.memory_space<vmem>>, vector<1x384xf32>
    %c0_1 = arith.constant 0 : index
    %c109 = arith.constant 109 : index
    %1 = vector.load %arg1[%c0_1, %c109] : memref<8x640xf32, #tpu.memory_space<vmem>>, vector<8x384xf32>
    %c0_2 = arith.constant 0 : index
    %c0_3 = arith.constant 0 : index
    %c0_4 = arith.constant 0 : index
    %2 = vector.load %arg2[%c0_2, %c0_3, %c0_4] : memref<9x8x8xf32, #tpu.memory_space<vmem>>, vector<1x8x8xf32>
    %3 = vector.shape_cast %2 : vector<1x8x8xf32> to vector<8x8xf32>
    %cst = arith.constant dense<0.000000e+00> : vector<8x384xf32>
    %4 = tpu.matmul %3, %1, %cst {dimension_numbers = #tpu.dot_dimension_numbers<[1], [0], [0], [1], [0, 0, 1, 1], [], []>, precision = #tpu.contract_precision<fp32>} : vector<8x8xf32>, vector<8x384xf32>, vector<8x384xf32> -> vector<8x384xf32>
    %c0_5 = arith.constant 0 : index
    %c110 = arith.constant 110 : index
    %5 = vector.load %arg1[%c0_5, %c110] : memref<8x640xf32, #tpu.memory_space<vmem>>, vector<8x384xf32>
    %c1 = arith.constant 1 : index
    %c0_6 = arith.constant 0 : index
    %c0_7 = arith.constant 0 : index
    %6 = vector.load %arg2[%c1, %c0_6, %c0_7] : memref<9x8x8xf32, #tpu.memory_space<vmem>>, vector<1x8x8xf32>
    %7 = vector.shape_cast %6 : vector<1x8x8xf32> to vector<8x8xf32>
    %cst_8 = arith.constant dense<0.000000e+00> : vector<8x384xf32>
    %8 = tpu.matmul %7, %5, %cst_8 {dimension_numbers = #tpu.dot_dimension_numbers<[1], [0], [0], [1], [0, 0, 1, 1], [], []>, precision = #tpu.contract_precision<fp32>} : vector<8x8xf32>, vector<8x384xf32>, vector<8x384xf32> -> vector<8x384xf32>
    %9 = arith.addf %4, %8 : vector<8x384xf32>
    %c0_9 = arith.constant 0 : index
    %c111 = arith.constant 111 : index
    %10 = vector.load %arg1[%c0_9, %c111] : memref<8x640xf32, #tpu.memory_space<vmem>>, vector<8x384xf32>
    %c2 = arith.constant 2 : index
    %c0_10 = arith.constant 0 : index
    %c0_11 = arith.constant 0 : index
    %11 = vector.load %arg2[%c2, %c0_10, %c0_11] : memref<9x8x8xf32, #tpu.memory_space<vmem>>, vector<1x8x8xf32>
    %12 = vector.shape_cast %11 : vector<1x8x8xf32> to vector<8x8xf32>
    %cst_12 = arith.constant dense<0.000000e+00> : vector<8x384xf32>
    %13 = tpu.matmul %12, %10, %cst_12 {dimension_numbers = #tpu.dot_dimension_numbers<[1], [0], [0], [1], [0, 0, 1, 1], [], []>, precision = #tpu.contract_precision<fp32>} : vector<8x8xf32>, vector<8x384xf32>, vector<8x384xf32> -> vector<8x384xf32>
    %14 = arith.addf %9, %13 : vector<8x384xf32>
    %c0_13 = arith.constant 0 : index
    %c127 = arith.constant 127 : index
    %15 = vector.load %arg1[%c0_13, %c127] : memref<8x640xf32, #tpu.memory_space<vmem>>, vector<8x384xf32>
    %c3 = arith.constant 3 : index
    %c0_14 = arith.constant 0 : index
    %c0_15 = arith.constant 0 : index
    %16 = vector.load %arg2[%c3, %c0_14, %c0_15] : memref<9x8x8xf32, #tpu.memory_space<vmem>>, vector<1x8x8xf32>
    %17 = vector.shape_cast %16 : vector<1x8x8xf32> to vector<8x8xf32>
    %cst_16 = arith.constant dense<0.000000e+00> : vector<8x384xf32>
    %18 = tpu.matmul %17, %15, %cst_16 {dimension_numbers = #tpu.dot_dimension_numbers<[1], [0], [0], [1], [0, 0, 1, 1], [], []>, precision = #tpu.contract_precision<fp32>} : vector<8x8xf32>, vector<8x384xf32>, vector<8x384xf32> -> vector<8x384xf32>
    %19 = arith.addf %14, %18 : vector<8x384xf32>
    %c0_17 = arith.constant 0 : index
    %c128 = arith.constant 128 : index
    %20 = vector.load %arg1[%c0_17, %c128] : memref<8x640xf32, #tpu.memory_space<vmem>>, vector<8x384xf32>
    %c4 = arith.constant 4 : index
    %c0_18 = arith.constant 0 : index
    %c0_19 = arith.constant 0 : index
    %21 = vector.load %arg2[%c4, %c0_18, %c0_19] : memref<9x8x8xf32, #tpu.memory_space<vmem>>, vector<1x8x8xf32>
    %22 = vector.shape_cast %21 : vector<1x8x8xf32> to vector<8x8xf32>
    %cst_20 = arith.constant dense<0.000000e+00> : vector<8x384xf32>
    %23 = tpu.matmul %22, %20, %cst_20 {dimension_numbers = #tpu.dot_dimension_numbers<[1], [0], [0], [1], [0, 0, 1, 1], [], []>, precision = #tpu.contract_precision<fp32>} : vector<8x8xf32>, vector<8x384xf32>, vector<8x384xf32> -> vector<8x384xf32>
    %24 = arith.addf %19, %23 : vector<8x384xf32>
    %c0_21 = arith.constant 0 : index
    %c129 = arith.constant 129 : index
    %25 = vector.load %arg1[%c0_21, %c129] : memref<8x640xf32, #tpu.memory_space<vmem>>, vector<8x384xf32>
    %c5 = arith.constant 5 : index
    %c0_22 = arith.constant 0 : index
    %c0_23 = arith.constant 0 : index
    %26 = vector.load %arg2[%c5, %c0_22, %c0_23] : memref<9x8x8xf32, #tpu.memory_space<vmem>>, vector<1x8x8xf32>
    %27 = vector.shape_cast %26 : vector<1x8x8xf32> to vector<8x8xf32>
    %cst_24 = arith.constant dense<0.000000e+00> : vector<8x384xf32>
    %28 = tpu.matmul %27, %25, %cst_24 {dimension_numbers = #tpu.dot_dimension_numbers<[1], [0], [0], [1], [0, 0, 1, 1], [], []>, precision = #tpu.contract_precision<fp32>} : vector<8x8xf32>, vector<8x384xf32>, vector<8x384xf32> -> vector<8x384xf32>
    %29 = arith.addf %24, %28 : vector<8x384xf32>
    %c0_25 = arith.constant 0 : index
    %c145 = arith.constant 145 : index
    %30 = vector.load %arg1[%c0_25, %c145] : memref<8x640xf32, #tpu.memory_space<vmem>>, vector<8x384xf32>
    %c6 = arith.constant 6 : index
    %c0_26 = arith.constant 0 : index
    %c0_27 = arith.constant 0 : index
    %31 = vector.load %arg2[%c6, %c0_26, %c0_27] : memref<9x8x8xf32, #tpu.memory_space<vmem>>, vector<1x8x8xf32>
    %32 = vector.shape_cast %31 : vector<1x8x8xf32> to vector<8x8xf32>
    %cst_28 = arith.constant dense<0.000000e+00> : vector<8x384xf32>
    %33 = tpu.matmul %32, %30, %cst_28 {dimension_numbers = #tpu.dot_dimension_numbers<[1], [0], [0], [1], [0, 0, 1, 1], [], []>, precision = #tpu.contract_precision<fp32>} : vector<8x8xf32>, vector<8x384xf32>, vector<8x384xf32> -> vector<8x384xf32>
    %34 = arith.addf %29, %33 : vector<8x384xf32>
    %c0_29 = arith.constant 0 : index
    %c146 = arith.constant 146 : index
    %35 = vector.load %arg1[%c0_29, %c146] : memref<8x640xf32, #tpu.memory_space<vmem>>, vector<8x384xf32>
    %c7 = arith.constant 7 : index
    %c0_30 = arith.constant 0 : index
    %c0_31 = arith.constant 0 : index
    %36 = vector.load %arg2[%c7, %c0_30, %c0_31] : memref<9x8x8xf32, #tpu.memory_space<vmem>>, vector<1x8x8xf32>
    %37 = vector.shape_cast %36 : vector<1x8x8xf32> to vector<8x8xf32>
    %cst_32 = arith.constant dense<0.000000e+00> : vector<8x384xf32>
    %38 = tpu.matmul %37, %35, %cst_32 {dimension_numbers = #tpu.dot_dimension_numbers<[1], [0], [0], [1], [0, 0, 1, 1], [], []>, precision = #tpu.contract_precision<fp32>} : vector<8x8xf32>, vector<8x384xf32>, vector<8x384xf32> -> vector<8x384xf32>
    %39 = arith.addf %34, %38 : vector<8x384xf32>
    %c0_33 = arith.constant 0 : index
    %c147 = arith.constant 147 : index
    %40 = vector.load %arg1[%c0_33, %c147] : memref<8x640xf32, #tpu.memory_space<vmem>>, vector<8x384xf32>
    %c8 = arith.constant 8 : index
    %c0_34 = arith.constant 0 : index
    %c0_35 = arith.constant 0 : index
    %41 = vector.load %arg2[%c8, %c0_34, %c0_35] : memref<9x8x8xf32, #tpu.memory_space<vmem>>, vector<1x8x8xf32>
    %42 = vector.shape_cast %41 : vector<1x8x8xf32> to vector<8x8xf32>
    %cst_36 = arith.constant dense<0.000000e+00> : vector<8x384xf32>
    %43 = tpu.matmul %42, %40, %cst_36 {dimension_numbers = #tpu.dot_dimension_numbers<[1], [0], [0], [1], [0, 0, 1, 1], [], []>, precision = #tpu.contract_precision<fp32>} : vector<8x8xf32>, vector<8x384xf32>, vector<8x384xf32> -> vector<8x384xf32>
    %44 = arith.addf %39, %43 : vector<8x384xf32>
    %c0_37 = arith.constant 0 : index
    %c0_38 = arith.constant 0 : index
    %45 = vector.load %arg3[%c0_37, %c0_38] : memref<8x1xf32, #tpu.memory_space<vmem>>, vector<8x1xf32>
    %46 = vector.broadcast %45 : vector<8x1xf32> to vector<8x384xf32>
    %47 = arith.addf %44, %46 : vector<8x384xf32>
    %cst_39 = arith.constant 0.000000e+00 : f32
    %48 = vector.broadcast %cst_39 : f32 to vector<8x384xf32>
    %49 = arith.maximumf %47, %48 : vector<8x384xf32>
    %50 = vector.broadcast %0 : vector<1x384xf32> to vector<8x384xf32>
    %51 = arith.mulf %49, %50 : vector<8x384xf32>
    %cst_40 = arith.constant 0.000000e+00 : f32
    %52 = vector.broadcast %cst_40 : f32 to vector<8x128xf32>
    %c0_41 = arith.constant 0 : index
    %c0_42 = arith.constant 0 : index
    %53 = vector.load %arg10[%c0_41, %c0_42] : memref<8x640xf32, #tpu.memory_space<vmem>>, vector<8x128xf32>
    tpu.vector_store %arg10[%c0_41, %c0_42], %52 {strides = array<i32>} : memref<8x640xf32, #tpu.memory_space<vmem>>, vector<8x128xf32>,
    %c0_43 = arith.constant 0 : index
    %c512 = arith.constant 512 : index
    %54 = vector.load %arg10[%c0_43, %c512] : memref<8x640xf32, #tpu.memory_space<vmem>>, vector<8x128xf32>
    tpu.vector_store %arg10[%c0_43, %c512], %52 {strides = array<i32>} : memref<8x640xf32, #tpu.memory_space<vmem>>, vector<8x128xf32>,
    %c0_44 = arith.constant 0 : index
    %c128_45 = arith.constant 128 : index
    %55 = vector.load %arg10[%c0_44, %c128_45] : memref<8x640xf32, #tpu.memory_space<vmem>>, vector<8x384xf32>
    tpu.vector_store %arg10[%c0_44, %c128_45], %51 {strides = array<i32>} : memref<8x640xf32, #tpu.memory_space<vmem>>, vector<8x384xf32>,
    %c0_46 = arith.constant 0 : index
    %c109_47 = arith.constant 109 : index
    %56 = vector.load %arg10[%c0_46, %c109_47] : memref<8x640xf32, #tpu.memory_space<vmem>>, vector<8x384xf32>
    %c0_48 = arith.constant 0 : index
    %c0_49 = arith.constant 0 : index
    %c0_50 = arith.constant 0 : index
    %57 = vector.load %arg4[%c0_48, %c0_49, %c0_50] : memref<9x8x8xf32, #tpu.memory_space<vmem>>, vector<1x8x8xf32>
    %58 = vector.shape_cast %57 : vector<1x8x8xf32> to vector<8x8xf32>
    %cst_51 = arith.constant dense<0.000000e+00> : vector<8x384xf32>
    %59 = tpu.matmul %58, %56, %cst_51 {dimension_numbers = #tpu.dot_dimension_numbers<[1], [0], [0], [1], [0, 0, 1, 1], [], []>, precision = #tpu.contract_precision<fp32>} : vector<8x8xf32>, vector<8x384xf32>, vector<8x384xf32> -> vector<8x384xf32>
    %c0_52 = arith.constant 0 : index
    %c110_53 = arith.constant 110 : index
    %60 = vector.load %arg10[%c0_52, %c110_53] : memref<8x640xf32, #tpu.memory_space<vmem>>, vector<8x384xf32>
    %c1_54 = arith.constant 1 : index
    %c0_55 = arith.constant 0 : index
    %c0_56 = arith.constant 0 : index
    %61 = vector.load %arg4[%c1_54, %c0_55, %c0_56] : memref<9x8x8xf32, #tpu.memory_space<vmem>>, vector<1x8x8xf32>
    %62 = vector.shape_cast %61 : vector<1x8x8xf32> to vector<8x8xf32>
    %cst_57 = arith.constant dense<0.000000e+00> : vector<8x384xf32>
    %63 = tpu.matmul %62, %60, %cst_57 {dimension_numbers = #tpu.dot_dimension_numbers<[1], [0], [0], [1], [0, 0, 1, 1], [], []>, precision = #tpu.contract_precision<fp32>} : vector<8x8xf32>, vector<8x384xf32>, vector<8x384xf32> -> vector<8x384xf32>
    %64 = arith.addf %59, %63 : vector<8x384xf32>
    %c0_58 = arith.constant 0 : index
    %c111_59 = arith.constant 111 : index
    %65 = vector.load %arg10[%c0_58, %c111_59] : memref<8x640xf32, #tpu.memory_space<vmem>>, vector<8x384xf32>
    %c2_60 = arith.constant 2 : index
    %c0_61 = arith.constant 0 : index
    %c0_62 = arith.constant 0 : index
    %66 = vector.load %arg4[%c2_60, %c0_61, %c0_62] : memref<9x8x8xf32, #tpu.memory_space<vmem>>, vector<1x8x8xf32>
    %67 = vector.shape_cast %66 : vector<1x8x8xf32> to vector<8x8xf32>
    %cst_63 = arith.constant dense<0.000000e+00> : vector<8x384xf32>
    %68 = tpu.matmul %67, %65, %cst_63 {dimension_numbers = #tpu.dot_dimension_numbers<[1], [0], [0], [1], [0, 0, 1, 1], [], []>, precision = #tpu.contract_precision<fp32>} : vector<8x8xf32>, vector<8x384xf32>, vector<8x384xf32> -> vector<8x384xf32>
    %69 = arith.addf %64, %68 : vector<8x384xf32>
    %c0_64 = arith.constant 0 : index
    %c127_65 = arith.constant 127 : index
    %70 = vector.load %arg10[%c0_64, %c127_65] : memref<8x640xf32, #tpu.memory_space<vmem>>, vector<8x384xf32>
    %c3_66 = arith.constant 3 : index
    %c0_67 = arith.constant 0 : index
    %c0_68 = arith.constant 0 : index
    %71 = vector.load %arg4[%c3_66, %c0_67, %c0_68] : memref<9x8x8xf32, #tpu.memory_space<vmem>>, vector<1x8x8xf32>
    %72 = vector.shape_cast %71 : vector<1x8x8xf32> to vector<8x8xf32>
    %cst_69 = arith.constant dense<0.000000e+00> : vector<8x384xf32>
    %73 = tpu.matmul %72, %70, %cst_69 {dimension_numbers = #tpu.dot_dimension_numbers<[1], [0], [0], [1], [0, 0, 1, 1], [], []>, precision = #tpu.contract_precision<fp32>} : vector<8x8xf32>, vector<8x384xf32>, vector<8x384xf32> -> vector<8x384xf32>
    %74 = arith.addf %69, %73 : vector<8x384xf32>
    %c0_70 = arith.constant 0 : index
    %c128_71 = arith.constant 128 : index
    %75 = vector.load %arg10[%c0_70, %c128_71] : memref<8x640xf32, #tpu.memory_space<vmem>>, vector<8x384xf32>
    %c4_72 = arith.constant 4 : index
    %c0_73 = arith.constant 0 : index
    %c0_74 = arith.constant 0 : index
    %76 = vector.load %arg4[%c4_72, %c0_73, %c0_74] : memref<9x8x8xf32, #tpu.memory_space<vmem>>, vector<1x8x8xf32>
    %77 = vector.shape_cast %76 : vector<1x8x8xf32> to vector<8x8xf32>
    %cst_75 = arith.constant dense<0.000000e+00> : vector<8x384xf32>
    %78 = tpu.matmul %77, %75, %cst_75 {dimension_numbers = #tpu.dot_dimension_numbers<[1], [0], [0], [1], [0, 0, 1, 1], [], []>, precision = #tpu.contract_precision<fp32>} : vector<8x8xf32>, vector<8x384xf32>, vector<8x384xf32> -> vector<8x384xf32>
    %79 = arith.addf %74, %78 : vector<8x384xf32>
    %c0_76 = arith.constant 0 : index
    %c129_77 = arith.constant 129 : index
    %80 = vector.load %arg10[%c0_76, %c129_77] : memref<8x640xf32, #tpu.memory_space<vmem>>, vector<8x384xf32>
    %c5_78 = arith.constant 5 : index
    %c0_79 = arith.constant 0 : index
    %c0_80 = arith.constant 0 : index
    %81 = vector.load %arg4[%c5_78, %c0_79, %c0_80] : memref<9x8x8xf32, #tpu.memory_space<vmem>>, vector<1x8x8xf32>
    %82 = vector.shape_cast %81 : vector<1x8x8xf32> to vector<8x8xf32>
    %cst_81 = arith.constant dense<0.000000e+00> : vector<8x384xf32>
    %83 = tpu.matmul %82, %80, %cst_81 {dimension_numbers = #tpu.dot_dimension_numbers<[1], [0], [0], [1], [0, 0, 1, 1], [], []>, precision = #tpu.contract_precision<fp32>} : vector<8x8xf32>, vector<8x384xf32>, vector<8x384xf32> -> vector<8x384xf32>
    %84 = arith.addf %79, %83 : vector<8x384xf32>
    %c0_82 = arith.constant 0 : index
    %c145_83 = arith.constant 145 : index
    %85 = vector.load %arg10[%c0_82, %c145_83] : memref<8x640xf32, #tpu.memory_space<vmem>>, vector<8x384xf32>
    %c6_84 = arith.constant 6 : index
    %c0_85 = arith.constant 0 : index
    %c0_86 = arith.constant 0 : index
    %86 = vector.load %arg4[%c6_84, %c0_85, %c0_86] : memref<9x8x8xf32, #tpu.memory_space<vmem>>, vector<1x8x8xf32>
    %87 = vector.shape_cast %86 : vector<1x8x8xf32> to vector<8x8xf32>
    %cst_87 = arith.constant dense<0.000000e+00> : vector<8x384xf32>
    %88 = tpu.matmul %87, %85, %cst_87 {dimension_numbers = #tpu.dot_dimension_numbers<[1], [0], [0], [1], [0, 0, 1, 1], [], []>, precision = #tpu.contract_precision<fp32>} : vector<8x8xf32>, vector<8x384xf32>, vector<8x384xf32> -> vector<8x384xf32>
    %89 = arith.addf %84, %88 : vector<8x384xf32>
    %c0_88 = arith.constant 0 : index
    %c146_89 = arith.constant 146 : index
    %90 = vector.load %arg10[%c0_88, %c146_89] : memref<8x640xf32, #tpu.memory_space<vmem>>, vector<8x384xf32>
    %c7_90 = arith.constant 7 : index
    %c0_91 = arith.constant 0 : index
    %c0_92 = arith.constant 0 : index
    %91 = vector.load %arg4[%c7_90, %c0_91, %c0_92] : memref<9x8x8xf32, #tpu.memory_space<vmem>>, vector<1x8x8xf32>
    %92 = vector.shape_cast %91 : vector<1x8x8xf32> to vector<8x8xf32>
    %cst_93 = arith.constant dense<0.000000e+00> : vector<8x384xf32>
    %93 = tpu.matmul %92, %90, %cst_93 {dimension_numbers = #tpu.dot_dimension_numbers<[1], [0], [0], [1], [0, 0, 1, 1], [], []>, precision = #tpu.contract_precision<fp32>} : vector<8x8xf32>, vector<8x384xf32>, vector<8x384xf32> -> vector<8x384xf32>
    %94 = arith.addf %89, %93 : vector<8x384xf32>
    %c0_94 = arith.constant 0 : index
    %c147_95 = arith.constant 147 : index
    %95 = vector.load %arg10[%c0_94, %c147_95] : memref<8x640xf32, #tpu.memory_space<vmem>>, vector<8x384xf32>
    %c8_96 = arith.constant 8 : index
    %c0_97 = arith.constant 0 : index
    %c0_98 = arith.constant 0 : index
    %96 = vector.load %arg4[%c8_96, %c0_97, %c0_98] : memref<9x8x8xf32, #tpu.memory_space<vmem>>, vector<1x8x8xf32>
    %97 = vector.shape_cast %96 : vector<1x8x8xf32> to vector<8x8xf32>
    %cst_99 = arith.constant dense<0.000000e+00> : vector<8x384xf32>
    %98 = tpu.matmul %97, %95, %cst_99 {dimension_numbers = #tpu.dot_dimension_numbers<[1], [0], [0], [1], [0, 0, 1, 1], [], []>, precision = #tpu.contract_precision<fp32>} : vector<8x8xf32>, vector<8x384xf32>, vector<8x384xf32> -> vector<8x384xf32>
    %99 = arith.addf %94, %98 : vector<8x384xf32>
    %c0_100 = arith.constant 0 : index
    %c0_101 = arith.constant 0 : index
    %100 = vector.load %arg5[%c0_100, %c0_101] : memref<8x1xf32, #tpu.memory_space<vmem>>, vector<8x1xf32>
    %101 = vector.broadcast %100 : vector<8x1xf32> to vector<8x384xf32>
    %102 = arith.addf %99, %101 : vector<8x384xf32>
    %cst_102 = arith.constant 0.000000e+00 : f32
    %103 = vector.broadcast %cst_102 : f32 to vector<8x384xf32>
    %104 = arith.maximumf %102, %103 : vector<8x384xf32>
    %105 = vector.broadcast %0 : vector<1x384xf32> to vector<8x384xf32>
    %106 = arith.mulf %104, %105 : vector<8x384xf32>
    %cst_103 = arith.constant 0.000000e+00 : f32
    %107 = vector.broadcast %cst_103 : f32 to vector<8x128xf32>
    %c0_104 = arith.constant 0 : index
    %c0_105 = arith.constant 0 : index
    %108 = vector.load %arg11[%c0_104, %c0_105] : memref<8x640xf32, #tpu.memory_space<vmem>>, vector<8x128xf32>
    tpu.vector_store %arg11[%c0_104, %c0_105], %107 {strides = array<i32>} : memref<8x640xf32, #tpu.memory_space<vmem>>, vector<8x128xf32>,
    %c0_106 = arith.constant 0 : index
    %c512_107 = arith.constant 512 : index
    %109 = vector.load %arg11[%c0_106, %c512_107] : memref<8x640xf32, #tpu.memory_space<vmem>>, vector<8x128xf32>
    tpu.vector_store %arg11[%c0_106, %c512_107], %107 {strides = array<i32>} : memref<8x640xf32, #tpu.memory_space<vmem>>, vector<8x128xf32>,
    %c0_108 = arith.constant 0 : index
    %c128_109 = arith.constant 128 : index
    %110 = vector.load %arg11[%c0_108, %c128_109] : memref<8x640xf32, #tpu.memory_space<vmem>>, vector<8x384xf32>
    tpu.vector_store %arg11[%c0_108, %c128_109], %106 {strides = array<i32>} : memref<8x640xf32, #tpu.memory_space<vmem>>, vector<8x384xf32>,
    %c0_110 = arith.constant 0 : index
    %c109_111 = arith.constant 109 : index
    %111 = vector.load %arg11[%c0_110, %c109_111] : memref<8x640xf32, #tpu.memory_space<vmem>>, vector<8x384xf32>
    %c0_112 = arith.constant 0 : index
    %c0_113 = arith.constant 0 : index
    %c0_114 = arith.constant 0 : index
    %112 = vector.load %arg6[%c0_112, %c0_113, %c0_114] : memref<9x8x8xf32, #tpu.memory_space<vmem>>, vector<1x8x8xf32>
    %113 = vector.shape_cast %112 : vector<1x8x8xf32> to vector<8x8xf32>
    %cst_115 = arith.constant dense<0.000000e+00> : vector<8x384xf32>
    %114 = tpu.matmul %113, %111, %cst_115 {dimension_numbers = #tpu.dot_dimension_numbers<[1], [0], [0], [1], [0, 0, 1, 1], [], []>, precision = #tpu.contract_precision<fp32>} : vector<8x8xf32>, vector<8x384xf32>, vector<8x384xf32> -> vector<8x384xf32>
    %c0_116 = arith.constant 0 : index
    %c110_117 = arith.constant 110 : index
    %115 = vector.load %arg11[%c0_116, %c110_117] : memref<8x640xf32, #tpu.memory_space<vmem>>, vector<8x384xf32>
    %c1_118 = arith.constant 1 : index
    %c0_119 = arith.constant 0 : index
    %c0_120 = arith.constant 0 : index
    %116 = vector.load %arg6[%c1_118, %c0_119, %c0_120] : memref<9x8x8xf32, #tpu.memory_space<vmem>>, vector<1x8x8xf32>
    %117 = vector.shape_cast %116 : vector<1x8x8xf32> to vector<8x8xf32>
    %cst_121 = arith.constant dense<0.000000e+00> : vector<8x384xf32>
    %118 = tpu.matmul %117, %115, %cst_121 {dimension_numbers = #tpu.dot_dimension_numbers<[1], [0], [0], [1], [0, 0, 1, 1], [], []>, precision = #tpu.contract_precision<fp32>} : vector<8x8xf32>, vector<8x384xf32>, vector<8x384xf32> -> vector<8x384xf32>
    %119 = arith.addf %114, %118 : vector<8x384xf32>
    %c0_122 = arith.constant 0 : index
    %c111_123 = arith.constant 111 : index
    %120 = vector.load %arg11[%c0_122, %c111_123] : memref<8x640xf32, #tpu.memory_space<vmem>>, vector<8x384xf32>
    %c2_124 = arith.constant 2 : index
    %c0_125 = arith.constant 0 : index
    %c0_126 = arith.constant 0 : index
    %121 = vector.load %arg6[%c2_124, %c0_125, %c0_126] : memref<9x8x8xf32, #tpu.memory_space<vmem>>, vector<1x8x8xf32>
    %122 = vector.shape_cast %121 : vector<1x8x8xf32> to vector<8x8xf32>
    %cst_127 = arith.constant dense<0.000000e+00> : vector<8x384xf32>
    %123 = tpu.matmul %122, %120, %cst_127 {dimension_numbers = #tpu.dot_dimension_numbers<[1], [0], [0], [1], [0, 0, 1, 1], [], []>, precision = #tpu.contract_precision<fp32>} : vector<8x8xf32>, vector<8x384xf32>, vector<8x384xf32> -> vector<8x384xf32>
    %124 = arith.addf %119, %123 : vector<8x384xf32>
    %c0_128 = arith.constant 0 : index
    %c127_129 = arith.constant 127 : index
    %125 = vector.load %arg11[%c0_128, %c127_129] : memref<8x640xf32, #tpu.memory_space<vmem>>, vector<8x384xf32>
    %c3_130 = arith.constant 3 : index
    %c0_131 = arith.constant 0 : index
    %c0_132 = arith.constant 0 : index
    %126 = vector.load %arg6[%c3_130, %c0_131, %c0_132] : memref<9x8x8xf32, #tpu.memory_space<vmem>>, vector<1x8x8xf32>
    %127 = vector.shape_cast %126 : vector<1x8x8xf32> to vector<8x8xf32>
    %cst_133 = arith.constant dense<0.000000e+00> : vector<8x384xf32>
    %128 = tpu.matmul %127, %125, %cst_133 {dimension_numbers = #tpu.dot_dimension_numbers<[1], [0], [0], [1], [0, 0, 1, 1], [], []>, precision = #tpu.contract_precision<fp32>} : vector<8x8xf32>, vector<8x384xf32>, vector<8x384xf32> -> vector<8x384xf32>
    %129 = arith.addf %124, %128 : vector<8x384xf32>
    %c0_134 = arith.constant 0 : index
    %c128_135 = arith.constant 128 : index
    %130 = vector.load %arg11[%c0_134, %c128_135] : memref<8x640xf32, #tpu.memory_space<vmem>>, vector<8x384xf32>
    %c4_136 = arith.constant 4 : index
    %c0_137 = arith.constant 0 : index
    %c0_138 = arith.constant 0 : index
    %131 = vector.load %arg6[%c4_136, %c0_137, %c0_138] : memref<9x8x8xf32, #tpu.memory_space<vmem>>, vector<1x8x8xf32>
    %132 = vector.shape_cast %131 : vector<1x8x8xf32> to vector<8x8xf32>
    %cst_139 = arith.constant dense<0.000000e+00> : vector<8x384xf32>
    %133 = tpu.matmul %132, %130, %cst_139 {dimension_numbers = #tpu.dot_dimension_numbers<[1], [0], [0], [1], [0, 0, 1, 1], [], []>, precision = #tpu.contract_precision<fp32>} : vector<8x8xf32>, vector<8x384xf32>, vector<8x384xf32> -> vector<8x384xf32>
    %134 = arith.addf %129, %133 : vector<8x384xf32>
    %c0_140 = arith.constant 0 : index
    %c129_141 = arith.constant 129 : index
    %135 = vector.load %arg11[%c0_140, %c129_141] : memref<8x640xf32, #tpu.memory_space<vmem>>, vector<8x384xf32>
    %c5_142 = arith.constant 5 : index
    %c0_143 = arith.constant 0 : index
    %c0_144 = arith.constant 0 : index
    %136 = vector.load %arg6[%c5_142, %c0_143, %c0_144] : memref<9x8x8xf32, #tpu.memory_space<vmem>>, vector<1x8x8xf32>
    %137 = vector.shape_cast %136 : vector<1x8x8xf32> to vector<8x8xf32>
    %cst_145 = arith.constant dense<0.000000e+00> : vector<8x384xf32>
    %138 = tpu.matmul %137, %135, %cst_145 {dimension_numbers = #tpu.dot_dimension_numbers<[1], [0], [0], [1], [0, 0, 1, 1], [], []>, precision = #tpu.contract_precision<fp32>} : vector<8x8xf32>, vector<8x384xf32>, vector<8x384xf32> -> vector<8x384xf32>
    %139 = arith.addf %134, %138 : vector<8x384xf32>
    %c0_146 = arith.constant 0 : index
    %c145_147 = arith.constant 145 : index
    %140 = vector.load %arg11[%c0_146, %c145_147] : memref<8x640xf32, #tpu.memory_space<vmem>>, vector<8x384xf32>
    %c6_148 = arith.constant 6 : index
    %c0_149 = arith.constant 0 : index
    %c0_150 = arith.constant 0 : index
    %141 = vector.load %arg6[%c6_148, %c0_149, %c0_150] : memref<9x8x8xf32, #tpu.memory_space<vmem>>, vector<1x8x8xf32>
    %142 = vector.shape_cast %141 : vector<1x8x8xf32> to vector<8x8xf32>
    %cst_151 = arith.constant dense<0.000000e+00> : vector<8x384xf32>
    %143 = tpu.matmul %142, %140, %cst_151 {dimension_numbers = #tpu.dot_dimension_numbers<[1], [0], [0], [1], [0, 0, 1, 1], [], []>, precision = #tpu.contract_precision<fp32>} : vector<8x8xf32>, vector<8x384xf32>, vector<8x384xf32> -> vector<8x384xf32>
    %144 = arith.addf %139, %143 : vector<8x384xf32>
    %c0_152 = arith.constant 0 : index
    %c146_153 = arith.constant 146 : index
    %145 = vector.load %arg11[%c0_152, %c146_153] : memref<8x640xf32, #tpu.memory_space<vmem>>, vector<8x384xf32>
    %c7_154 = arith.constant 7 : index
    %c0_155 = arith.constant 0 : index
    %c0_156 = arith.constant 0 : index
    %146 = vector.load %arg6[%c7_154, %c0_155, %c0_156] : memref<9x8x8xf32, #tpu.memory_space<vmem>>, vector<1x8x8xf32>
    %147 = vector.shape_cast %146 : vector<1x8x8xf32> to vector<8x8xf32>
    %cst_157 = arith.constant dense<0.000000e+00> : vector<8x384xf32>
    %148 = tpu.matmul %147, %145, %cst_157 {dimension_numbers = #tpu.dot_dimension_numbers<[1], [0], [0], [1], [0, 0, 1, 1], [], []>, precision = #tpu.contract_precision<fp32>} : vector<8x8xf32>, vector<8x384xf32>, vector<8x384xf32> -> vector<8x384xf32>
    %149 = arith.addf %144, %148 : vector<8x384xf32>
    %c0_158 = arith.constant 0 : index
    %c147_159 = arith.constant 147 : index
    %150 = vector.load %arg11[%c0_158, %c147_159] : memref<8x640xf32, #tpu.memory_space<vmem>>, vector<8x384xf32>
    %c8_160 = arith.constant 8 : index
    %c0_161 = arith.constant 0 : index
    %c0_162 = arith.constant 0 : index
    %151 = vector.load %arg6[%c8_160, %c0_161, %c0_162] : memref<9x8x8xf32, #tpu.memory_space<vmem>>, vector<1x8x8xf32>
    %152 = vector.shape_cast %151 : vector<1x8x8xf32> to vector<8x8xf32>
    %cst_163 = arith.constant dense<0.000000e+00> : vector<8x384xf32>
    %153 = tpu.matmul %152, %150, %cst_163 {dimension_numbers = #tpu.dot_dimension_numbers<[1], [0], [0], [1], [0, 0, 1, 1], [], []>, precision = #tpu.contract_precision<fp32>} : vector<8x8xf32>, vector<8x384xf32>, vector<8x384xf32> -> vector<8x384xf32>
    %154 = arith.addf %149, %153 : vector<8x384xf32>
    %c0_164 = arith.constant 0 : index
    %c0_165 = arith.constant 0 : index
    %155 = vector.load %arg7[%c0_164, %c0_165] : memref<8x1xf32, #tpu.memory_space<vmem>>, vector<8x1xf32>
    %156 = vector.broadcast %155 : vector<8x1xf32> to vector<8x384xf32>
    %157 = arith.addf %154, %156 : vector<8x384xf32>
    %cst_166 = arith.constant 0.000000e+00 : f32
    %158 = vector.broadcast %cst_166 : f32 to vector<8x384xf32>
    %159 = arith.subf %158, %157 : vector<8x384xf32>
    %160 = math.exp %159 : vector<8x384xf32>
    %cst_167 = arith.constant 1.000000e+00 : f32
    %161 = vector.broadcast %cst_167 : f32 to vector<8x384xf32>
    %162 = arith.addf %161, %160 : vector<8x384xf32>
    %cst_168 = arith.constant 1.000000e+00 : f32
    %163 = vector.broadcast %cst_168 : f32 to vector<8x384xf32>
    %164 = arith.divf %163, %162 : vector<8x384xf32>
    %c0_169 = arith.constant 0 : index
    %c128_170 = arith.constant 128 : index
    %165 = vector.load %arg1[%c0_169, %c128_170] : memref<8x640xf32, #tpu.memory_space<vmem>>, vector<4x384xf32>
    %c4_171 = arith.constant 4 : index
    %c128_172 = arith.constant 128 : index
    %166 = vector.load %arg1[%c4_171, %c128_172] : memref<8x640xf32, #tpu.memory_space<vmem>>, vector<4x384xf32>
    %167 = vector.extract_strided_slice %164 {offsets = [0, 0], sizes = [1, 384], strides = [1, 1]} : vector<8x384xf32> to vector<1x384xf32>
    %168 = vector.broadcast %167 : vector<1x384xf32> to vector<4x384xf32>
    %169 = arith.mulf %165, %168 : vector<4x384xf32>
    %170 = vector.extract_strided_slice %164 {offsets = [1, 0], sizes = [1, 384], strides = [1, 1]} : vector<8x384xf32> to vector<1x384xf32>
    %171 = vector.broadcast %170 : vector<1x384xf32> to vector<4x384xf32>
    %172 = arith.mulf %166, %171 : vector<4x384xf32>
    %173 = arith.addf %169, %172 : vector<4x384xf32>
    %c0_173 = arith.constant 0 : index
    %c0_174 = arith.constant 0 : index
    %c0_175 = arith.constant 0 : index
    %174 = vector.load %arg9[%c0_173, %c0_174, %c0_175] : memref<1x4x384xf32, #tpu.memory_space<vmem>>, vector<1x4x384xf32>
    %175 = vector.shape_cast %174 : vector<1x4x384xf32> to vector<4x384xf32>
    %176 = vector.shape_cast %173 : vector<4x384xf32> to vector<1x4x384xf32>
    tpu.vector_store %arg9[%c0_173, %c0_174, %c0_175], %176 {strides = array<i32>} : memref<1x4x384xf32, #tpu.memory_space<vmem>>, vector<1x4x384xf32>,
    return
  }
  func.func @transform_0(%arg0: i32) -> (i32, i32) {
    %c0_i32 = arith.constant 0 : i32
    %c0_i32_0 = arith.constant 0 : i32
    return %arg0, %c0_i32 : i32, i32
  }
  func.func @transform_1(%arg0: i32) -> (i32, i32, i32) {
    %c0_i32 = arith.constant 0 : i32
    %c0_i32_0 = arith.constant 0 : i32
    %c0_i32_1 = arith.constant 0 : i32
    %c0_i32_2 = arith.constant 0 : i32
    return %c0_i32, %c0_i32_0, %c0_i32_1 : i32, i32, i32
  }
  func.func @transform_2(%arg0: i32) -> (i32, i32) {
    %c0_i32 = arith.constant 0 : i32
    %c0_i32_0 = arith.constant 0 : i32
    %c0_i32_1 = arith.constant 0 : i32
    return %c0_i32, %c0_i32_0 : i32, i32
  }
  func.func @transform_3(%arg0: i32) -> (i32, i32, i32) {
    %c0_i32 = arith.constant 0 : i32
    %c0_i32_0 = arith.constant 0 : i32
    %c0_i32_1 = arith.constant 0 : i32
    %c0_i32_2 = arith.constant 0 : i32
    return %c0_i32, %c0_i32_0, %c0_i32_1 : i32, i32, i32
  }
  func.func @transform_4(%arg0: i32) -> (i32, i32) {
    %c0_i32 = arith.constant 0 : i32
    %c0_i32_0 = arith.constant 0 : i32
    %c0_i32_1 = arith.constant 0 : i32
    return %c0_i32, %c0_i32_0 : i32, i32
  }
  func.func @transform_5(%arg0: i32) -> (i32, i32, i32) {
    %c0_i32 = arith.constant 0 : i32
    %c0_i32_0 = arith.constant 0 : i32
    %c0_i32_1 = arith.constant 0 : i32
    %c0_i32_2 = arith.constant 0 : i32
    return %c0_i32, %c0_i32_0, %c0_i32_1 : i32, i32, i32
  }
  func.func @transform_6(%arg0: i32) -> (i32, i32) {
    %c0_i32 = arith.constant 0 : i32
    %c0_i32_0 = arith.constant 0 : i32
    %c0_i32_1 = arith.constant 0 : i32
    return %c0_i32, %c0_i32_0 : i32, i32
  }
  func.func @transform_7(%arg0: i32) -> (i32, i32) {
    %c0_i32 = arith.constant 0 : i32
    %c0_i32_0 = arith.constant 0 : i32
    %c0_i32_1 = arith.constant 0 : i32
    return %c0_i32, %c0_i32_0 : i32, i32
  }
  func.func @transform_8(%arg0: i32) -> (i32, i32, i32) {
    %c0_i32 = arith.constant 0 : i32
    %c0_i32_0 = arith.constant 0 : i32
    %c0_i32_1 = arith.constant 0 : i32
    return %arg0, %c0_i32, %c0_i32_0 : i32, i32, i32
  }
}

</mosaic_0001>

<bundles_post_ra>
// kernel: tpu_custom_call.1
= control target key start
LH: loop header
LB: loop body
LE: loop exit
PB: predicated region body
PF: predicated region fallthrough
CT: control target
= control target key end

     0   :  { %13 = vsyncpa [#allocation5], 0  ;;  %s30184_s0 = inlined_call_operand.vmem [shape: f32[16,640], index: 0, kind: input, shape index: {}]   ;;  %s30185_s1 = inlined_call_operand.vmem [shape: f32[9,8,8], index: 1, kind: input, shape index: {}]   ;;  %s30186_s2 = inlined_call_operand.vmem [shape: f32[8,1], index: 2, kind: input, shape index: {}]   ;;  %s30187_s3 = inlined_call_operand.vmem [shape: f32[9,8,8], index: 3, kind: input, shape index: {}]   ;;  %s30188_s4 = inlined_call_operand.vmem [shape: f32[8,1], index: 4, kind: input, shape index: {}]   ;;  %s30189_s5 = inlined_call_operand.vmem [shape: f32[9,8,8], index: 5, kind: input, shape index: {}]   ;;  %s30190_s6 = inlined_call_operand.vmem [shape: f32[8,1], index: 6, kind: input, shape index: {}]   ;;  %s30191_s7 = inlined_call_operand.vmem [shape: f32[1,384], index: 7, kind: input, shape index: {}]   ;;  %s30192_s8 = inlined_call_operand.hbm [shape: f32[2,4,384], index: 8, kind: output, shape index: {}]  }
   0x1   :  { %15 = vsyncpa [#allocation5 + $0x1], 0  ;;  %s27373_s27 = smov 0   ;;  %s27375_s28 = smov 0  }
   0x2   :  { %s27377_s29 = smov 0   ;;  %s27379_s30 = smov 0  }
   0x3 LB: > { %s27394_s9 = sadd.s32 4294967295, %s27314_s30   ;;  %s25701_s10 = sadd.s32 4294967294, %s27314_s30   ;;  %s27314_s30 = sphi %s27379_s30, %s30198_s30   ;;  %s27310_s29 = sphi %s27377_s29, %s30197_s29   ;;  %s27306_s28 = sphi %s27375_s28, %s30196_s28   ;;  %s27302_s27 = sphi %s27373_s27, %s30195_s27  }
   0x4   : > { %s27398_s11 = sadd.s32 1, %s27314_s30   ;;  %s201_s12 = sadd.s32 1, %s27310_s29 }
   0x5   : > { %s198_s13 = ssub.s32 %s27314_s30, %s27398_s11  ;;  %p211_p0 = scmp.ne.s32.totalorder %s27310_s29, %s27306_s28 }
   0x6   : > { %p199_p1 = scmp.eq.s32.totalorder %s198_s13, 0  ;;  %p212_p2 = scmp.eq.s32.totalorder %s27394_s9, 1 }
   0x7   : > { %p217_p3 = scmp.ne.s32.totalorder %s27306_s28, %s27302_s27  ;;  %p218_p4 = scmp.eq.s32.totalorder %s25701_s10, 1 }
   0x8   : > { %s27409_s14 = scalar_select %p199_p1, %s27310_s29, %s201_s12  }
   0x9   : > { %p27411_p5 = por %p212_p2, %p211_p0  ;;  %p27415_p6 = por %p218_p4, %p217_p3 }
   0xa   : > { %p25704_p7 = scmp.ge.s32.totalorder %s27314_s30, 1  ;;  %p265_p8 = scmp.lt.s32.totalorder %s27314_s30, 3 }
   0xc   : > { %p266_p9 = pnand %p25704_p7, %p265_p8 }
   0xd   : > { %p299_p10 = scmp.lt.s32.totalorder (!%p266_p9), %s27394_s9, 1  ;;  %v27316_v0 = vmov (!%p266_p9), 0.0   ;;  %s27317_s22 = smov (!%p266_p9), 18   ;;  %vm27325_vm0 = vmmov (!%p266_p9), 0   ;;  %v25706_v6 = vld [vmem:[%s30185_s1 + $0x8] sm:$0xff] (!%p266_p9)  ;;  %vm331_vm1 = vcmask (!%p266_p9), 64512  }
   0xe   : > { %269 = sbr.rel (%p266_p9) target bundleno = 2372 (0x944), region = 52  ;;  %401 = vmatprep.mubr.f32.mxu0 (!%p266_p9), %v27316_v0  ;;  %26057 = vmatprep.subr.mxu1 (!%p266_p9), %v27316_v0  ;;  %s27318_s23 = smov (!%p266_p9), 19   ;;  %v333_v7 = vsel (!%p266_p9), %vm331_vm1, %v25706_v6, 0  ;;  %vm324_vm2 = vcmask (!%p266_p9), 146432   ;;  %vm2185_vm3 = vcmask (!%p266_p9), 138240   ;;  %vm3119_vm4 = vcmask (!%p266_p9), 7168  }
   0xf   : > { %s27319_s24 = smov (!%p266_p9), 17   ;;  %s27320_s25 = smov (!%p266_p9), 1   ;;  %26059 = vmatprep.mubr.msk.f32.mxu1 (!%p266_p9), %vm27325_vm0, %v27316_v0  ;;  %v27503_v8 = vand.u32 (!%p266_p9), 4294901760, %v333_v7  ;;  %vm1254_vm5 = vcmask (!%p266_p9), 154624   ;;  %vm4980_vm6 = vcmask (!%p266_p9), 1039360   ;;  %vm5914_vm7 = vcmask (!%p266_p9), 908288  }
  0x10   : > { %s27321_s26 = smov (!%p266_p9), 127   ;;  %s27322_s10 = smov (!%p266_p9), 111   ;;  %v309_v49 = vld [vmem:[%s30185_s1] sm:$0xff] (!%p266_p9)  ;;  %vm6848_vm8 = vcmask (!%p266_p9), 900096   ;;  %vm7782_vm9 = vcmask (!%p266_p9), 891904  }
  0x11   : > { %s27323_s12 = smov (!%p266_p9), 110   ;;  %s27324_s13 = smov (!%p266_p9), 109   ;;  %v27506_v9 = vsub.f32 (!%p266_p9), %v333_v7, %v27503_v8  ;;  %v1262_v51 = vsel (!%p266_p9), %vm331_vm1, %v309_v49, 0 }
  0x12   : > { %v27584_v56 = vand.u32 (!%p266_p9), 4294901760, %v1262_v51  ;;  %s296_s19 = sand.u32 (!%p266_p9), 1, %s27306_s28  }
  0x13   : > { %v27509_v10 = vand.u32 (!%p266_p9), 4294901760, %v27506_v9  ;;  %s27185_s20 = smul.u32 (!%p266_p9), 12, %s296_s19 }
  0x14   : > { %v27597_v62 = vsub.f32 (!%p266_p9), %v1262_v51, %v27584_v56 }
  0x15   : > { %s300_s17 = scalar_select %p299_p10, %s27394_s9, 1  ;;  %v405_v15 = vsub.f32 %v27506_v9, %v27509_v10 }
  0x17   : > { %s27186_s18 = smul.u32 40, %s300_s17  ;;  %v27521_v21 = vand.u32 4294901760, %v405_v15  ;;  %s30123_s17 = scalar_lea.vmem [#allocation4], %s27185_s20 }
  0x19   : > { %s27428_s21 = scalar_lea.vmem %s30184_s0, %s27186_s18  ;;  %s27187_s18 = smul.u32 192, %s27394_s9 }
  0x1a   : > { %v27431_v1 = vld [vmem:[%s27428_s21 + $0x8] sm:$0xff]  ;;  %v305_v2 = vld [vmem:[%s27428_s21] sm:$0xff]  ;;  %v27438_v3 = vld [vmem:[%s27428_s21 + $0x10] sm:$0xff]  ;;  %s27327_s9 = smov [#allocation4]  }
  0x1b   : > { %318 = vrot.lane.b32.xlu0 %v27431_v1, %s27317_s22  ;;  %316 = vrot.lane.b32.xlu1 %v305_v2, %s27317_s22  ;;  %v27458_v4 = vld [vmem:[%s27428_s21 + $0x18] sm:$0xff]  ;;  %v4965_v5 = vld [vmem:[%s27428_s21 + $0x20] sm:$0xff] }
  0x1f   : > { %320 = vrot.lane.b32.xlu0 %v27438_v3, %s27317_s22  ;;  %1248 = vrot.lane.b32.xlu1 %v27431_v1, %s27318_s23 }
  0x23   : > { %1250 = vrot.lane.b32.xlu0 %v27438_v3, %s27318_s23  ;;  %1246 = vrot.lane.b32.xlu1 %v305_v2, %s27318_s23 }
  0x27   : > { %2179 = vrot.lane.b32.xlu0 %v27431_v1, %s27319_s24  ;;  %2181 = vrot.lane.b32.xlu1 %v27438_v3, %s27319_s24 }
  0x2b   : > { %2177 = vrot.lane.b32.xlu0 %v305_v2, %s27319_s24  ;;  %3113 = vrot.lane.b32.xlu1 %v27431_v1, %s27320_s25 }
  0x2f   : > { %3115 = vrot.lane.b32.xlu0 %v27438_v3, %s27320_s25  ;;  %3111 = vrot.lane.b32.xlu1 %v305_v2, %s27320_s25 }
  0x33   : > { %4974 = vrot.lane.b32.xlu0 %v27438_v3, %s27321_s26  ;;  %4976 = vrot.lane.b32.xlu1 %v27458_v4, %s27321_s26 }
  0x37   : > { %4972 = vrot.lane.b32.xlu0 %v27431_v1, %s27321_s26  ;;  %5908 = vrot.lane.b32.xlu1 %v27438_v3, %s27322_s10 }
  0x3b   : > { %5910 = vrot.lane.b32.xlu0 %v27458_v4, %s27322_s10  ;;  %5906 = vrot.lane.b32.xlu1 %v27431_v1, %s27322_s10 }
  0x3f   : > { %6842 = vrot.lane.b32.xlu0 %v27438_v3, %s27323_s12  ;;  %6844 = vrot.lane.b32.xlu1 %v27458_v4, %s27323_s12 }
  0x43   : > { %6840 = vrot.lane.b32.xlu0 %v27431_v1, %s27323_s12  ;;  %7776 = vrot.lane.b32.xlu1 %v27438_v3, %s27324_s13 }
  0x47   : > { %7778 = vrot.lane.b32.xlu0 %v27458_v4, %s27324_s13  ;;  %7774 = vrot.lane.b32.xlu1 %v27431_v1, %s27324_s13 }
  0x4b   : > { %322 = vrot.lane.b32.xlu0 %v27458_v4, %s27317_s22  ;;  %1252 = vrot.lane.b32.xlu1 %v27458_v4, %s27318_s23 }
  0x4f   : > { %2183 = vrot.lane.b32.xlu0 %v27458_v4, %s27319_s24  ;;  %3117 = vrot.lane.b32.xlu1 %v27458_v4, %s27320_s25 }
  0x53   : > { %4978 = vrot.lane.b32.xlu0 %v4965_v5, %s27321_s26  ;;  %5912 = vrot.lane.b32.xlu1 %v4965_v5, %s27322_s10 }
  0x57   : > { %6846 = vrot.lane.b32.xlu0 %v4965_v5, %s27323_s12 }
  0x5b   : > { %7780 = vrot.lane.b32.xlu0 %v4965_v5, %s27324_s13 }
  0x8d   : > { %v319_v11 = vpop.permute.xlu0 %318  ;;  %v317_v12 = vpop.permute.xlu1 %316 }
  0x8e   : > { %v325_v13 = vsel %vm324_vm2, %v317_v12, %v319_v11 }
  0x8f   : > { %v27512_v14 = vand.u32 4294901760, %v325_v13 }
  0x91   : > { %v420_v16 = vsub.f32 %v325_v13, %v27512_v14  ;;  %v27517_v17 = vpop.permute.xlu0 %320  ;;  %v1249_v18 = vpop.permute.xlu1 %1248 }
  0x92   : > { %v326_v19 = vsel %vm324_vm2, %v319_v11, %v27517_v17  ;;  %v27615_v11 = vand.u32 4294901760, %v27597_v62 }
  0x93   : > { %v335_v20 = vand.u32 4294901760, %v326_v19  ;;  %v421_v22 = vand.u32 4294901760, %v420_v16 }
  0x95   : > { %v414_v23 = vsub.f32 %v326_v19, %v335_v20  ;;  %336 = vmatprep.subr.mxu0 %v335_v20  ;;  %v27523_v24 = vpop.permute.xlu0 %1250  ;;  %v1247_v25 = vpop.permute.xlu1 %1246  ;;  %v422_v27 = vsub.f32 %v420_v16, %v421_v22 }
  0x96   : > { %338 = vmatpush1.msra.mxu0 %v27512_v14  ;;  %v1256_v44 = vsel %vm1254_vm5, %v1249_v18, %v27523_v24  ;;  %v1255_v53 = vsel %vm1254_vm5, %v1247_v25, %v1249_v18  ;;  %v1334_v18 = vsub.f32 %v27597_v62, %v27615_v11 }
  0x97   : > { %407 = vmatmul.mubr.f32.vlgmr.msra.gmra.mrb[0].mxu0 %v27521_v21  ;;  %v415_v26 = vand.u32 4294901760, %v414_v23  ;;  %v423_v32 = vand.u32 4294901760, %v422_v27  ;;  %v27562_v46 = vand.u32 4294901760, %v1256_v44  ;;  %v27586_v57 = vand.u32 4294901760, %v1255_v53 }
  0x98   : > { %487 = vmatprep.mubr.f32.mxu0 %v27316_v0 }
  0x99   : > { %v27528_v28 = vpop.permute.xlu0 %2179  ;;  %v27530_v29 = vpop.permute.xlu1 %2181  ;;  %v416_v30 = vsub.f32 %v414_v23, %v415_v26  ;;  %v27577_v52 = vsub.f32 %v1256_v44, %v27562_v46  ;;  %v27600_v63 = vsub.f32 %v1255_v53, %v27586_v57 }
  0x9b   : > { %v417_v31 = vand.u32 4294901760, %v416_v30  ;;  %v1344_v60 = vand.u32 4294901760, %v27577_v52  ;;  %v1350_v12 = vand.u32 4294901760, %v27600_v63 }
  0x9d   : > { %v2178_v33 = vpop.permute.xlu0 %2177  ;;  %418 = vmatprep.subr.mxu0 %v417_v31  ;;  %v3114_v34 = vpop.permute.xlu1 %3113  ;;  %v1345_v6 = vsub.f32 %v27577_v52, %v1344_v60  ;;  %v1351_v19 = vsub.f32 %v27600_v63, %v1350_v12  ;;  %v2187_v31 = vsel %vm2185_vm3, %v27528_v28, %v27530_v29 }
  0x9e   : > { %v27534_v35 = vsel %vm2185_vm3, %v2178_v33, %v27528_v28  ;;  %424 = vmatpush1.msra.mxu0 %v423_v32  ;;  %v25707_v32 = vld [vmem:[%s30185_s1 + $0x10] sm:$0xff] }
  0x9f   : > { %489 = vmatmul.mubr.f32.vlgmr.msra.gmra.mrb[0].mxu0 %v27503_v8  ;;  %497 = vmatprep.subr.mxu0 %v414_v23  ;;  %v1352_v23 = vand.u32 4294901760, %v1351_v19  ;;  %v2193_v28 = vsel %vm331_vm1, %v25707_v32, 0 }
  0xa0   : > { %500 = vmatpush1.msra.mxu0 %v420_v16  ;;  %563 = vmatprep.mubr.f32.mxu0 %v27316_v0  ;;  %v27693_v44 = vand.u32 4294901760, %v2193_v28 }
  0xa1   : > { %v27538_v36 = vpop.permute.xlu0 %3115  ;;  %573 = vmatprep.subr.mxu0 %v335_v20  ;;  %v3112_v37 = vpop.permute.xlu1 %3111 }
  0xa2   : > { %v27542_v38 = vsel %vm3119_vm4, %v3114_v34, %v27538_v36  ;;  %v27545_v39 = vsel %vm3119_vm4, %v3112_v37, %v3114_v34  ;;  %v27706_v49 = vsub.f32 %v2193_v28, %v27693_v44 }
  0xa5   : > { %v27547_v40 = vpop.permute.xlu0 %4974  ;;  %v27549_v41 = vpop.permute.xlu1 %4976 }
  0xa7   : > { %566 = vmatmul.mubr.f32.vlgmr.msra.gmra.mrb[0].mxu0 %v27506_v9 }
  0xa8   : > { %575 = vmatpush1.msra.mxu0 %v27512_v14  ;;  %638 = vmatprep.mubr.f32.mxu0 %v27316_v0 }
  0xa9   : > { %651 = vmatprep.subr.mxu0 %v415_v26  ;;  %v4973_v42 = vpop.permute.xlu0 %4972  ;;  %v27554_v43 = vpop.permute.xlu1 %5908 }
  0xaa   : > { %v27560_v45 = vsel %vm4980_vm6, %v4973_v42, %v27547_v40 }
  0xad   : > { %v27564_v47 = vpop.permute.xlu0 %5910  ;;  %v5907_v48 = vpop.permute.xlu1 %5906 }
  0xae   : > { %v27571_v50 = vsel %vm5914_vm7, %v5907_v48, %v27554_v43 }
  0xaf   : > { %642 = vmatmul.mubr.f32.vlgmr.msra.gmra.mrb[0].mxu0 %v27509_v10 }
  0xb0   : > { %655 = vmatpush1.msra.mxu0 %v421_v22  ;;  %718 = vmatprep.mubr.f32.mxu0 %v27316_v0  ;;  %v1335_v22 = vand.u32 4294901760, %v1334_v18 }
  0xb1   : > { %727 = vmatprep.subr.mxu0 %v335_v20  ;;  %v27580_v54 = vpop.permute.xlu0 %6842  ;;  %v27582_v55 = vpop.permute.xlu1 %6844 }
  0xb5   : > { %v6841_v58 = vpop.permute.xlu0 %6840  ;;  %v27588_v59 = vpop.permute.xlu1 %7776 }
  0xb6   : > { %v27593_v61 = vsel %vm6848_vm8, %v6841_v58, %v27580_v54 }
  0xb7   : > { %720 = vmatmul.mubr.f32.vlgmr.msra.gmra.mrb[0].mxu0 %v27503_v8 }
  0xb8   : > { %729 = vmatpush1.msra.mxu0 %v27512_v14  ;;  %792 = vmatprep.mubr.f32.mxu0 %v27316_v0  ;;  %v1346_v14 = vand.u32 4294901760, %v1345_v6 }
  0xb9   : > { %v27604_v2 = vpop.permute.xlu0 %7778  ;;  %v7775_v5 = vpop.permute.xlu1 %7774  ;;  %1265 = vmatprep.subr.mxu0 %v27562_v46 }
  0xba   : > { %v27612_v7 = vsel %vm7782_vm9, %v7775_v5, %v27588_v59 }
  0xbd   : > { %v323_v13 = vpop.permute.xlu0 %322  ;;  %v1253_v26 = vpop.permute.xlu1 %1252 }
  0xbe   : > { %v327_v15 = vsel %vm324_vm2, %v27517_v17, %v323_v13  ;;  %v25708_v13 = vld [vmem:[%s30185_s1 + $0x18] sm:$0xff] }
  0xbf   : > { %v801_v16 = vand.u32 4294901760, %v327_v15  ;;  %794 = vmatmul.mubr.f32.vlgmr.msra.gmra.mrb[0].mxu0 %v27503_v8 }
  0xc0   : > { %1267 = vmatpush1.msra.mxu0 %v27586_v57  ;;  %1330 = vmatprep.mubr.f32.mxu0 %v27316_v0 }
  0xc1   : > { %v878_v20 = vsub.f32 %v327_v15, %v801_v16  ;;  %26058 = vmatpush3.msra.mxu1 %v801_v16  ;;  %1347 = vmatprep.subr.mxu0 %v1346_v14  ;;  %v2184_v34 = vpop.permute.xlu0 %2183  ;;  %v3118_v14 = vpop.permute.xlu1 %3117 }
  0xc2   : > { %26060 = vmatmul.mubr.f32.vlgmr.msra.gmra.mrb[0].mxu1 %v27521_v21  ;;  %26062 = vmatprep.subr.mxu1 %v27316_v0  ;;  %v1257_v21 = vsel %vm1254_vm5, %v27523_v24, %v1253_v26  ;;  %v2188_v37 = vsel %vm2185_vm3, %v27530_v29, %v2184_v34  ;;  %v27700_v29 = vand.u32 4294901760, %v27534_v35  ;;  %v3122_v15 = vsel %vm3119_vm4, %v27538_v36, %v3118_v14  ;;  %v25711_v14 = vld [vmem:[%s30185_s1 + $0x30] sm:$0xff] }
  0xc3   : > { %v879_v17 = vand.u32 4294901760, %v878_v20  ;;  %26064 = vmatprep.mubr.msk.f32.mxu1 %vm27325_vm0, %v27316_v0  ;;  %v27641_v30 = vand.u32 4294901760, %v1257_v21  ;;  %v27697_v48 = vand.u32 4294901760, %v2188_v37  ;;  %v27771_v18 = vand.u32 4294901760, %v3122_v15 }
  0xc5   : > { %v880_v25 = vsub.f32 %v878_v20, %v879_v17  ;;  %v1807_v24 = vsub.f32 %v1257_v21, %v27641_v30  ;;  %v27711_v51 = vsub.f32 %v2188_v37, %v27697_v48  ;;  %v3672_v19 = vsub.f32 %v3122_v15, %v27771_v18  ;;  %v25709_v21 = vld [vmem:[%s30185_s1 + $0x20] sm:$0xff]  ;;  %v5913_v15 = vpop.permute.xlu1 %5912 }
  0xc7   : > { %1336 = vmatmul.mubr.f32.vlgmr.msra.gmra.mrb[0].mxu0 %v1335_v22  ;;  %v881_v27 = vand.u32 4294901760, %v880_v25 }
  0xc8   : > { %1353 = vmatpush1.msra.mxu0 %v1352_v23  ;;  %1416 = vmatprep.mubr.f32.mxu0 %v27316_v0 }
  0xc9   : > { %1426 = vmatprep.subr.mxu0 %v27577_v52  ;;  %26063 = vmatpush3.msra.mxu1 %v881_v27  ;;  %v27715_v52 = vsub.f32 %v27534_v35, %v27700_v29  ;;  %v27728_v35 = vand.u32 4294901760, %v27706_v49  ;;  %v27814_v27 = vand.u32 4294901760, %v27542_v38 }
  0xca   : > { %26065 = vmatmul.mubr.f32.vlgmr.msra.gmra.mrb[2].mxu1 %v27503_v8  ;;  %26067 = vmatprep.subr.mxu1 %v27316_v0 }
  0xcb   : > { %26068 = vmatpush3.msra.mxu1 %v878_v20  ;;  %26069 = vmatprep.mubr.msk.f32.mxu1 %vm27325_vm0, %v27316_v0  ;;  %v2281_v58 = vand.u32 4294901760, %v27715_v52 }
  0xcc   : > { %26072 = vmatprep.subr.mxu1 %v27316_v0 }
  0xcd   : > { %v2282_v5 = vsub.f32 %v27715_v52, %v2281_v58 }
  0xce   : > { %26070 = vmatmul.mubr.f32.vlgmr.msra.gmra.mrb[4].mxu1 %v27506_v9  ;;  %v1808_v9 = vand.u32 4294901760, %v1807_v24 }
  0xcf   : > { %26073 = vmatpush3.msra.mxu1 %v801_v16  ;;  %1418 = vmatmul.mubr.f32.vlgmr.msra.gmra.mrb[0].mxu0 %v27584_v56 }
  0xd0   : > { %1429 = vmatpush1.msra.mxu0 %v27600_v63  ;;  %26074 = vmatprep.mubr.msk.f32.mxu1 %vm27325_vm0, %v27316_v0 }
  0xd1   : > { %1502 = vmatprep.subr.mxu0 %v27562_v46  ;;  %26077 = vmatprep.subr.mxu1 %v27316_v0 }
  0xd2   : > { %26075 = vmatmul.mubr.f32.vlgmr.msra.gmra.mrb[6].mxu1 %v27509_v10  ;;  %1492 = vmatprep.mubr.f32.mxu0 %v27316_v0  ;;  %v1809_v10 = vsub.f32 %v1807_v24, %v1808_v9 }
  0xd3   : > { %26078 = vmatpush3.msra.mxu1 %v879_v17  ;;  %26079 = vmatprep.mubr.msk.f32.mxu1 %vm27325_vm0, %v27316_v0  ;;  %v3673_v17 = vand.u32 4294901760, %v3672_v19 }
  0xd4   : > { %26082 = vmatprep.subr.mxu1 %v27316_v0  ;;  %v1810_v33 = vand.u32 4294901760, %v1809_v10 }
  0xd5   : > { %v3674_v23 = vsub.f32 %v3672_v19, %v3673_v17 }
  0xd6   : > { %26080 = vmatmul.mubr.f32.vlgmr.msra.gmra.mrb[8].mxu1 %v27503_v8 }
  0xd7   : > { %26083 = vmatpush3.msra.mxu1 %v801_v16  ;;  %1495 = vmatmul.mubr.f32.vlgmr.msra.gmra.mrb[0].mxu0 %v27597_v62  ;;  %v3675_v26 = vand.u32 4294901760, %v3674_v23 }
  0xd8   : > { %1504 = vmatpush1.msra.mxu0 %v27586_v57  ;;  %26084 = vmatprep.mubr.msk.f32.mxu1 %vm27325_vm0, %v27316_v0 }
  0xd9   : > { %1580 = vmatprep.subr.mxu0 %v1344_v60  ;;  %26087 = vmatprep.subr.mxu1 %v27316_v0 }
  0xda   : > { %26085 = vmatmul.mubr.f32.vlgmr.msra.gmra.mrb[10].mxu1 %v27503_v8  ;;  %1567 = vmatprep.mubr.f32.mxu0 %v27316_v0  ;;  %v27676_v8 = vand.u32 4294901760, %v2187_v31 }
  0xdb   : > { %26088 = vmatpush3.msra.mxu1 %v27641_v30  ;;  %26089 = vmatprep.mubr.msk.f32.mxu1 %vm27325_vm0, %v27316_v0 }
  0xdc   : > { %26092 = vmatprep.subr.mxu1 %v27316_v0  ;;  %v27689_v42 = vsub.f32 %v2187_v31, %v27676_v8 }
  0xde   : > { %26090 = vmatmul.mubr.f32.vlgmr.msra.gmra.mrb[12].mxu1 %v1335_v22 }
  0xdf   : > { %26093 = vmatpush3.msra.mxu1 %v1810_v33  ;;  %1571 = vmatmul.mubr.f32.vlgmr.msra.gmra.mrb[0].mxu0 %v27615_v11 }
  0xe0   : > { %1584 = vmatpush1.msra.mxu0 %v1350_v12  ;;  %26094 = vmatprep.mubr.msk.f32.mxu1 %vm27325_vm0, %v27316_v0  ;;  %v2283_v12 = vand.u32 4294901760, %v2282_v5 }
  0xe1   : > { %1656 = vmatprep.subr.mxu0 %v27562_v46  ;;  %26097 = vmatprep.subr.mxu1 %v27316_v0  ;;  %v2275_v46 = vand.u32 4294901760, %v27689_v42 }
  0xe2   : > { %26095 = vmatmul.mubr.f32.vlgmr.msra.gmra.mrb[14].mxu1 %v27584_v56  ;;  %1647 = vmatprep.mubr.f32.mxu0 %v27316_v0 }
  0xe3   : > { %26098 = vmatpush3.msra.mxu1 %v1807_v24  ;;  %26099 = vmatprep.mubr.msk.f32.mxu1 %vm27325_vm0, %v27316_v0  ;;  %v2276_v53 = vsub.f32 %v27689_v42, %v2275_v46  ;;  %v4046_v24 = vsel %vm331_vm1, %v25709_v21, 0 }
  0xe4   : > { %26102 = vmatprep.subr.mxu1 %v27316_v0  ;;  %v27843_v10 = vand.u32 4294901760, %v4046_v24 }
  0xe5   : > { %v2277_v60 = vand.u32 4294901760, %v2276_v53 }
  0xe6   : > { %26100 = vmatmul.mubr.f32.vlgmr.msra.gmra.mrb[16].mxu1 %v27597_v62  ;;  %v2265_v62 = vsub.f32 %v27706_v49, %v27728_v35  ;;  %v27860_v34 = vsub.f32 %v4046_v24, %v27843_v10 }
  0xe7   : > { %26103 = vmatpush3.msra.mxu1 %v27641_v30  ;;  %1649 = vmatmul.mubr.f32.vlgmr.msra.gmra.mrb[0].mxu0 %v27584_v56 }
  0xe8   : > { %1658 = vmatpush1.msra.mxu0 %v27586_v57  ;;  %26104 = vmatprep.mubr.msk.f32.mxu1 %vm27325_vm0, %v27316_v0  ;;  %v2739_v57 = vand.u32 4294901760, %v27711_v51  ;;  %v2266_v6 = vand.u32 4294901760, %v2265_v62  ;;  %v27876_v28 = vand.u32 4294901760, %v27860_v34 }
  0xe9   : > { %26107 = vmatprep.subr.mxu1 %v27316_v0  ;;  %1721 = vmatprep.mubr.f32.mxu0 %v27316_v0 }
  0xea   : > { %26105 = vmatmul.mubr.f32.vlgmr.msra.gmra.mrb[18].mxu1 %v27615_v11  ;;  %2196 = vmatprep.subr.mxu0 %v27676_v8  ;;  %v2740_v63 = vsub.f32 %v27711_v51, %v2739_v57 }
  0xeb   : > { %26108 = vmatpush3.msra.mxu1 %v1808_v9  ;;  %26109 = vmatprep.mubr.msk.f32.mxu1 %vm27325_vm0, %v27316_v0  ;;  %v27837_v9 = vand.u32 4294901760, %v27458_v4 }
  0xec   : > { %26112 = vmatprep.subr.mxu1 %v27316_v0  ;;  %v2741_v11 = vand.u32 4294901760, %v2740_v63 }
  0xed   : > { %v27851_v32 = vsub.f32 %v27458_v4, %v27837_v9 }
  0xee   : > { %26110 = vmatmul.mubr.f32.vlgmr.msra.gmra.mrb[20].mxu1 %v27584_v56 }
  0xef   : > { %26113 = vmatpush3.msra.mxu1 %v27641_v30  ;;  %1723 = vmatmul.mubr.f32.vlgmr.msra.gmra.mrb[0].mxu0 %v27584_v56  ;;  %v27826_v30 = vsub.f32 %v27542_v38, %v27814_v27  ;;  %v27840_v38 = vand.u32 4294901760, %v27545_v39 }
  0xf0   : > { %26114 = vmatprep.mubr.msk.f32.mxu1 %vm27325_vm0, %v27316_v0  ;;  %2198 = vmatpush1.msra.mxu0 %v27700_v29 }
  0xf1   : > { %26117 = vmatprep.subr.mxu1 %v27316_v0  ;;  %2261 = vmatprep.mubr.f32.mxu0 %v27316_v0  ;;  %v3209_v31 = vand.u32 4294901760, %v27826_v30  ;;  %v27855_v33 = vsub.f32 %v27545_v39, %v27840_v38  ;;  %v4592_v39 = vand.u32 4294901760, %v27851_v32 }
  0xf2   : > { %26115 = vmatmul.mubr.f32.vlgmr.msra.gmra.mrb[22].mxu1 %v27584_v56  ;;  %2278 = vmatprep.subr.mxu0 %v2277_v60  ;;  %v3127_v56 = vsel %vm331_vm1, %v25708_v13, 0 }
  0xf3   : > { %26118 = vmatpush3.msra.mxu1 %v27697_v48  ;;  %26119 = vmatprep.mubr.msk.f32.mxu1 %vm27325_vm0, %v27316_v0  ;;  %v27766_v16 = vand.u32 4294901760, %v3127_v56  ;;  %v3210_v4 = vsub.f32 %v27826_v30, %v3209_v31 }
  0xf4   : > { %26122 = vmatprep.subr.mxu1 %v27316_v0 }
  0xf5   : > { %v27776_v36 = vsub.f32 %v3127_v56, %v27766_v16  ;;  %v3211_v37 = vand.u32 4294901760, %v3210_v4  ;;  %v27968_v56 = vand.u32 4294901760, %v27438_v3  ;;  %v25712_v4 = vld [vmem:[%s30185_s1 + $0x38] sm:$0xff] }
  0xf6   : > { %26120 = vmatmul.mubr.f32.vlgmr.msra.gmra.mrb[24].mxu1 %v2266_v6 }
  0xf7   : > { %2267 = vmatmul.mubr.f32.vlgmr.msra.gmra.mrb[0].mxu0 %v2266_v6  ;;  %26123 = vmatpush3.msra.mxu1 %v2741_v11  ;;  %v27789_v20 = vand.u32 4294901760, %v27776_v36 }
  0xf8   : > { %2284 = vmatpush1.msra.mxu0 %v2283_v12  ;;  %26124 = vmatprep.mubr.msk.f32.mxu1 %vm27325_vm0, %v27316_v0 }
  0xf9   : > { %2357 = vmatprep.subr.mxu0 %v27689_v42  ;;  %26127 = vmatprep.subr.mxu1 %v27316_v0  ;;  %v3199_v22 = vsub.f32 %v27776_v36, %v27789_v20  ;;  %v4593_v42 = vsub.f32 %v27851_v32, %v4592_v39 }
  0xfa   : > { %26125 = vmatmul.mubr.f32.vlgmr.msra.gmra.mrb[26].mxu1 %v27693_v44  ;;  %2347 = vmatprep.mubr.f32.mxu0 %v27316_v0 }
  0xfb   : > { %26128 = vmatpush3.msra.mxu1 %v27711_v51  ;;  %26129 = vmatprep.mubr.msk.f32.mxu1 %vm27325_vm0, %v27316_v0  ;;  %v27807_v25 = vand.u32 4294901760, %v3199_v22  ;;  %v25710_v51 = vld [vmem:[%s30185_s1 + $0x28] sm:$0xff]  ;;  %v27995_v22 = vand.u32 4294901760, %v27431_v1 }
  0xfc   : > { %26132 = vmatprep.subr.mxu1 %v27316_v0  ;;  %v4988_v53 = vsel %vm331_vm1, %v25710_v51, 0 }
  0xfe   : > { %26130 = vmatmul.mubr.f32.vlgmr.msra.gmra.mrb[28].mxu1 %v27706_v49 }
  0xff   : > { %26133 = vmatpush3.msra.mxu1 %v27697_v48  ;;  %2349 = vmatmul.mubr.f32.vlgmr.msra.gmra.mrb[0].mxu0 %v27693_v44 }
 0x100   : > { %2360 = vmatpush1.msra.mxu0 %v27715_v52  ;;  %26134 = vmatprep.mubr.msk.f32.mxu1 %vm27325_vm0, %v27316_v0  ;;  %v4979_v52 = vpop.permute.xlu0 %4978 }
 0x101   : > { %2433 = vmatprep.subr.mxu0 %v27676_v8  ;;  %26137 = vmatprep.subr.mxu1 %v27316_v0 }
 0x102   : > { %26135 = vmatmul.mubr.f32.vlgmr.msra.gmra.mrb[30].mxu1 %v27728_v35  ;;  %2423 = vmatprep.mubr.f32.mxu0 %v27316_v0 }
 0x103   : > { %26138 = vmatpush3.msra.mxu1 %v2739_v57  ;;  %26139 = vmatprep.mubr.msk.f32.mxu1 %vm27325_vm0, %v27316_v0  ;;  %v27913_v57 = vand.u32 4294901760, %v4988_v53 }
 0x104   : > { %26142 = vmatprep.subr.mxu1 %v27316_v0 }
 0x105   : > { %v27923_v60 = vsub.f32 %v4988_v53, %v27913_v57  ;;  %v4982_v53 = vsel %vm4980_vm6, %v27547_v40, %v27549_v41 }
 0x106   : > { %26140 = vmatmul.mubr.f32.vlgmr.msra.gmra.mrb[32].mxu1 %v27693_v44 }
 0x107   : > { %26143 = vmatpush3.msra.mxu1 %v27697_v48  ;;  %2426 = vmatmul.mubr.f32.vlgmr.msra.gmra.mrb[0].mxu0 %v27706_v49  ;;  %v27938_v63 = vand.u32 4294901760, %v27923_v60 }
 0x108   : > { %2435 = vmatpush1.msra.mxu0 %v27700_v29  ;;  %2498 = vmatprep.mubr.f32.mxu0 %v27316_v0 }
 0x109   : > { %2511 = vmatprep.subr.mxu0 %v2275_v46  ;;  %26144 = vmatprep.mubr.msk.f32.mxu1 %vm27325_vm0, %v27316_v0  ;;  %v5060_v6 = vsub.f32 %v27923_v60, %v27938_v63 }
 0x10a   : > { %26145 = vmatmul.mubr.f32.vlgmr.msra.gmra.mrb[34].mxu1 %v27693_v44  ;;  %26147 = vmatprep.subr.mxu1 %v27316_v0 }
 0x10b   : > { %26148 = vmatpush3.msra.mxu1 %v27771_v18  ;;  %26149 = vmatprep.mubr.msk.f32.mxu1 %vm27325_vm0, %v27316_v0  ;;  %v27958_v12 = vand.u32 4294901760, %v5060_v6 }
 0x10c   : > { %26152 = vmatprep.subr.mxu1 %v27316_v0 }
 0x10e   : > { %26150 = vmatmul.mubr.f32.vlgmr.msra.gmra.mrb[36].mxu1 %v27807_v25 }
 0x10f   : > { %2502 = vmatmul.mubr.f32.vlgmr.msra.gmra.mrb[0].mxu0 %v27728_v35  ;;  %26153 = vmatpush3.msra.mxu1 %v3675_v26  ;;  %v4983_v35 = vsel %vm4980_vm6, %v27549_v41, %v4979_v52  ;;  %v28012_v26 = vsub.f32 %v27431_v1, %v27995_v22  ;;  %v28133_v41 = vand.u32 4294901760, %v27560_v45 }
 0x110   : > { %2515 = vmatpush1.msra.mxu0 %v2281_v58  ;;  %2578 = vmatprep.mubr.f32.mxu0 %v27316_v0  ;;  %v27918_v58 = vand.u32 4294901760, %v4983_v35 }
 0x111   : > { %2587 = vmatprep.subr.mxu0 %v27676_v8  ;;  %26154 = vmatprep.mubr.msk.f32.mxu1 %vm27325_vm0, %v27316_v0  ;;  %v3215_v8 = vand.u32 4294901760, %v27855_v33 }
 0x112   : > { %26155 = vmatmul.mubr.f32.vlgmr.msra.gmra.mrb[38].mxu1 %v27766_v16  ;;  %26157 = vmatprep.subr.mxu1 %v27316_v0  ;;  %v27928_v62 = vsub.f32 %v4983_v35, %v27918_v58 }
 0x113   : > { %26158 = vmatpush3.msra.mxu1 %v3672_v19  ;;  %26159 = vmatprep.mubr.msk.f32.mxu1 %vm27325_vm0, %v27316_v0  ;;  %v3216_v48 = vsub.f32 %v27855_v33, %v3215_v8  ;;  %v27981_v19 = vsub.f32 %v27438_v3, %v27968_v56 }
 0x114   : > { %26162 = vmatprep.subr.mxu1 %v27316_v0  ;;  %v5534_v5 = vand.u32 4294901760, %v27928_v62 }
 0x115   : > { %v3217_v46 = vand.u32 4294901760, %v3216_v48  ;;  %v4128_v3 = vand.u32 4294901760, %v27981_v19 }
 0x116   : > { %26160 = vmatmul.mubr.f32.vlgmr.msra.gmra.mrb[40].mxu1 %v27776_v36  ;;  %v5535_v11 = vsub.f32 %v27928_v62, %v5534_v5 }
 0x117   : > { %2580 = vmatmul.mubr.f32.vlgmr.msra.gmra.mrb[0].mxu0 %v27693_v44  ;;  %26163 = vmatpush3.msra.mxu1 %v27771_v18 }
 0x118   : > { %2589 = vmatpush1.msra.mxu0 %v27700_v29  ;;  %2652 = vmatprep.mubr.f32.mxu0 %v27316_v0  ;;  %v4118_v29 = vsub.f32 %v27860_v34, %v27876_v28  ;;  %v5536_v13 = vand.u32 4294901760, %v5535_v11  ;;  %v25713_v11 = vld [vmem:[%s30185_s1 + $0x40] sm:$0xff] }
 0x119   : > { %26164 = vmatprep.mubr.msk.f32.mxu1 %vm27325_vm0, %v27316_v0  ;;  %3130 = vmatprep.subr.mxu0 %v27814_v27 }
 0x11a   : > { %26165 = vmatmul.mubr.f32.vlgmr.msra.gmra.mrb[42].mxu1 %v27789_v20  ;;  %26167 = vmatprep.subr.mxu1 %v27316_v0  ;;  %v27896_v49 = vand.u32 4294901760, %v4118_v29 }
 0x11b   : > { %26168 = vmatpush3.msra.mxu1 %v3673_v17  ;;  %26169 = vmatprep.mubr.msk.f32.mxu1 %vm27325_vm0, %v27316_v0 }
 0x11c   : > { %26172 = vmatprep.subr.mxu1 %v27316_v0 }
 0x11e   : > { %26170 = vmatmul.mubr.f32.vlgmr.msra.gmra.mrb[44].mxu1 %v27766_v16 }
 0x11f   : > { %2654 = vmatmul.mubr.f32.vlgmr.msra.gmra.mrb[0].mxu0 %v27693_v44  ;;  %26173 = vmatpush3.msra.mxu1 %v27771_v18  ;;  %v4594_v44 = vand.u32 4294901760, %v4593_v42  ;;  %v5922_v18 = vsel %vm331_vm1, %v25711_v14, 0  ;;  %v7790_v14 = vsel %vm331_vm1, %v25713_v11, 0 }
 0x120   : > { %3132 = vmatpush1.msra.mxu0 %v27840_v38  ;;  %3195 = vmatprep.mubr.f32.mxu0 %v27316_v0 }
 0x121   : > { %3212 = vmatprep.subr.mxu0 %v3211_v37  ;;  %26174 = vmatprep.mubr.msk.f32.mxu1 %vm27325_vm0, %v27316_v0 }
 0x122   : > { %26175 = vmatmul.mubr.f32.vlgmr.msra.gmra.mrb[46].mxu1 %v27766_v16  ;;  %26177 = vmatprep.subr.mxu1 %v27316_v0 }
 0x123   : > { %26178 = vmatpush3.msra.mxu1 %v27837_v9  ;;  %26179 = vmatprep.mubr.msk.f32.mxu1 %vm27325_vm0, %v27316_v0 }
 0x124   : > { %26182 = vmatprep.subr.mxu1 %v27316_v0 }
 0x126   : > { %26180 = vmatmul.mubr.f32.vlgmr.msra.gmra.mrb[48].mxu1 %v27896_v49 }
 0x127   : > { %3201 = vmatmul.mubr.f32.vlgmr.msra.gmra.mrb[0].mxu0 %v27807_v25  ;;  %26183 = vmatpush3.msra.mxu1 %v4594_v44 }
 0x128   : > { %3218 = vmatpush1.msra.mxu0 %v3217_v46  ;;  %3281 = vmatprep.mubr.f32.mxu0 %v27316_v0 }
 0x129   : > { %3291 = vmatprep.subr.mxu0 %v27826_v30  ;;  %26184 = vmatprep.mubr.msk.f32.mxu1 %vm27325_vm0, %v27316_v0  ;;  %v4134_v30 = vand.u32 4294901760, %v28012_v26 }
 0x12a   : > { %26185 = vmatmul.mubr.f32.vlgmr.msra.gmra.mrb[50].mxu1 %v27843_v10  ;;  %26187 = vmatprep.subr.mxu1 %v27316_v0 }
 0x12b   : > { %26188 = vmatpush3.msra.mxu1 %v27851_v32  ;;  %26189 = vmatprep.mubr.msk.f32.mxu1 %vm27325_vm0, %v27316_v0 }
 0x12c   : > { %26192 = vmatprep.subr.mxu1 %v27316_v0 }
 0x12e   : > { %26190 = vmatmul.mubr.f32.vlgmr.msra.gmra.mrb[52].mxu1 %v27860_v34 }
 0x12f   : > { %3283 = vmatmul.mubr.f32.vlgmr.msra.gmra.mrb[0].mxu0 %v27766_v16  ;;  %26193 = vmatpush3.msra.mxu1 %v27837_v9 }
 0x130   : > { %3294 = vmatpush1.msra.mxu0 %v27855_v33  ;;  %3357 = vmatprep.mubr.f32.mxu0 %v27316_v0 }
 0x131   : > { %3367 = vmatprep.subr.mxu0 %v27814_v27  ;;  %26194 = vmatprep.mubr.msk.f32.mxu1 %vm27325_vm0, %v27316_v0 }
 0x132   : > { %26195 = vmatmul.mubr.f32.vlgmr.msra.gmra.mrb[54].mxu1 %v27876_v28  ;;  %26197 = vmatprep.subr.mxu1 %v27316_v0 }
 0x133   : > { %26198 = vmatpush3.msra.mxu1 %v4592_v39  ;;  %26199 = vmatprep.mubr.msk.f32.mxu1 %vm27325_vm0, %v27316_v0  ;;  %v6847_v39 = vpop.permute.xlu0 %6846 }
 0x134   : > { %26202 = vmatprep.subr.mxu1 %v27316_v0  ;;  %v6851_v37 = vsel %vm6848_vm8, %v27582_v55, %v6847_v39 }
 0x135   : > { %v28070_v48 = vand.u32 4294901760, %v6851_v37 }
 0x136   : > { %26200 = vmatmul.mubr.f32.vlgmr.msra.gmra.mrb[56].mxu1 %v27843_v10 }
 0x137   : > { %3360 = vmatmul.mubr.f32.vlgmr.msra.gmra.mrb[0].mxu0 %v27776_v36  ;;  %26203 = vmatpush3.msra.mxu1 %v27837_v9  ;;  %v5917_v36 = vsel %vm5914_vm7, %v27564_v47, %v5913_v15  ;;  %v7401_v44 = vsub.f32 %v6851_v37, %v28070_v48  ;;  %v7781_v6 = vpop.permute.xlu0 %7780  ;;  %v28164_v15 = vand.u32 4294901760, %v7790_v14 }
 0x138   : > { %3369 = vmatpush1.msra.mxu0 %v27840_v38  ;;  %3432 = vmatprep.mubr.f32.mxu0 %v27316_v0  ;;  %v27992_v17 = vand.u32 4294901760, %v5917_v36 }
 0x139   : > { %3445 = vmatprep.subr.mxu0 %v3209_v31  ;;  %26204 = vmatprep.mubr.msk.f32.mxu1 %vm27325_vm0, %v27316_v0  ;;  %v4135_v31 = vsub.f32 %v28012_v26, %v4134_v30 }
 0x13a   : > { %26205 = vmatmul.mubr.f32.vlgmr.msra.gmra.mrb[58].mxu1 %v27843_v10  ;;  %26207 = vmatprep.subr.mxu1 %v27316_v0  ;;  %v28006_v25 = vsub.f32 %v5917_v36, %v27992_v17 }
 0x13b   : > { %26208 = vmatpush3.msra.mxu1 %v27918_v58  ;;  %26209 = vmatprep.mubr.msk.f32.mxu1 %vm27325_vm0, %v27316_v0  ;;  %v4136_v33 = vand.u32 4294901760, %v4135_v31 }
 0x13c   : > { %26212 = vmatprep.subr.mxu1 %v27316_v0  ;;  %v6468_v1 = vand.u32 4294901760, %v28006_v25 }
 0x13e   : > { %26210 = vmatmul.mubr.f32.vlgmr.msra.gmra.mrb[60].mxu1 %v27958_v12 }
 0x13f   : > { %3436 = vmatmul.mubr.f32.vlgmr.msra.gmra.mrb[0].mxu0 %v27789_v20  ;;  %26213 = vmatpush3.msra.mxu1 %v5536_v13  ;;  %v27987_v20 = vand.u32 4294901760, %v5922_v18 }
 0x140   : > { %3449 = vmatpush1.msra.mxu0 %v3215_v8  ;;  %3512 = vmatprep.mubr.f32.mxu0 %v27316_v0  ;;  %v6856_v8 = vsel %vm331_vm1, %v25712_v4, 0  ;;  %v27326_v4 = vmov 0  }
 0x141   : > { %3521 = vmatprep.subr.mxu0 %v27814_v27  ;;  %26214 = vmatprep.mubr.msk.f32.mxu1 %vm27325_vm0, %v27316_v0  ;;  %v28001_v23 = vsub.f32 %v5922_v18, %v27987_v20  ;;  %v4129_v27 = vsub.f32 %v27981_v19, %v4128_v3  ;;  %v28065_v42 = vand.u32 4294901760, %v6856_v8 }
 0x142   : > { %26215 = vmatmul.mubr.f32.vlgmr.msra.gmra.mrb[62].mxu1 %v27913_v57  ;;  %26217 = vmatprep.subr.mxu1 %v27316_v0 }
 0x143   : > { %26218 = vmatpush3.msra.mxu1 %v27928_v62  ;;  %26219 = vmatprep.mubr.msk.f32.mxu1 %vm27325_vm0, %v27316_v0  ;;  %v28023_v21 = vand.u32 4294901760, %v28001_v23  ;;  %v4130_v24 = vand.u32 4294901760, %v4129_v27  ;;  %v28075_v29 = vsub.f32 %v6856_v8, %v28065_v42  ;;  %v28142_v62 = vsub.f32 %v27560_v45, %v28133_v41 }
 0x144   : > { %26222 = vmatprep.subr.mxu1 %v27316_v0  ;;  %v7785_v45 = vsel %vm7782_vm9, %v27604_v2, %v7781_v6  ;;  %27238 = vset.pattern.permute.xlu1 %v27326_v4 }
 0x145   : > { %v5994_v9 = vsub.f32 %v28001_v23, %v28023_v21  ;;  %v28088_v46 = vand.u32 4294901760, %v28075_v29  ;;  %v8258_v13 = vand.u32 4294901760, %v7785_v45  ;;  %27239 = vset.pattern.permute.xlu0 %v27326_v4 }
 0x146   : > { %26220 = vmatmul.mubr.f32.vlgmr.msra.gmra.mrb[64].mxu1 %v27923_v60 }
 0x147   : > { %3514 = vmatmul.mubr.f32.vlgmr.msra.gmra.mrb[0].mxu0 %v27766_v16  ;;  %26223 = vmatpush3.msra.mxu1 %v27918_v58  ;;  %v6928_v51 = vsub.f32 %v28075_v29, %v28088_v46  ;;  %v8335_v36 = vsub.f32 %v7785_v45, %v8258_v13 }
 0x148   : > { %3523 = vmatpush1.msra.mxu0 %v27840_v38  ;;  %3586 = vmatprep.mubr.f32.mxu0 %v27316_v0  ;;  %v6469_v38 = vsub.f32 %v28006_v25, %v6468_v1 }
 0x149   : > { %4049 = vmatprep.subr.mxu0 %v27968_v56  ;;  %26224 = vmatprep.mubr.msk.f32.mxu1 %vm27325_vm0, %v27316_v0 }
 0x14a   : > { %26225 = vmatmul.mubr.f32.vlgmr.msra.gmra.mrb[66].mxu1 %v27938_v63  ;;  %26227 = vmatprep.subr.mxu1 %v27316_v0  ;;  %v6470_v32 = vand.u32 4294901760, %v6469_v38 }
 0x14b   : > { %26228 = vmatpush3.msra.mxu1 %v5534_v5  ;;  %26229 = vmatprep.mubr.msk.f32.mxu1 %vm27325_vm0, %v27316_v0 }
 0x14c   : > { %26232 = vmatprep.subr.mxu1 %v27316_v0 }
 0x14e   : > { %26230 = vmatmul.mubr.f32.vlgmr.msra.gmra.mrb[68].mxu1 %v27913_v57 }
 0x14f   : > { %3588 = vmatmul.mubr.f32.vlgmr.msra.gmra.mrb[0].mxu0 %v27766_v16  ;;  %26233 = vmatpush3.msra.mxu1 %v27918_v58  ;;  %v28045_v16 = vand.u32 4294901760, %v5994_v9  ;;  %v28115_v58 = vand.u32 4294901760, %v4982_v53 }
 0x150   : > { %4051 = vmatpush1.msra.mxu0 %v27995_v22  ;;  %4114 = vmatprep.mubr.f32.mxu0 %v27316_v0 }
 0x151   : > { %4131 = vmatprep.subr.mxu0 %v4130_v24  ;;  %26234 = vmatprep.mubr.msk.f32.mxu1 %vm27325_vm0, %v27316_v0  ;;  %v28123_v40 = vsub.f32 %v4982_v53, %v28115_v58 }
 0x152   : > { %26235 = vmatmul.mubr.f32.vlgmr.msra.gmra.mrb[70].mxu1 %v27913_v57  ;;  %26237 = vmatprep.subr.mxu1 %v27316_v0 }
 0x153   : > { %26238 = vmatpush3.msra.mxu1 %v27992_v17  ;;  %26239 = vmatprep.mubr.msk.f32.mxu1 %vm27325_vm0, %v27316_v0 }
 0x154   : > { %26242 = vmatprep.subr.mxu1 %v27316_v0 }
 0x156   : > { %26240 = vmatmul.mubr.f32.vlgmr.msra.gmra.mrb[72].mxu1 %v28045_v16 }
 0x157   : > { %4120 = vmatmul.mubr.f32.vlgmr.msra.gmra.mrb[0].mxu0 %v27896_v49  ;;  %26243 = vmatpush3.msra.mxu1 %v6470_v32  ;;  %v7402_v49 = vand.u32 4294901760, %v7401_v44 }
 0x158   : > { %4137 = vmatpush1.msra.mxu0 %v4136_v33  ;;  %4200 = vmatprep.mubr.f32.mxu0 %v27316_v0 }
 0x159   : > { %4210 = vmatprep.subr.mxu0 %v27981_v19  ;;  %26244 = vmatprep.mubr.msk.f32.mxu1 %vm27325_vm0, %v27316_v0  ;;  %v7403_v52 = vsub.f32 %v7401_v44, %v7402_v49  ;;  %v28168_v19 = vsub.f32 %v7790_v14, %v28164_v15 }
 0x15a   : > { %26245 = vmatmul.mubr.f32.vlgmr.msra.gmra.mrb[74].mxu1 %v27987_v20  ;;  %26247 = vmatprep.subr.mxu1 %v27316_v0 }
 0x15b   : > { %26248 = vmatpush3.msra.mxu1 %v28006_v25  ;;  %26249 = vmatprep.mubr.msk.f32.mxu1 %vm27325_vm0, %v27316_v0  ;;  %v7404_v35 = vand.u32 4294901760, %v7403_v52 }
 0x15c   : > { %26252 = vmatprep.subr.mxu1 %v27316_v0 }
 0x15e   : > { %26250 = vmatmul.mubr.f32.vlgmr.msra.gmra.mrb[76].mxu1 %v28001_v23 }
 0x15f   : > { %4202 = vmatmul.mubr.f32.vlgmr.msra.gmra.mrb[0].mxu0 %v27843_v10  ;;  %26253 = vmatpush3.msra.mxu1 %v27992_v17 }
 0x160   : > { %4213 = vmatpush1.msra.mxu0 %v28012_v26  ;;  %4276 = vmatprep.mubr.f32.mxu0 %v27316_v0 }
 0x161   : > { %4286 = vmatprep.subr.mxu0 %v27968_v56  ;;  %26254 = vmatprep.mubr.msk.f32.mxu1 %vm27325_vm0, %v27316_v0 }
 0x162   : > { %26255 = vmatmul.mubr.f32.vlgmr.msra.gmra.mrb[78].mxu1 %v28023_v21  ;;  %26257 = vmatprep.subr.mxu1 %v27316_v0 }
 0x163   : > { %26258 = vmatpush3.msra.mxu1 %v6468_v1  ;;  %26259 = vmatprep.mubr.msk.f32.mxu1 %vm27325_vm0, %v27316_v0 }
 0x164   : > { %26262 = vmatprep.subr.mxu1 %v27316_v0 }
 0x166   : > { %26260 = vmatmul.mubr.f32.vlgmr.msra.gmra.mrb[80].mxu1 %v27987_v20 }
 0x167   : > { %4279 = vmatmul.mubr.f32.vlgmr.msra.gmra.mrb[0].mxu0 %v27860_v34  ;;  %26263 = vmatpush3.msra.mxu1 %v27992_v17  ;;  %v28109_v34 = vand.u32 4294901760, %v6928_v51  ;;  %v8336_v17 = vand.u32 4294901760, %v8335_v36 }
 0x168   : > { %4288 = vmatpush1.msra.mxu0 %v27995_v22  ;;  %4351 = vmatprep.mubr.f32.mxu0 %v27316_v0 }
 0x169   : > { %4364 = vmatprep.subr.mxu0 %v4128_v3  ;;  %26264 = vmatprep.mubr.msk.f32.mxu1 %vm27325_vm0, %v27316_v0  ;;  %v28176_v3 = vand.u32 4294901760, %v28168_v19  ;;  %v8337_v25 = vsub.f32 %v8335_v36, %v8336_v17 }
 0x16a   : > { %26265 = vmatmul.mubr.f32.vlgmr.msra.gmra.mrb[82].mxu1 %v27987_v20  ;;  %26267 = vmatprep.subr.mxu1 %v27316_v0 }
 0x16b   : > { %26268 = vmatpush3.msra.mxu1 %v28070_v48  ;;  %26269 = vmatprep.mubr.msk.f32.mxu1 %vm27325_vm0, %v27316_v0  ;;  %v8338_v1 = vand.u32 4294901760, %v8337_v25  ;;  %v28268_v25 = vand.u32 4294901760, %v27593_v61 }
 0x16c   : > { %26272 = vmatprep.subr.mxu1 %v27316_v0 }
 0x16e   : > { %26270 = vmatmul.mubr.f32.vlgmr.msra.gmra.mrb[84].mxu1 %v28109_v34 }
 0x16f   : > { %4355 = vmatmul.mubr.f32.vlgmr.msra.gmra.mrb[0].mxu0 %v27876_v28  ;;  %26273 = vmatpush3.msra.mxu1 %v7404_v35  ;;  %v5070_v28 = vand.u32 4294901760, %v28123_v40 }
 0x170   : > { %4368 = vmatpush1.msra.mxu0 %v4134_v30  ;;  %4431 = vmatprep.mubr.f32.mxu0 %v27316_v0 }
 0x171   : > { %4440 = vmatprep.subr.mxu0 %v27968_v56  ;;  %26274 = vmatprep.mubr.msk.f32.mxu1 %vm27325_vm0, %v27316_v0  ;;  %v5071_v5 = vsub.f32 %v28123_v40, %v5070_v28  ;;  %v5076_v56 = vand.u32 4294901760, %v28142_v62 }
 0x172   : > { %26275 = vmatmul.mubr.f32.vlgmr.msra.gmra.mrb[86].mxu1 %v28065_v42  ;;  %26277 = vmatprep.subr.mxu1 %v27316_v0 }
 0x173   : > { %26278 = vmatpush3.msra.mxu1 %v7401_v44  ;;  %26279 = vmatprep.mubr.msk.f32.mxu1 %vm27325_vm0, %v27316_v0  ;;  %v5072_v18 = vand.u32 4294901760, %v5071_v5 }
 0x174   : > { %26282 = vmatprep.subr.mxu1 %v27316_v0 }
 0x176   : > { %26280 = vmatmul.mubr.f32.vlgmr.msra.gmra.mrb[88].mxu1 %v28075_v29 }
 0x177   : > { %4433 = vmatmul.mubr.f32.vlgmr.msra.gmra.mrb[0].mxu0 %v27843_v10  ;;  %26283 = vmatpush3.msra.mxu1 %v28070_v48 }
 0x178   : > { %4442 = vmatpush1.msra.mxu0 %v27995_v22  ;;  %4505 = vmatprep.mubr.f32.mxu0 %v27316_v0  ;;  %v5077_v22 = vsub.f32 %v28142_v62, %v5076_v56 }
 0x179   : > { %4991 = vmatprep.subr.mxu0 %v28115_v58  ;;  %26284 = vmatprep.mubr.msk.f32.mxu1 %vm27325_vm0, %v27316_v0 }
 0x17a   : > { %26285 = vmatmul.mubr.f32.vlgmr.msra.gmra.mrb[90].mxu1 %v28088_v46  ;;  %26287 = vmatprep.subr.mxu1 %v27316_v0  ;;  %v5078_v26 = vand.u32 4294901760, %v5077_v22 }
 0x17b   : > { %26288 = vmatpush3.msra.mxu1 %v7402_v49  ;;  %26289 = vmatprep.mubr.msk.f32.mxu1 %vm27325_vm0, %v27316_v0 }
 0x17c   : > { %26292 = vmatprep.subr.mxu1 %v27316_v0 }
 0x17e   : > { %26290 = vmatmul.mubr.f32.vlgmr.msra.gmra.mrb[92].mxu1 %v28065_v42 }
 0x17f   : > { %4507 = vmatmul.mubr.f32.vlgmr.msra.gmra.mrb[0].mxu0 %v27843_v10  ;;  %26293 = vmatpush3.msra.mxu1 %v28070_v48  ;;  %v7862_v10 = vsub.f32 %v28168_v19, %v28176_v3 }
 0x180   : > { %4993 = vmatpush1.msra.mxu0 %v28133_v41  ;;  %5056 = vmatprep.mubr.f32.mxu0 %v27316_v0 }
 0x181   : > { %5073 = vmatprep.subr.mxu0 %v5072_v18  ;;  %26294 = vmatprep.mubr.msk.f32.mxu1 %vm27325_vm0, %v27316_v0  ;;  %v28186_v27 = vand.u32 4294901760, %v7862_v10 }
 0x182   : > { %26295 = vmatmul.mubr.f32.vlgmr.msra.gmra.mrb[94].mxu1 %v28065_v42  ;;  %26297 = vmatprep.subr.mxu1 %v27316_v0 }
 0x183   : > { %26298 = vmatpush3.msra.mxu1 %v8258_v13  ;;  %26299 = vmatprep.mubr.msk.f32.mxu1 %vm27325_vm0, %v27316_v0 }
 0x184   : > { %26302 = vmatprep.subr.mxu1 %v27316_v0 }
 0x186   : > { %26300 = vmatmul.mubr.f32.vlgmr.msra.gmra.mrb[96].mxu1 %v28186_v27 }
 0x187   : > { %5062 = vmatmul.mubr.f32.vlgmr.msra.gmra.mrb[0].mxu0 %v27958_v12  ;;  %26304 = vmatprep.mubr.msk.f32.mxu1 %vm27325_vm0, %v27316_v0  ;;  %v5916_v12 = vsel %vm5914_vm7, %v27554_v43, %v27564_v47  ;;  %v28234_v43 = vand.u32 4294901760, %v27571_v50 }
 0x188   : > { %5079 = vmatpush1.msra.mxu0 %v5078_v26  ;;  %5142 = vmatprep.mubr.f32.mxu0 %v27316_v0 }
 0x189   : > { %5152 = vmatprep.subr.mxu0 %v28123_v40  ;;  %26303 = vmatpush3.msra.mxu1 %v8338_v1  ;;  %v6009_v24 = vsub.f32 %v27571_v50, %v28234_v43  ;;  %v8706_v50 = vld [vmem:[%s30186_s2] sm:$0xff] }
 0x18a   : > { %26305 = vmatmul.mubr.f32.vlgmr.msra.gmra.mrb[98].mxu1 %v28164_v15  ;;  %26307 = vmatprep.subr.mxu1 %v27316_v0 }
 0x18b   : > { %26308 = vmatpush3.msra.mxu1 %v8335_v36  ;;  %26309 = vmatprep.mubr.msk.f32.mxu1 %vm27325_vm0, %v27316_v0  ;;  %v6010_v9 = vand.u32 4294901760, %v6009_v24 }
 0x18c   : > { %26312 = vmatprep.subr.mxu1 %v27316_v0  ;;  %8709 = vperm.xlu1 %27238, %v8706_v50  }
 0x18d   : > { %v6011_v31 = vsub.f32 %v6009_v24, %v6010_v9 }
 0x18e   : > { %26310 = vmatmul.mubr.f32.vlgmr.msra.gmra.mrb[100].mxu1 %v28168_v19 }
 0x18f   : > { %5144 = vmatmul.mubr.f32.vlgmr.msra.gmra.mrb[0].mxu0 %v27913_v57  ;;  %26313 = vmatpush3.msra.mxu1 %v8258_v13  ;;  %v6012_v32 = vand.u32 4294901760, %v6011_v31 }
 0x190   : > { %5155 = vmatpush1.msra.mxu0 %v28142_v62  ;;  %5218 = vmatprep.mubr.f32.mxu0 %v27316_v0 }
 0x191   : > { %5228 = vmatprep.subr.mxu0 %v28115_v58  ;;  %26314 = vmatprep.mubr.msk.f32.mxu1 %vm27325_vm0, %v27316_v0 }
 0x192   : > { %26315 = vmatmul.mubr.f32.vlgmr.msra.gmra.mrb[102].mxu1 %v28176_v3  ;;  %26317 = vmatprep.subr.mxu1 %v27316_v0 }
 0x193   : > { %26318 = vmatpush3.msra.mxu1 %v8336_v17  ;;  %26319 = vmatprep.mubr.msk.f32.mxu1 %vm27325_vm0, %v27316_v0 }
 0x194   : > { %26322 = vmatprep.subr.mxu1 %v27316_v0 }
 0x196   : > { %26320 = vmatmul.mubr.f32.vlgmr.msra.gmra.mrb[104].mxu1 %v28164_v15 }
 0x197   : > { %5221 = vmatmul.mubr.f32.vlgmr.msra.gmra.mrb[0].mxu0 %v27923_v60  ;;  %26323 = vmatpush3.msra.mxu1 %v8258_v13  ;;  %v28227_v60 = vand.u32 4294901760, %v5916_v12 }
 0x198   : > { %5230 = vmatpush1.msra.mxu0 %v28133_v41  ;;  %5293 = vmatprep.mubr.f32.mxu0 %v27316_v0 }
 0x199   : > { %5306 = vmatprep.subr.mxu0 %v5070_v28  ;;  %26324 = vmatprep.mubr.msk.f32.mxu1 %vm27325_vm0, %v27316_v0  ;;  %v6003_v30 = vsub.f32 %v5916_v12, %v28227_v60 }
 0x19a   : > { %26325 = vmatmul.mubr.f32.vlgmr.msra.gmra.mrb[106].mxu1 %v28164_v15  ;;  %26327 = vmatprep.subr.mxu1 %v27316_v0 }
 0x19b   : > { %26329 = vmatprep.mubr.msk.f32.mxu1 %vm27325_vm0, %v27316_v0  ;;  %v6004_v47 = vand.u32 4294901760, %v6003_v30 }
 0x19f   : > { %5297 = vmatmul.mubr.f32.vlgmr.msra.gmra.mrb[0].mxu0 %v27938_v63  ;;  %v6005_v63 = vsub.f32 %v6003_v30, %v6004_v47 }
 0x1a0   : > { %5310 = vmatpush1.msra.mxu0 %v5076_v56  ;;  %5373 = vmatprep.mubr.f32.mxu0 %v27316_v0 }
 0x1a1   : > { %5382 = vmatprep.subr.mxu0 %v28115_v58  ;;  %v6006_v38 = vand.u32 4294901760, %v6005_v63 }
 0x1a7   : > { %5375 = vmatmul.mubr.f32.vlgmr.msra.gmra.mrb[0].mxu0 %v27913_v57 }
 0x1a8   : > { %5384 = vmatpush1.msra.mxu0 %v28133_v41  ;;  %5447 = vmatprep.mubr.f32.mxu0 %v27316_v0  ;;  %v6850_v41 = vsel %vm6848_vm8, %v27580_v54, %v27582_v55 }
 0x1a9   : > { %5925 = vmatprep.subr.mxu0 %v28227_v60  ;;  %v28259_v11 = vand.u32 4294901760, %v6850_v41 }
 0x1ab   : > { %v28264_v54 = vsub.f32 %v6850_v41, %v28259_v11 }
 0x1ad   : > { %v6938_v1 = vand.u32 4294901760, %v28264_v54 }
 0x1af   : > { %5449 = vmatmul.mubr.f32.vlgmr.msra.gmra.mrb[0].mxu0 %v27913_v57  ;;  %v872_v57 = vpop.f32.mrb[0].mxu1 }
 0x1b0   : > { %5927 = vmatpush1.msra.mxu0 %v28234_v43  ;;  %5990 = vmatprep.mubr.f32.mxu0 %v27316_v0  ;;  %v26061_v33 = vpop.f32.mrb[1].mxu1 }
 0x1b1   : > { %6007 = vmatprep.subr.mxu0 %v6006_v38 }
 0x1b7   : > { %5996 = vmatmul.mubr.f32.vlgmr.msra.gmra.mrb[0].mxu0 %v28045_v16  ;;  %v948_v16 = vpop.f32.mrb[2].mxu1 }
 0x1b8   : > { %6013 = vmatpush1.msra.mxu0 %v6012_v32  ;;  %6076 = vmatprep.mubr.f32.mxu0 %v27316_v0  ;;  %v949_v39 = vadd.f32 %v948_v16, %v872_v57  ;;  %v26066_v8 = vpop.f32.mrb[3].mxu1 }
 0x1b9   : > { %6086 = vmatprep.subr.mxu0 %v6003_v30  ;;  %v1022_v37 = vpop.f32.mrb[4].mxu1 }
 0x1ba   : > { %v1023_v48 = vadd.f32 %v1022_v37, %v949_v39  ;;  %v26071_v44 = vpop.f32.mrb[5].mxu1 }
 0x1bb   : > { %v1096_v49 = vpop.f32.mrb[6].mxu1 }
 0x1bc   : > { %v1097_v51 = vadd.f32 %v1096_v49, %v1023_v48  ;;  %v26076_v52 = vpop.f32.mrb[7].mxu1 }
 0x1bd   : > { %v1170_v53 = vpop.f32.mrb[8].mxu1 }
 0x1be   : > { %v1171_v35 = vadd.f32 %v1170_v53, %v1097_v51  ;;  %v26081_v58 = vpop.f32.mrb[9].mxu1 }
 0x1bf   : > { %6078 = vmatmul.mubr.f32.vlgmr.msra.gmra.mrb[0].mxu0 %v27987_v20  ;;  %v1242_v40 = vpop.f32.mrb[10].mxu1 }
 0x1c0   : > { %6089 = vmatpush1.msra.mxu0 %v6009_v24  ;;  %6152 = vmatprep.mubr.f32.mxu0 %v27316_v0  ;;  %v1243_v28 = vadd.f32 %v1242_v40, %v1171_v35  ;;  %v26086_v62 = vpop.f32.mrb[11].mxu1 }
 0x1c1   : > { %6162 = vmatprep.subr.mxu0 %v28227_v60  ;;  %v1801_v5 = vpop.f32.mrb[12].mxu1 }
 0x1c2   : > { %v1802_v6 = vadd.f32 %v1801_v5, %v1243_v28  ;;  %v26091_v45 = vpop.f32.mrb[13].mxu1 }
 0x1c7   : > { %6155 = vmatmul.mubr.f32.vlgmr.msra.gmra.mrb[0].mxu0 %v28001_v23  ;;  %v1877_v23 = vpop.f32.mrb[14].mxu1 }
 0x1c8   : > { %6164 = vmatpush1.msra.mxu0 %v28234_v43  ;;  %6227 = vmatprep.mubr.f32.mxu0 %v27316_v0  ;;  %v1878_v13 = vadd.f32 %v1877_v23, %v1802_v6  ;;  %v26096_v14 = vpop.f32.mrb[15].mxu1 }
 0x1c9   : > { %6240 = vmatprep.subr.mxu0 %v6004_v47  ;;  %v1951_v56 = vpop.f32.mrb[16].mxu1 }
 0x1ca   : > { %v1952_v18 = vadd.f32 %v1951_v56, %v1878_v13  ;;  %v26101_v36 = vpop.f32.mrb[17].mxu1 }
 0x1cb   : > { %v2025_v55 = vpop.f32.mrb[18].mxu1 }
 0x1cc   : > { %v2026_v17 = vadd.f32 %v2025_v55, %v1952_v18  ;;  %v26106_v22 = vpop.f32.mrb[19].mxu1 }
 0x1cd   : > { %v2099_v10 = vpop.f32.mrb[20].mxu1 }
 0x1ce   : > { %v2100_v26 = vadd.f32 %v2099_v10, %v2026_v17  ;;  %v7784_v10 = vsel %vm7782_vm9, %v27588_v59, %v27604_v2  ;;  %v28309_v59 = vand.u32 4294901760, %v27612_v7 }
 0x1cf   : > { %6231 = vmatmul.mubr.f32.vlgmr.msra.gmra.mrb[0].mxu0 %v28023_v21  ;;  %v26111_v21 = vpop.f32.mrb[21].mxu1 }
 0x1d0   : > { %6244 = vmatpush1.msra.mxu0 %v6010_v9  ;;  %6307 = vmatprep.mubr.f32.mxu0 %v27316_v0  ;;  %v2171_v12 = vpop.f32.mrb[22].mxu1  ;;  %v6939_v9 = vsub.f32 %v28264_v54, %v6938_v1  ;;  %v28302_v21 = vand.u32 4294901760, %v7784_v10 }
 0x1d1   : > { %6316 = vmatprep.subr.mxu0 %v28227_v60  ;;  %v2172_v30 = vadd.f32 %v2171_v12, %v2100_v26  ;;  %v26116_v47 = vpop.f32.mrb[23].mxu1  ;;  %v28274_v60 = vsub.f32 %v27593_v61, %v28268_v25 }
 0x1d2   : > { %v2732_v24 = vpop.f32.mrb[24].mxu1  ;;  %v6940_v4 = vand.u32 4294901760, %v6939_v9 }
 0x1d3   : > { %v26121_v63 = vpop.f32.mrb[25].mxu1  ;;  %v6944_v57 = vand.u32 4294901760, %v28274_v60 }
 0x1d4   : > { %v2808_v38 = vpop.f32.mrb[26].mxu1 }
 0x1d5   : > { %v2809_v31 = vadd.f32 %v2808_v38, %v2732_v24  ;;  %v26126_v32 = vpop.f32.mrb[27].mxu1  ;;  %v6945_v37 = vsub.f32 %v28274_v60, %v6944_v57 }
 0x1d6   : > { %v2882_v50 = vpop.f32.mrb[28].mxu1 }
 0x1d7   : > { %6309 = vmatmul.mubr.f32.vlgmr.msra.gmra.mrb[0].mxu0 %v27987_v20  ;;  %v2883_v33 = vadd.f32 %v2882_v50, %v2809_v31  ;;  %v26131_v61 = vpop.f32.mrb[29].mxu1  ;;  %v6946_v35 = vand.u32 4294901760, %v6945_v37 }
 0x1d8   : > { %6318 = vmatpush1.msra.mxu0 %v28234_v43  ;;  %6381 = vmatprep.mubr.f32.mxu0 %v27316_v0  ;;  %v2956_v16 = vpop.f32.mrb[30].mxu1 }
 0x1d9   : > { %6859 = vmatprep.subr.mxu0 %v28259_v11  ;;  %v2957_v43 = vadd.f32 %v2956_v16, %v2883_v33  ;;  %v26136_v39 = vpop.f32.mrb[31].mxu1 }
 0x1da   : > { %v3030_v8 = vpop.f32.mrb[32].mxu1 }
 0x1db   : > { %v3031_v48 = vadd.f32 %v3030_v8, %v2957_v43  ;;  %v26141_v44 = vpop.f32.mrb[33].mxu1 }
 0x1dd   : > { %v3102_v49 = vpop.f32.mrb[34].mxu1 }
 0x1de   : > { %v3103_v51 = vadd.f32 %v3102_v49, %v3031_v48  ;;  %v26146_v52 = vpop.f32.mrb[35].mxu1 }
 0x1df   : > { %6383 = vmatmul.mubr.f32.vlgmr.msra.gmra.mrb[0].mxu0 %v27987_v20 }
 0x1e0   : > { %6861 = vmatpush1.msra.mxu0 %v28268_v25  ;;  %6924 = vmatprep.mubr.f32.mxu0 %v27316_v0  ;;  %v3108_v58 = vadd.f32 %v3103_v51, %v2172_v30 }
 0x1e1   : > { %6941 = vmatprep.subr.mxu0 %v6940_v4  ;;  %v3666_v53 = vpop.f32.mrb[36].mxu1 }
 0x1e2   : > { %v26151_v40 = vpop.f32.mrb[37].mxu1 }
 0x1e5   : > { %v3742_v41 = vpop.f32.mrb[38].mxu1 }
 0x1e6   : > { %v3743_v28 = vadd.f32 %v3742_v41, %v3666_v53  ;;  %v26156_v20 = vpop.f32.mrb[39].mxu1 }
 0x1e7   : > { %6930 = vmatmul.mubr.f32.vlgmr.msra.gmra.mrb[0].mxu0 %v28109_v34 }
 0x1e8   : > { %6947 = vmatpush1.msra.mxu0 %v6946_v35  ;;  %7010 = vmatprep.mubr.f32.mxu0 %v27316_v0 }
 0x1e9   : > { %7020 = vmatprep.subr.mxu0 %v28264_v54  ;;  %v3816_v62 = vpop.f32.mrb[40].mxu1 }
 0x1ea   : > { %v3817_v5 = vadd.f32 %v3816_v62, %v3743_v28  ;;  %v26161_v6 = vpop.f32.mrb[41].mxu1 }
 0x1ed   : > { %v3890_v45 = vpop.f32.mrb[42].mxu1 }
 0x1ee   : > { %v3891_v23 = vadd.f32 %v3890_v45, %v3817_v5  ;;  %v26166_v13 = vpop.f32.mrb[43].mxu1 }
 0x1ef   : > { %7012 = vmatmul.mubr.f32.vlgmr.msra.gmra.mrb[0].mxu0 %v28065_v42 }
 0x1f0   : > { %7023 = vmatpush1.msra.mxu0 %v28274_v60  ;;  %7086 = vmatprep.mubr.f32.mxu0 %v27316_v0 }
 0x1f1   : > { %7096 = vmatprep.subr.mxu0 %v28259_v11  ;;  %v3964_v34 = vpop.f32.mrb[44].mxu1 }
 0x1f2   : > { %v3965_v14 = vadd.f32 %v3964_v34, %v3891_v23  ;;  %v26171_v56 = vpop.f32.mrb[45].mxu1 }
 0x1f5   : > { %v4036_v18 = vpop.f32.mrb[46].mxu1 }
 0x1f6   : > { %v4037_v36 = vadd.f32 %v4036_v18, %v3965_v14  ;;  %v26176_v55 = vpop.f32.mrb[47].mxu1 }
 0x1f7   : > { %7089 = vmatmul.mubr.f32.vlgmr.msra.gmra.mrb[0].mxu0 %v28075_v29  ;;  %v7871_v29 = vsub.f32 %v7784_v10, %v28302_v21 }
 0x1f8   : > { %7098 = vmatpush1.msra.mxu0 %v28268_v25  ;;  %7161 = vmatprep.mubr.f32.mxu0 %v27316_v0  ;;  %v4042_v17 = vadd.f32 %v4037_v36, %v3108_v58 }
 0x1f9   : > { %7174 = vmatprep.subr.mxu0 %v6938_v1  ;;  %v4585_v22 = vpop.f32.mrb[48].mxu1  ;;  %v7872_v2 = vand.u32 4294901760, %v7871_v29 }
 0x1fa   : > { %v26181_v26 = vpop.f32.mrb[49].mxu1 }
 0x1fd   : > { %v4661_v12 = vpop.f32.mrb[50].mxu1 }
 0x1fe   : > { %v4662_v30 = vadd.f32 %v4661_v12, %v4585_v22  ;;  %v26186_v47 = vpop.f32.mrb[51].mxu1 }
 0x1ff   : > { %7165 = vmatmul.mubr.f32.vlgmr.msra.gmra.mrb[0].mxu0 %v28088_v46  ;;  %v7877_v46 = vsub.f32 %v27612_v7, %v28309_v59 }
 0x200   : > { %7178 = vmatpush1.msra.mxu0 %v6944_v57  ;;  %7241 = vmatprep.mubr.f32.mxu0 %v27316_v0 }
 0x201   : > { %7250 = vmatprep.subr.mxu0 %v28259_v11  ;;  %v4735_v54 = vpop.f32.mrb[52].mxu1  ;;  %v7873_v11 = vsub.f32 %v7871_v29, %v7872_v2  ;;  %v7878_v50 = vand.u32 4294901760, %v7877_v46 }
 0x202   : > { %v4736_v1 = vadd.f32 %v4735_v54, %v4662_v30  ;;  %v26191_v24 = vpop.f32.mrb[53].mxu1 }
 0x203   : > { %v7874_v57 = vand.u32 4294901760, %v7873_v11  ;;  %v7879_v16 = vsub.f32 %v7877_v46, %v7878_v50 }
 0x205   : > { %v4809_v60 = vpop.f32.mrb[54].mxu1  ;;  %v7880_v39 = vand.u32 4294901760, %v7879_v16 }
 0x206   : > { %v4810_v63 = vadd.f32 %v4809_v60, %v4736_v1  ;;  %v26196_v9 = vpop.f32.mrb[55].mxu1 }
 0x207   : > { %7243 = vmatmul.mubr.f32.vlgmr.msra.gmra.mrb[0].mxu0 %v28065_v42 }
 0x208   : > { %7252 = vmatpush1.msra.mxu0 %v28268_v25  ;;  %7315 = vmatprep.mubr.f32.mxu0 %v27316_v0 }
 0x209   : > { %7793 = vmatprep.subr.mxu0 %v28302_v21  ;;  %v4883_v38 = vpop.f32.mrb[56].mxu1 }
 0x20a   : > { %v4884_v31 = vadd.f32 %v4883_v38, %v4810_v63  ;;  %v26201_v32 = vpop.f32.mrb[57].mxu1 }
 0x20d   : > { %v4955_v33 = vpop.f32.mrb[58].mxu1 }
 0x20e   : > { %v4956_v61 = vadd.f32 %v4955_v33, %v4884_v31  ;;  %v26206_v4 = vpop.f32.mrb[59].mxu1 }
 0x20f   : > { %7317 = vmatmul.mubr.f32.vlgmr.msra.gmra.mrb[0].mxu0 %v28065_v42 }
 0x210   : > { %7795 = vmatpush1.msra.mxu0 %v28309_v59  ;;  %7858 = vmatprep.mubr.f32.mxu0 %v27316_v0  ;;  %v4961_v7 = vadd.f32 %v4956_v61, %v4042_v17 }
 0x211   : > { %7875 = vmatprep.subr.mxu0 %v7874_v57  ;;  %v5527_v25 = vpop.f32.mrb[60].mxu1 }
 0x212   : > { %v26211_v43 = vpop.f32.mrb[61].mxu1 }
 0x215   : > { %v5603_v8 = vpop.f32.mrb[62].mxu1 }
 0x216   : > { %v5604_v37 = vadd.f32 %v5603_v8, %v5527_v25  ;;  %v26216_v48 = vpop.f32.mrb[63].mxu1 }
 0x217   : > { %7864 = vmatmul.mubr.f32.vlgmr.msra.gmra.mrb[0].mxu0 %v28186_v27 }
 0x218   : > { %7881 = vmatpush1.msra.mxu0 %v7880_v39  ;;  %7944 = vmatprep.mubr.f32.mxu0 %v27316_v0 }
 0x219   : > { %7954 = vmatprep.subr.mxu0 %v7871_v29  ;;  %v5677_v42 = vpop.f32.mrb[64].mxu1 }
 0x21a   : > { %v5678_v44 = vadd.f32 %v5677_v42, %v5604_v37  ;;  %v26221_v49 = vpop.f32.mrb[65].mxu1 }
 0x21d   : > { %v5751_v51 = vpop.f32.mrb[66].mxu1 }
 0x21e   : > { %v26226_v52 = vpop.f32.mrb[67].mxu1  ;;  %v5752_v53 = vadd.f32 %v5751_v51, %v5678_v44 }
 0x21f   : > { %7946 = vmatmul.mubr.f32.vlgmr.msra.gmra.mrb[0].mxu0 %v28164_v15  ;;  %v8719_v52 = vlaneseq }
 0x220   : > { %7957 = vmatpush1.msra.mxu0 %v7877_v46  ;;  %8020 = vmatprep.mubr.f32.mxu0 %v27316_v0 }
 0x221   : > { %8030 = vmatprep.subr.mxu0 %v28302_v21  ;;  %v5825_v35 = vpop.f32.mrb[68].mxu1 }
 0x222   : > { %v5826_v58 = vadd.f32 %v5825_v35, %v5752_v53  ;;  %v26231_v27 = vpop.f32.mrb[69].mxu1  ;;  %v8720_v53 = vshrl.u32 %v8719_v52, 7  ;;  %v8746_v52 = vld [vmem:[%s30187_s3] sm:$0xff] }
 0x223   : > { %v304_v27 = vld [vmem:[%s30191_s7] sm:$0x7] }
 0x224   : > { %v28336_v35 = vsub.s32 0, %v8720_v53 }
 0x225   : > { %v5897_v40 = vpop.f32.mrb[70].mxu1 }
 0x226   : > { %v5898_v41 = vadd.f32 %v5897_v40, %v5826_v58  ;;  %v26236_v28 = vpop.f32.mrb[71].mxu1  ;;  %v28338_v58 = vsub.s32 1, %v8720_v53  ;;  %v8710_v40 = vpop.permute.xlu1 %8709 }
 0x227   : > { %8023 = vmatmul.mubr.f32.vlgmr.msra.gmra.mrb[0].mxu0 %v28168_v19 }
 0x228   : > { %8032 = vmatpush1.msra.mxu0 %v28309_v59  ;;  %8095 = vmatprep.mubr.f32.mxu0 %v27316_v0  ;;  %v5903_v20 = vadd.f32 %v5898_v41, %v4961_v7 }
 0x229   : > { %8108 = vmatprep.subr.mxu0 %v7872_v2  ;;  %v6461_v62 = vpop.f32.mrb[72].mxu1 }
 0x22a   : > { %v26241_v5 = vpop.f32.mrb[73].mxu1 }
 0x22d   : > { %v6537_v6 = vpop.f32.mrb[74].mxu1 }
 0x22e   : > { %v6538_v45 = vadd.f32 %v6537_v6, %v6461_v62  ;;  %v26246_v23 = vpop.f32.mrb[75].mxu1  ;;  %v28347_v6 = vrot.slane %v304_v27, %v28338_v58 }
 0x22f   : > { %8099 = vmatmul.mubr.f32.vlgmr.msra.gmra.mrb[0].mxu0 %v28176_v3 }
 0x230   : > { %8112 = vmatpush1.msra.mxu0 %v7878_v50  ;;  %8175 = vmatprep.mubr.f32.mxu0 %v27316_v0 }
 0x231   : > { %8184 = vmatprep.subr.mxu0 %v28302_v21  ;;  %v6611_v13 = vpop.f32.mrb[76].mxu1 }
 0x232   : > { %v6612_v19 = vadd.f32 %v6611_v13, %v6538_v45  ;;  %v26251_v34 = vpop.f32.mrb[77].mxu1 }
 0x233   : > { %v8729_v34 = vsub.s32 2, %v8720_v53 }
 0x235   : > { %v6685_v14 = vpop.f32.mrb[78].mxu1 }
 0x236   : > { %v6686_v56 = vadd.f32 %v6685_v14, %v6612_v19  ;;  %v26256_v18 = vpop.f32.mrb[79].mxu1 }
 0x237   : > { %8177 = vmatmul.mubr.f32.vlgmr.msra.gmra.mrb[0].mxu0 %v28164_v15 }
 0x238   : > { %8186 = vmatpush1.msra.mxu0 %v28309_v59  ;;  %8249 = vmatprep.mubr.f32.mxu0 %v27316_v0 }
 0x239   : > { %v6759_v36 = vpop.f32.mrb[80].mxu1 }
 0x23a   : > { %v6760_v55 = vadd.f32 %v6759_v36, %v6686_v56  ;;  %v26261_v3 = vpop.f32.mrb[81].mxu1  ;;  %v28375_v56 = vrot.slane %v304_v27, %v8729_v34 }
 0x23b   : > { %v25714_v3 = vld [vmem:[%s30187_s3 + $0x8] sm:$0xff] }
 0x23d   : > { %v6831_v17 = vpop.f32.mrb[82].mxu1 }
 0x23e   : > { %v6832_v22 = vadd.f32 %v6831_v17, %v6760_v55  ;;  %v26266_v10 = vpop.f32.mrb[83].mxu1  ;;  %v17134_v55 = vld [vmem:[%s30188_s4] sm:$0xff]  ;;  %v8768_v17 = vsel %vm331_vm1, %v25714_v3, 0 }
 0x23f   : > { %8251 = vmatmul.mubr.f32.vlgmr.msra.gmra.mrb[0].mxu0 %v28164_v15 }
 0x240   : > { %v6837_v26 = vadd.f32 %v6832_v22, %v5903_v20  ;;  %8836 = vmatprep.mubr.f32.mxu0 %v27316_v0  ;;  %v28344_v20 = vrot.slane %v304_v27, %v28336_v35  ;;  %v28431_v22 = vand.u32 4294901760, %v8768_v17 }
 0x241   : > { %v7395_v21 = vpop.f32.mrb[84].mxu1 }
 0x242   : > { %v26271_v12 = vpop.f32.mrb[85].mxu1  ;;  %v28434_v10 = vsub.f32 %v8768_v17, %v28431_v22 }
 0x245   : > { %v7471_v30 = vpop.f32.mrb[86].mxu1 }
 0x246   : > { %v7472_v47 = vadd.f32 %v7471_v30, %v7395_v21  ;;  %v26276_v29 = vpop.f32.mrb[87].mxu1 }
 0x249   : > { %v7545_v54 = vpop.f32.mrb[88].mxu1 }
 0x24a   : > { %v7546_v1 = vadd.f32 %v7545_v54, %v7472_v47  ;;  %v26281_v24 = vpop.f32.mrb[89].mxu1 }
 0x24d   : > { %v7619_v59 = vpop.f32.mrb[90].mxu1 }
 0x24e   : > { %v7620_v2 = vadd.f32 %v7619_v59, %v7546_v1  ;;  %v26286_v60 = vpop.f32.mrb[91].mxu1 }
 0x251   : > { %v7693_v63 = vpop.f32.mrb[92].mxu1 }
 0x252   : > { %v7694_v9 = vadd.f32 %v7693_v63, %v7620_v2  ;;  %v26291_v46 = vpop.f32.mrb[93].mxu1 }
 0x255   : > { %v7765_v11 = vpop.f32.mrb[94].mxu1 }
 0x256   : > { %v7766_v38 = vadd.f32 %v7765_v11, %v7694_v9  ;;  %v26296_v15 = vpop.f32.mrb[95].mxu1 }
 0x258   : > { %v7771_v31 = vadd.f32 %v7766_v38, %v6837_v26  ;;  %v28437_v26 = vand.u32 4294901760, %v28434_v10 }
 0x259   : > { %v8329_v32 = vpop.f32.mrb[96].mxu1 }
 0x25a   : > { %v26301_v50 = vpop.f32.mrb[97].mxu1  ;;  %v8840_v30 = vsub.f32 %v28434_v10, %v28437_v26 }
 0x25c   : > { %v28446_v2 = vand.u32 4294901760, %v8840_v30 }
 0x25d   : > { %v8405_v57 = vpop.f32.mrb[98].mxu1 }
 0x25e   : > { %v8406_v33 = vadd.f32 %v8405_v57, %v8329_v32  ;;  %v26306_v61 = vpop.f32.mrb[99].mxu1 }
 0x261   : > { %v8479_v4 = vpop.f32.mrb[100].mxu1 }
 0x262   : > { %v8480_v16 = vadd.f32 %v8479_v4, %v8406_v33  ;;  %v26311_v7 = vpop.f32.mrb[101].mxu1 }
 0x265   : > { %v8553_v25 = vpop.f32.mrb[102].mxu1 }
 0x266   : > { %v8554_v43 = vadd.f32 %v8553_v25, %v8480_v16  ;;  %v26316_v39 = vpop.f32.mrb[103].mxu1 }
 0x269   : > { %v8627_v8 = vpop.f32.mrb[104].mxu1 }
 0x26a   : > { %v8628_v37 = vadd.f32 %v8627_v8, %v8554_v43  ;;  %v26321_v48 = vpop.f32.mrb[105].mxu1 }
 0x26d   : > { %v8699_v42 = vpop.f32.mrb[106].mxu1 }
 0x26e   : > { %v8700_v44 = vadd.f32 %v8699_v42, %v8628_v37  ;;  %v26326_v49 = vpop.f32.mrb[107].mxu1 }
 0x270   : > { %v8705_v51 = vadd.f32 %v8700_v44, %v7771_v31 }
 0x272   : > { %v8714_v14 = vadd.f32 %v8710_v40, %v8705_v51 }
 0x274   : > { %v8717_v18 = vmax.f32 %v8714_v14, 0.0 }
 0x276   : > { %v28382_v36 = vmul.f32 %v28375_v56, %v8717_v18 }
 0x312   : > { %v8252_v41 = vpop.f32.mrb[0].mxu0 }
 0x313   : > { %v8712_v28 = vadd.f32 %v8710_v40, %v8252_v41  ;;  %v8254_v62 = vpop.f32.mrb[1].mxu0 }
 0x314   : > { %v8713_v5 = vadd.f32 %v8710_v40, %v8254_v62  ;;  %v9696_v62 = vsel %vm331_vm1, %v8746_v52, 0 }
 0x315   : > { %v8715_v45 = vmax.f32 %v8712_v28, 0.0  ;;  %v28512_v14 = vand.u32 4294901760, %v9696_v62 }
 0x316   : > { %v8716_v23 = vmax.f32 %v8713_v5, 0.0 }
 0x317   : > { %v28350_v13 = vmul.f32 %v28344_v20, %v8715_v45 }
 0x318   : > { %v28353_v19 = vmul.f32 %v28347_v6, %v8716_v23 }
 0x319   : > { %8755 = vrot.lane.b32.xlu1 %v28350_v13, %s27317_s22 }
 0x31a   : > { %8757 = vrot.lane.b32.xlu0 %v28353_v19, %s27317_s22 }
 0x31d   : > { %8753 = vrot.lane.b32.xlu1 %v27316_v0, %s27317_s22 }
 0x31e   : > { %9683 = vrot.lane.b32.xlu0 %v28350_v13, %s27318_s23 }
 0x321   : > { %9685 = vrot.lane.b32.xlu1 %v28353_v19, %s27318_s23 }
 0x322   : > { %9681 = vrot.lane.b32.xlu0 %v27316_v0, %s27318_s23 }
 0x325   : > { %10613 = vrot.lane.b32.xlu1 %v28350_v13, %s27319_s24 }
 0x326   : > { %10615 = vrot.lane.b32.xlu0 %v28353_v19, %s27319_s24 }
 0x329   : > { %10611 = vrot.lane.b32.xlu1 %v27316_v0, %s27319_s24 }
 0x32a   : > { %11546 = vrot.lane.b32.xlu0 %v28350_v13, %s27320_s25 }
 0x32d   : > { %11548 = vrot.lane.b32.xlu1 %v28353_v19, %s27320_s25 }
 0x32e   : > { %11544 = vrot.lane.b32.xlu0 %v27316_v0, %s27320_s25 }
 0x331   : > { %13406 = vrot.lane.b32.xlu1 %v28353_v19, %s27321_s26 }
 0x332   : > { %13408 = vrot.lane.b32.xlu0 %v28382_v36, %s27321_s26 }
 0x335   : > { %13404 = vrot.lane.b32.xlu1 %v28350_v13, %s27321_s26 }
 0x336   : > { %14339 = vrot.lane.b32.xlu0 %v28353_v19, %s27322_s10 }
 0x339   : > { %14341 = vrot.lane.b32.xlu1 %v28382_v36, %s27322_s10 }
 0x33a   : > { %14337 = vrot.lane.b32.xlu0 %v28350_v13, %s27322_s10 }
 0x33d   : > { %15272 = vrot.lane.b32.xlu1 %v28353_v19, %s27323_s12 }
 0x33e   : > { %15274 = vrot.lane.b32.xlu0 %v28382_v36, %s27323_s12 }
 0x341   : > { %15270 = vrot.lane.b32.xlu1 %v28350_v13, %s27323_s12 }
 0x342   : > { %16205 = vrot.lane.b32.xlu0 %v28353_v19, %s27324_s13 }
 0x345   : > { %16207 = vrot.lane.b32.xlu1 %v28382_v36, %s27324_s13 }
 0x346   : > { %16203 = vrot.lane.b32.xlu0 %v28350_v13, %s27324_s13 }
 0x349   : > { %8759 = vrot.lane.b32.xlu1 %v28382_v36, %s27317_s22 }
 0x34a   : > { %9687 = vrot.lane.b32.xlu0 %v28382_v36, %s27318_s23 }
 0x34d   : > { %10617 = vrot.lane.b32.xlu1 %v28382_v36, %s27319_s24 }
 0x34e   : > { %11550 = vrot.lane.b32.xlu0 %v28382_v36, %s27320_s25 }
 0x351   : > { %13410 = vrot.lane.b32.xlu1 %v27316_v0, %s27321_s26 }
 0x352   : > { %14343 = vrot.lane.b32.xlu0 %v27316_v0, %s27322_s10 }
 0x355   : > { %15276 = vrot.lane.b32.xlu1 %v27316_v0, %s27323_s12 }
 0x356   : > { %16209 = vrot.lane.b32.xlu0 %v27316_v0, %s27324_s13 }
 0x359   : > { %17137 = vperm.xlu1 %27238, %v17134_v55  }
 0x38b   : > { %v8756_v21 = vpop.permute.xlu1 %8755 }
 0x38c   : > { %v28439_v12 = vpop.permute.xlu0 %8757 }
 0x38d   : > { %v8762_v47 = vsel %vm324_vm2, %v8756_v21, %v28439_v12 }
 0x38e   : > { %v8770_v29 = vand.u32 4294901760, %v8762_v47 }
 0x38f   : > { %v8754_v54 = vpop.permute.xlu1 %8753 }
 0x390   : > { %v8849_v1 = vsub.f32 %v8762_v47, %v8770_v29  ;;  %v8761_v24 = vsel %vm324_vm2, %v8754_v54, %v8756_v21  ;;  %v9684_v59 = vpop.permute.xlu0 %9683  ;;  %8771 = vmatprep.subr.mxu0 %v8770_v29  ;;  %v28526_v47 = vsub.f32 %v9696_v62, %v28512_v14 }
 0x391   : > { %v28448_v60 = vand.u32 4294901760, %v8761_v24 }
 0x392   : > { %v8850_v63 = vand.u32 4294901760, %v8849_v1 }
 0x393   : > { %v8855_v9 = vsub.f32 %v8761_v24, %v28448_v60  ;;  %8773 = vmatpush1.msra.mxu0 %v28448_v60  ;;  %v28452_v46 = vpop.permute.xlu1 %9685 }
 0x394   : > { %v9682_v11 = vpop.permute.xlu0 %9681  ;;  %8842 = vmatmul.mubr.f32.vlgmr.msra.gmra.mrb[2].mxu0 %v28446_v2  ;;  %v8851_v38 = vsub.f32 %v8849_v1, %v8850_v63  ;;  %v9690_v51 = vsel %vm1254_vm5, %v9684_v59, %v28452_v46 }
 0x395   : > { %v8856_v15 = vand.u32 4294901760, %v8855_v9  ;;  %8922 = vmatprep.mubr.f32.mxu0 %v27316_v0  ;;  %v28494_v27 = vand.u32 4294901760, %v9690_v51  ;;  %v9689_v23 = vsel %vm1254_vm5, %v9682_v11, %v9684_v59 }
 0x396   : > { %v8852_v31 = vand.u32 4294901760, %v8851_v38  ;;  %v28518_v55 = vand.u32 4294901760, %v9689_v23 }
 0x397   : > { %v8857_v32 = vsub.f32 %v8855_v9, %v8856_v15  ;;  %v28456_v50 = vpop.permute.xlu1 %10613  ;;  %v28507_v45 = vsub.f32 %v9690_v51, %v28494_v27 }
 0x398   : > { %v28458_v57 = vpop.permute.xlu0 %10615  ;;  %8853 = vmatprep.subr.mxu0 %v8852_v31 }
 0x399   : > { %v8858_v33 = vand.u32 4294901760, %v8857_v32  ;;  %v9778_v30 = vand.u32 4294901760, %v28507_v45  ;;  %v10620_v52 = vsel %vm2185_vm3, %v28456_v50, %v28458_v57 }
 0x39b   : > { %8859 = vmatpush1.msra.mxu0 %v8858_v33  ;;  %v10612_v61 = vpop.permute.xlu1 %10611  ;;  %v9779_v59 = vsub.f32 %v28507_v45, %v9778_v30 }
 0x39c   : > { %v28462_v4 = vsel %vm2185_vm3, %v10612_v61, %v28456_v50  ;;  %v11547_v16 = vpop.permute.xlu0 %11546  ;;  %8924 = vmatmul.mubr.f32.vlgmr.msra.gmra.mrb[2].mxu0 %v28431_v22  ;;  %8932 = vmatprep.subr.mxu0 %v8849_v1 }
 0x39d   : > { %8935 = vmatpush1.msra.mxu0 %v8855_v9  ;;  %8998 = vmatprep.mubr.f32.mxu0 %v27316_v0 }
 0x39e   : > { %9008 = vmatprep.subr.mxu0 %v8770_v29 }
 0x39f   : > { %v28466_v7 = vpop.permute.xlu1 %11548 }
 0x3a0   : > { %v28470_v25 = vsel %vm3119_vm4, %v11547_v16, %v28466_v7  ;;  %v11545_v43 = vpop.permute.xlu0 %11544 }
 0x3a1   : > { %v28473_v39 = vsel %vm3119_vm4, %v11545_v43, %v11547_v16 }
 0x3a3   : > { %v13407_v8 = vpop.permute.xlu1 %13406 }
 0x3a4   : > { %v28475_v37 = vpop.permute.xlu0 %13408  ;;  %9001 = vmatmul.mubr.f32.vlgmr.msra.gmra.mrb[2].mxu0 %v28434_v10 }
 0x3a5   : > { %v28480_v48 = vsel %vm4980_vm6, %v13407_v8, %v28475_v37  ;;  %9010 = vmatpush1.msra.mxu0 %v28448_v60  ;;  %9073 = vmatprep.mubr.f32.mxu0 %v27316_v0 }
 0x3a6   : > { %9086 = vmatprep.subr.mxu0 %v8850_v63 }
 0x3a7   : > { %v13405_v42 = vpop.permute.xlu1 %13404 }
 0x3a8   : > { %v28485_v44 = vsel %vm4980_vm6, %v13405_v42, %v13407_v8  ;;  %v14340_v49 = vpop.permute.xlu0 %14339 }
 0x3ab   : > { %v28492_v53 = vpop.permute.xlu1 %14341 }
 0x3ac   : > { %v28498_v40 = vsel %vm5914_vm7, %v14340_v49, %v28492_v53  ;;  %v14338_v41 = vpop.permute.xlu0 %14337  ;;  %9077 = vmatmul.mubr.f32.vlgmr.msra.gmra.mrb[2].mxu0 %v28437_v26 }
 0x3ad   : > { %v28502_v28 = vsel %vm5914_vm7, %v14338_v41, %v14340_v49  ;;  %9090 = vmatpush1.msra.mxu0 %v8856_v15  ;;  %9153 = vmatprep.mubr.f32.mxu0 %v27316_v0  ;;  %v9780_v15 = vand.u32 4294901760, %v9779_v59  ;;  %v25715_v41 = vld [vmem:[%s30187_s3 + $0x10] sm:$0xff] }
 0x3ae   : > { %9162 = vmatprep.subr.mxu0 %v8770_v29  ;;  %v28532_v29 = vsub.f32 %v9689_v23, %v28518_v55  ;;  %v10626_v50 = vsel %vm331_vm1, %v25715_v41, 0 }
 0x3af   : > { %v15273_v5 = vpop.permute.xlu1 %15272 }
 0x3b0   : > { %v28510_v34 = vpop.permute.xlu0 %15274  ;;  %v9784_v9 = vand.u32 4294901760, %v28532_v29 }
 0x3b1   : > { %v28516_v18 = vsel %vm6848_vm8, %v15273_v5, %v28510_v34 }
 0x3b2   : > { %v9785_v33 = vsub.f32 %v28532_v29, %v9784_v9 }
 0x3b3   : > { %v15271_v3 = vpop.permute.xlu1 %15270 }
 0x3b4   : > { %v28521_v17 = vsel %vm6848_vm8, %v15271_v3, %v15273_v5  ;;  %v16206_v21 = vpop.permute.xlu0 %16205  ;;  %9155 = vmatmul.mubr.f32.vlgmr.msra.gmra.mrb[2].mxu0 %v28431_v22  ;;  %v9786_v8 = vand.u32 4294901760, %v9785_v33  ;;  %v28608_v5 = vand.u32 4294901760, %v10620_v52  ;;  %v28625_v3 = vand.u32 4294901760, %v10626_v50 }
 0x3b5   : > { %9164 = vmatpush1.msra.mxu0 %v28448_v60  ;;  %9227 = vmatprep.mubr.f32.mxu0 %v27316_v0  ;;  %v28544_v60 = vand.u32 4294901760, %v28526_v47 }
 0x3b6   : > { %9699 = vmatprep.subr.mxu0 %v28494_v27 }
 0x3b7   : > { %v28534_v54 = vpop.permute.xlu1 %16207  ;;  %v9768_v31 = vsub.f32 %v28526_v47, %v28544_v60 }
 0x3b8   : > { %v28538_v1 = vsel %vm7782_vm9, %v16206_v21, %v28534_v54  ;;  %v16204_v24 = vpop.permute.xlu0 %16203 }
 0x3b9   : > { %v28547_v63 = vsel %vm7782_vm9, %v16204_v24, %v16206_v21 }
 0x3bb   : > { %v8760_v11 = vpop.permute.xlu1 %8759 }
 0x3bc   : > { %v8763_v38 = vsel %vm324_vm2, %v28439_v12, %v8760_v11  ;;  %9229 = vmatmul.mubr.f32.vlgmr.msra.gmra.mrb[2].mxu0 %v28431_v22  ;;  %v9769_v12 = vand.u32 4294901760, %v9768_v31  ;;  %v9688_v42 = vpop.permute.xlu0 %9687  ;;  %v25716_v31 = vld [vmem:[%s30187_s3 + $0x18] sm:$0xff] }
 0x3bd   : > { %v9236_v32 = vand.u32 4294901760, %v8763_v38  ;;  %9701 = vmatpush1.msra.mxu0 %v28518_v55  ;;  %9764 = vmatprep.mubr.f32.mxu0 %v27316_v0 }
 0x3be   : > { %9781 = vmatprep.subr.mxu0 %v9780_v15 }
 0x3bf   : > { %v9313_v61 = vsub.f32 %v8763_v38, %v9236_v32  ;;  %26328 = vmatpush3.msra.mxu1 %v9236_v32 }
 0x3c0   : > { %26330 = vmatmul.mubr.f32.vlgmr.msra.gmra.mrb[108].mxu1 %v28446_v2  ;;  %26332 = vmatprep.subr.mxu1 %v27316_v0  ;;  %v9691_v2 = vsel %vm1254_vm5, %v28452_v46, %v9688_v42 }
 0x3c1   : > { %v9314_v16 = vand.u32 4294901760, %v9313_v61  ;;  %26334 = vmatprep.mubr.msk.f32.mxu1 %vm27325_vm0, %v27316_v0  ;;  %v28573_v51 = vand.u32 4294901760, %v9691_v2 }
 0x3c3   : > { %v9315_v43 = vsub.f32 %v9313_v61, %v9314_v16  ;;  %v10241_v46 = vsub.f32 %v9691_v2, %v28573_v51 }
 0x3c4   : > { %9770 = vmatmul.mubr.f32.vlgmr.msra.gmra.mrb[2].mxu0 %v9769_v12 }
 0x3c5   : > { %9787 = vmatpush1.msra.mxu0 %v9786_v8  ;;  %v9316_v49 = vand.u32 4294901760, %v9315_v43  ;;  %9850 = vmatprep.mubr.f32.mxu0 %v27316_v0 }
 0x3c6   : > { %9860 = vmatprep.subr.mxu0 %v28507_v45  ;;  %v28620_v45 = vsub.f32 %v10620_v52, %v28608_v5  ;;  %v28744_v52 = vand.u32 4294901760, %v28470_v25 }
 0x3c7   : > { %26333 = vmatpush3.msra.mxu1 %v9316_v49 }
 0x3c8   : > { %26335 = vmatmul.mubr.f32.vlgmr.msra.gmra.mrb[110].mxu1 %v28431_v22  ;;  %26337 = vmatprep.subr.mxu1 %v27316_v0 }
 0x3c9   : > { %26338 = vmatpush3.msra.mxu1 %v9313_v61  ;;  %26339 = vmatprep.mubr.msk.f32.mxu1 %vm27325_vm0, %v27316_v0  ;;  %v11551_v61 = vpop.permute.xlu0 %11550 }
 0x3ca   : > { %26342 = vmatprep.subr.mxu1 %v27316_v0 }
 0x3cc   : > { %26340 = vmatmul.mubr.f32.vlgmr.msra.gmra.mrb[112].mxu1 %v28434_v10  ;;  %9852 = vmatmul.mubr.f32.vlgmr.msra.gmra.mrb[2].mxu0 %v28512_v14  ;;  %v10242_v10 = vand.u32 4294901760, %v10241_v46 }
 0x3cd   : > { %26343 = vmatpush3.msra.mxu1 %v9236_v32  ;;  %9863 = vmatpush1.msra.mxu0 %v28532_v29 }
 0x3ce   : > { %9936 = vmatprep.subr.mxu0 %v28494_v27  ;;  %26344 = vmatprep.mubr.msk.f32.mxu1 %vm27325_vm0, %v27316_v0 }
 0x3cf   : > { %26347 = vmatprep.subr.mxu1 %v27316_v0  ;;  %9926 = vmatprep.mubr.f32.mxu0 %v27316_v0 }
 0x3d0   : > { %26345 = vmatmul.mubr.f32.vlgmr.msra.gmra.mrb[114].mxu1 %v28437_v26  ;;  %v10243_v26 = vsub.f32 %v10241_v46, %v10242_v10 }
 0x3d1   : > { %26348 = vmatpush3.msra.mxu1 %v9314_v16  ;;  %26349 = vmatprep.mubr.msk.f32.mxu1 %vm27325_vm0, %v27316_v0 }
 0x3d2   : > { %26352 = vmatprep.subr.mxu1 %v27316_v0  ;;  %v10244_v62 = vand.u32 4294901760, %v10243_v26 }
 0x3d4   : > { %26350 = vmatmul.mubr.f32.vlgmr.msra.gmra.mrb[116].mxu1 %v28431_v22  ;;  %9929 = vmatmul.mubr.f32.vlgmr.msra.gmra.mrb[2].mxu0 %v28526_v47 }
 0x3d5   : > { %26353 = vmatpush3.msra.mxu1 %v9236_v32  ;;  %9938 = vmatpush1.msra.mxu0 %v28518_v55 }
 0x3d6   : > { %10014 = vmatprep.subr.mxu0 %v9778_v30  ;;  %26354 = vmatprep.mubr.msk.f32.mxu1 %vm27325_vm0, %v27316_v0  ;;  %v28639_v30 = vsub.f32 %v10626_v50, %v28625_v3  ;;  %v28770_v50 = vand.u32 4294901760, %v28382_v36 }
 0x3d7   : > { %26357 = vmatprep.subr.mxu1 %v27316_v0  ;;  %10001 = vmatprep.mubr.f32.mxu0 %v27316_v0 }
 0x3d8   : > { %26355 = vmatmul.mubr.f32.vlgmr.msra.gmra.mrb[118].mxu1 %v28431_v22  ;;  %v10618_v22 = vpop.permute.xlu1 %10617  ;;  %v28658_v24 = vand.u32 4294901760, %v28639_v30 }
 0x3d9   : > { %26358 = vmatpush3.msra.mxu1 %v28573_v51  ;;  %26359 = vmatprep.mubr.msk.f32.mxu1 %vm27325_vm0, %v27316_v0  ;;  %v10621_v23 = vsel %vm2185_vm3, %v28458_v57, %v10618_v22  ;;  %v10708_v57 = vand.u32 4294901760, %v28620_v45 }
 0x3da   : > { %26362 = vmatprep.subr.mxu1 %v27316_v0  ;;  %v28633_v21 = vand.u32 4294901760, %v10621_v23 }
 0x3dc   : > { %10005 = vmatmul.mubr.f32.vlgmr.msra.gmra.mrb[2].mxu0 %v28544_v60  ;;  %26360 = vmatmul.mubr.f32.vlgmr.msra.gmra.mrb[120].mxu1 %v9769_v12  ;;  %v11554_v12 = vsel %vm3119_vm4, %v28466_v7, %v11551_v61 }
 0x3dd   : > { %10018 = vmatpush1.msra.mxu0 %v9784_v9  ;;  %26363 = vmatpush3.msra.mxu1 %v10244_v62  ;;  %v10698_v9 = vsub.f32 %v28639_v30, %v28658_v24  ;;  %v28699_v43 = vand.u32 4294901760, %v11554_v12  ;;  %v28758_v62 = vsub.f32 %v28470_v25, %v28744_v52 }
 0x3de   : > { %10090 = vmatprep.subr.mxu0 %v28494_v27  ;;  %26364 = vmatprep.mubr.msk.f32.mxu1 %vm27325_vm0, %v27316_v0  ;;  %v28631_v27 = vand.u32 4294901760, %v28462_v4 }
 0x3df   : > { %26367 = vmatprep.subr.mxu1 %v27316_v0  ;;  %10081 = vmatprep.mubr.f32.mxu0 %v27316_v0  ;;  %v10699_v15 = vand.u32 4294901760, %v10698_v9  ;;  %v12104_v7 = vsub.f32 %v11554_v12, %v28699_v43  ;;  %v11641_v25 = vand.u32 4294901760, %v28758_v62 }
 0x3e0   : > { %26365 = vmatmul.mubr.f32.vlgmr.msra.gmra.mrb[122].mxu1 %v28512_v14  ;;  %v28648_v29 = vsub.f32 %v28462_v4, %v28631_v27 }
 0x3e1   : > { %26368 = vmatpush3.msra.mxu1 %v10241_v46  ;;  %26369 = vmatprep.mubr.msk.f32.mxu1 %vm27325_vm0, %v27316_v0  ;;  %v12105_v49 = vand.u32 4294901760, %v12104_v7 }
 0x3e2   : > { %26372 = vmatprep.subr.mxu1 %v27316_v0  ;;  %v10714_v4 = vand.u32 4294901760, %v28648_v29 }
 0x3e4   : > { %10083 = vmatmul.mubr.f32.vlgmr.msra.gmra.mrb[2].mxu0 %v28512_v14  ;;  %26370 = vmatmul.mubr.f32.vlgmr.msra.gmra.mrb[124].mxu1 %v28526_v47  ;;  %v11171_v47 = vsub.f32 %v10621_v23, %v28633_v21  ;;  %v10715_v11 = vsub.f32 %v28648_v29, %v10714_v4 }
 0x3e5   : > { %10092 = vmatpush1.msra.mxu0 %v28518_v55  ;;  %26373 = vmatpush3.msra.mxu1 %v28573_v51  ;;  %v10709_v55 = vsub.f32 %v28620_v45, %v10708_v57 }
 0x3e6   : > { %10629 = vmatprep.subr.mxu0 %v28608_v5  ;;  %26374 = vmatprep.mubr.msk.f32.mxu1 %vm27325_vm0, %v27316_v0  ;;  %v11172_v59 = vand.u32 4294901760, %v11171_v47  ;;  %v10716_v32 = vand.u32 4294901760, %v10715_v11 }
 0x3e7   : > { %26377 = vmatprep.subr.mxu1 %v27316_v0  ;;  %10155 = vmatprep.mubr.f32.mxu0 %v27316_v0 }
 0x3e8   : > { %26375 = vmatmul.mubr.f32.vlgmr.msra.gmra.mrb[126].mxu1 %v28544_v60  ;;  %v10710_v60 = vand.u32 4294901760, %v10709_v55  ;;  %v11173_v38 = vsub.f32 %v11171_v47, %v11172_v59 }
 0x3e9   : > { %26378 = vmatpush3.msra.mxu1 %v10242_v10  ;;  %26379 = vmatprep.mubr.msk.f32.mxu1 %vm27325_vm0, %v27316_v0  ;;  %v25717_v10 = vld [vmem:[%s30187_s3 + $0x20] sm:$0xff] }
 0x3ea   : > { %26382 = vmatprep.subr.mxu1 %v27316_v0  ;;  %v11174_v33 = vand.u32 4294901760, %v11173_v38  ;;  %v12478_v41 = vsel %vm331_vm1, %v25717_v10, 0 }
 0x3eb   : > { %v28761_v22 = vand.u32 4294901760, %v12478_v41 }
 0x3ec   : > { %10157 = vmatmul.mubr.f32.vlgmr.msra.gmra.mrb[2].mxu0 %v28512_v14  ;;  %26380 = vmatmul.mubr.f32.vlgmr.msra.gmra.mrb[128].mxu1 %v28512_v14 }
 0x3ed   : > { %26383 = vmatpush3.msra.mxu1 %v28573_v51  ;;  %10631 = vmatpush1.msra.mxu0 %v28631_v27  ;;  %v12106_v51 = vsub.f32 %v12104_v7, %v12105_v49 }
 0x3ee   : > { %10711 = vmatprep.subr.mxu0 %v10710_v60  ;;  %26384 = vmatprep.mubr.msk.f32.mxu1 %vm27325_vm0, %v27316_v0  ;;  %v13411_v60 = vpop.permute.xlu1 %13410 }
 0x3ef   : > { %26387 = vmatprep.subr.mxu1 %v27316_v0  ;;  %10694 = vmatprep.mubr.f32.mxu0 %v27316_v0  ;;  %v12107_v26 = vand.u32 4294901760, %v12106_v51  ;;  %v13414_v11 = vsel %vm4980_vm6, %v28475_v37, %v13411_v60 }
 0x3f0   : > { %26385 = vmatmul.mubr.f32.vlgmr.msra.gmra.mrb[130].mxu1 %v28512_v14  ;;  %v11559_v14 = vsel %vm331_vm1, %v25716_v31, 0 }
 0x3f1   : > { %26388 = vmatpush3.msra.mxu1 %v28633_v21  ;;  %26389 = vmatprep.mubr.msk.f32.mxu1 %vm27325_vm0, %v27316_v0  ;;  %v28694_v16 = vand.u32 4294901760, %v11559_v14 }
 0x3f2   : > { %26392 = vmatprep.subr.mxu1 %v27316_v0 }
 0x3f3   : > { %v28704_v8 = vsub.f32 %v11559_v14, %v28694_v16 }
 0x3f4   : > { %10700 = vmatmul.mubr.f32.vlgmr.msra.gmra.mrb[2].mxu0 %v10699_v15  ;;  %26390 = vmatmul.mubr.f32.vlgmr.msra.gmra.mrb[132].mxu1 %v10699_v15  ;;  %v28841_v15 = vand.u32 4294901760, %v13414_v11 }
 0x3f5   : > { %10717 = vmatpush1.msra.mxu0 %v10716_v32  ;;  %26393 = vmatpush3.msra.mxu1 %v11174_v33  ;;  %v28716_v42 = vand.u32 4294901760, %v28704_v8 }
 0x3f6   : > { %10790 = vmatprep.subr.mxu0 %v28620_v45  ;;  %26394 = vmatprep.mubr.msk.f32.mxu1 %vm27325_vm0, %v27316_v0  ;;  %v28776_v45 = vsub.f32 %v12478_v41, %v28761_v22  ;;  %v13964_v37 = vsub.f32 %v13414_v11, %v28841_v15 }
 0x3f7   : > { %26397 = vmatprep.subr.mxu1 %v27316_v0  ;;  %10780 = vmatprep.mubr.f32.mxu0 %v27316_v0  ;;  %v11631_v2 = vsub.f32 %v28704_v8, %v28716_v42 }
 0x3f8   : > { %26395 = vmatmul.mubr.f32.vlgmr.msra.gmra.mrb[134].mxu1 %v28625_v3  ;;  %v13965_v33 = vand.u32 4294901760, %v13964_v37 }
 0x3f9   : > { %26398 = vmatpush3.msra.mxu1 %v11171_v47  ;;  %26399 = vmatprep.mubr.msk.f32.mxu1 %vm27325_vm0, %v27316_v0  ;;  %v28734_v46 = vand.u32 4294901760, %v11631_v2 }
 0x3fa   : > { %26402 = vmatprep.subr.mxu1 %v27316_v0  ;;  %v13966_v14 = vsub.f32 %v13964_v37, %v13965_v33 }
 0x3fc   : > { %10782 = vmatmul.mubr.f32.vlgmr.msra.gmra.mrb[2].mxu0 %v28625_v3  ;;  %26400 = vmatmul.mubr.f32.vlgmr.msra.gmra.mrb[136].mxu1 %v28639_v30 }
 0x3fd   : > { %10793 = vmatpush1.msra.mxu0 %v28648_v29  ;;  %26403 = vmatpush3.msra.mxu1 %v28633_v21 }
 0x3fe   : > { %10866 = vmatprep.subr.mxu0 %v28608_v5  ;;  %26404 = vmatprep.mubr.msk.f32.mxu1 %vm27325_vm0, %v27316_v0 }
 0x3ff   : > { %26407 = vmatprep.subr.mxu1 %v27316_v0  ;;  %10856 = vmatprep.mubr.f32.mxu0 %v27316_v0 }
 0x400   : > { %26405 = vmatmul.mubr.f32.vlgmr.msra.gmra.mrb[138].mxu1 %v28658_v24 }
 0x401   : > { %26408 = vmatpush3.msra.mxu1 %v11172_v59  ;;  %26409 = vmatprep.mubr.msk.f32.mxu1 %vm27325_vm0, %v27316_v0 }
 0x402   : > { %26412 = vmatprep.subr.mxu1 %v27316_v0 }
 0x404   : > { %10859 = vmatmul.mubr.f32.vlgmr.msra.gmra.mrb[2].mxu0 %v28639_v30  ;;  %26410 = vmatmul.mubr.f32.vlgmr.msra.gmra.mrb[140].mxu1 %v28625_v3 }
 0x405   : > { %10868 = vmatpush1.msra.mxu0 %v28631_v27  ;;  %26413 = vmatpush3.msra.mxu1 %v28633_v21  ;;  %v13023_v21 = vsub.f32 %v28382_v36, %v28770_v50 }
 0x406   : > { %10944 = vmatprep.subr.mxu0 %v10708_v57  ;;  %26414 = vmatprep.mubr.msk.f32.mxu1 %vm27325_vm0, %v27316_v0  ;;  %v28796_v57 = vand.u32 4294901760, %v28776_v45 }
 0x407   : > { %26417 = vmatprep.subr.mxu1 %v27316_v0  ;;  %10931 = vmatprep.mubr.f32.mxu0 %v27316_v0  ;;  %v13024_v30 = vand.u32 4294901760, %v13023_v21 }
 0x408   : > { %26415 = vmatmul.mubr.f32.vlgmr.msra.gmra.mrb[142].mxu1 %v28625_v3  ;;  %v12550_v29 = vsub.f32 %v28776_v45, %v28796_v57 }
 0x409   : > { %26418 = vmatpush3.msra.mxu1 %v28699_v43  ;;  %26419 = vmatprep.mubr.msk.f32.mxu1 %vm27325_vm0, %v27316_v0 }
 0x40a   : > { %26422 = vmatprep.subr.mxu1 %v27316_v0  ;;  %v28816_v55 = vand.u32 4294901760, %v12550_v29  ;;  %v15277_v29 = vpop.permute.xlu1 %15276 }
 0x40c   : > { %10935 = vmatmul.mubr.f32.vlgmr.msra.gmra.mrb[2].mxu0 %v28658_v24  ;;  %26420 = vmatmul.mubr.f32.vlgmr.msra.gmra.mrb[144].mxu1 %v28734_v46  ;;  %v25718_v24 = vld [vmem:[%s30187_s3 + $0x28] sm:$0xff] }
 0x40d   : > { %10948 = vmatpush1.msra.mxu0 %v10714_v4  ;;  %26423 = vmatpush3.msra.mxu1 %v12107_v26  ;;  %v13419_v9 = vsel %vm331_vm1, %v25718_v24, 0  ;;  %v28913_v26 = vand.u32 4294901760, %v28350_v13 }
 0x40e   : > { %11020 = vmatprep.subr.mxu0 %v28608_v5  ;;  %26424 = vmatprep.mubr.msk.f32.mxu1 %vm27325_vm0, %v27316_v0  ;;  %v28767_v5 = vand.u32 4294901760, %v28473_v39  ;;  %v28836_v38 = vand.u32 4294901760, %v13419_v9 }
 0x40f   : > { %26427 = vmatprep.subr.mxu1 %v27316_v0  ;;  %11011 = vmatprep.mubr.f32.mxu0 %v27316_v0  ;;  %v28931_v41 = vsub.f32 %v28350_v13, %v28913_v26 }
 0x410   : > { %26425 = vmatmul.mubr.f32.vlgmr.msra.gmra.mrb[146].mxu1 %v28694_v16  ;;  %v28785_v23 = vsub.f32 %v28473_v39, %v28767_v5  ;;  %v28846_v31 = vsub.f32 %v13419_v9, %v28836_v38 }
 0x411   : > { %26428 = vmatpush3.msra.mxu1 %v12104_v7  ;;  %26429 = vmatprep.mubr.msk.f32.mxu1 %vm27325_vm0, %v27316_v0  ;;  %v28888_v7 = vand.u32 4294901760, %v28353_v19 }
 0x412   : > { %26432 = vmatprep.subr.mxu1 %v27316_v0  ;;  %v11647_v39 = vand.u32 4294901760, %v28785_v23  ;;  %v28858_v32 = vand.u32 4294901760, %v28846_v31 }
 0x413   : > { %v28903_v51 = vsub.f32 %v28353_v19, %v28888_v7 }
 0x414   : > { %11013 = vmatmul.mubr.f32.vlgmr.msra.gmra.mrb[2].mxu0 %v28625_v3  ;;  %26430 = vmatmul.mubr.f32.vlgmr.msra.gmra.mrb[148].mxu1 %v28704_v8  ;;  %v11648_v47 = vsub.f32 %v28785_v23, %v11647_v39  ;;  %v13491_v61 = vsub.f32 %v28846_v31, %v28858_v32 }
 0x415   : > { %11022 = vmatpush1.msra.mxu0 %v28631_v27  ;;  %26433 = vmatpush3.msra.mxu1 %v28699_v43  ;;  %v11642_v27 = vsub.f32 %v28758_v62, %v11641_v25  ;;  %v12560_v19 = vand.u32 4294901760, %v28903_v51 }
 0x416   : > { %11562 = vmatprep.subr.mxu0 %v28744_v52  ;;  %26434 = vmatprep.mubr.msk.f32.mxu1 %vm27325_vm0, %v27316_v0  ;;  %v11649_v4 = vand.u32 4294901760, %v11648_v47  ;;  %v28876_v12 = vand.u32 4294901760, %v13491_v61 }
 0x417   : > { %26437 = vmatprep.subr.mxu1 %v27316_v0  ;;  %11085 = vmatprep.mubr.f32.mxu0 %v27316_v0  ;;  %v11643_v36 = vand.u32 4294901760, %v11642_v27 }
 0x418   : > { %26435 = vmatmul.mubr.f32.vlgmr.msra.gmra.mrb[150].mxu1 %v28716_v42 }
 0x419   : > { %26438 = vmatpush3.msra.mxu1 %v12105_v49  ;;  %26439 = vmatprep.mubr.msk.f32.mxu1 %vm27325_vm0, %v27316_v0  ;;  %v14344_v49 = vpop.permute.xlu0 %14343 }
 0x41a   : > { %26442 = vmatprep.subr.mxu1 %v27316_v0 }
 0x41c   : > { %11087 = vmatmul.mubr.f32.vlgmr.msra.gmra.mrb[2].mxu0 %v28625_v3  ;;  %26440 = vmatmul.mubr.f32.vlgmr.msra.gmra.mrb[152].mxu1 %v28694_v16  ;;  %v13025_v3 = vsub.f32 %v13023_v21, %v13024_v30 }
 0x41d   : > { %11564 = vmatpush1.msra.mxu0 %v28767_v5  ;;  %26443 = vmatpush3.msra.mxu1 %v28699_v43  ;;  %v25719_v43 = vld [vmem:[%s30187_s3 + $0x30] sm:$0xff]  ;;  %v16210_v61 = vpop.permute.xlu0 %16209 }
 0x41e   : > { %11644 = vmatprep.subr.mxu0 %v11643_v36  ;;  %26444 = vmatprep.mubr.msk.f32.mxu1 %vm27325_vm0, %v27316_v0  ;;  %v13026_v59 = vand.u32 4294901760, %v13025_v3  ;;  %v14352_v2 = vsel %vm331_vm1, %v25719_v43, 0  ;;  %v15280_v3 = vsel %vm6848_vm8, %v28510_v34, %v15277_v29  ;;  %v16213_v43 = vsel %vm7782_vm9, %v28534_v54, %v16210_v61 }
 0x41f   : > { %26447 = vmatprep.subr.mxu1 %v27316_v0  ;;  %11627 = vmatprep.mubr.f32.mxu0 %v27316_v0  ;;  %v28983_v24 = vand.u32 4294901760, %v15280_v3 }
 0x420   : > { %26445 = vmatmul.mubr.f32.vlgmr.msra.gmra.mrb[154].mxu1 %v28694_v16 }
 0x421   : > { %26448 = vmatpush3.msra.mxu1 %v28770_v50  ;;  %26449 = vmatprep.mubr.msk.f32.mxu1 %vm27325_vm0, %v27316_v0  ;;  %v15830_v34 = vsub.f32 %v15280_v3, %v28983_v24 }
 0x422   : > { %26452 = vmatprep.subr.mxu1 %v27316_v0 }
 0x423   : > { %v15831_v60 = vand.u32 4294901760, %v15830_v34 }
 0x424   : > { %11633 = vmatmul.mubr.f32.vlgmr.msra.gmra.mrb[2].mxu0 %v28734_v46  ;;  %26450 = vmatmul.mubr.f32.vlgmr.msra.gmra.mrb[156].mxu1 %v28816_v55  ;;  %v28905_v46 = vand.u32 4294901760, %v14352_v2 }
 0x425   : > { %11650 = vmatpush1.msra.mxu0 %v11649_v4  ;;  %26453 = vmatpush3.msra.mxu1 %v13026_v59  ;;  %v15832_v11 = vsub.f32 %v15830_v34, %v15831_v60 }
 0x426   : > { %11723 = vmatprep.subr.mxu0 %v28758_v62  ;;  %26454 = vmatprep.mubr.msk.f32.mxu1 %vm27325_vm0, %v27316_v0  ;;  %v12561_v62 = vsub.f32 %v28903_v51, %v12560_v19 }
 0x427   : > { %26457 = vmatprep.subr.mxu1 %v27316_v0  ;;  %11713 = vmatprep.mubr.f32.mxu0 %v27316_v0 }
 0x428   : > { %26455 = vmatmul.mubr.f32.vlgmr.msra.gmra.mrb[158].mxu1 %v28761_v22  ;;  %v12562_v13 = vand.u32 4294901760, %v12561_v62 }
 0x429   : > { %26458 = vmatpush3.msra.mxu1 %v13023_v21  ;;  %26459 = vmatprep.mubr.msk.f32.mxu1 %vm27325_vm0, %v27316_v0 }
 0x42a   : > { %26462 = vmatprep.subr.mxu1 %v27316_v0 }
 0x42c   : > { %11715 = vmatmul.mubr.f32.vlgmr.msra.gmra.mrb[2].mxu0 %v28694_v16  ;;  %26460 = vmatmul.mubr.f32.vlgmr.msra.gmra.mrb[160].mxu1 %v28776_v45 }
 0x42d   : > { %11726 = vmatpush1.msra.mxu0 %v28785_v23  ;;  %26463 = vmatpush3.msra.mxu1 %v28770_v50 }
 0x42e   : > { %11799 = vmatprep.subr.mxu0 %v28744_v52  ;;  %26464 = vmatprep.mubr.msk.f32.mxu1 %vm27325_vm0, %v27316_v0 }
 0x42f   : > { %26467 = vmatprep.subr.mxu1 %v27316_v0  ;;  %11789 = vmatprep.mubr.f32.mxu0 %v27316_v0 }
 0x430   : > { %26465 = vmatmul.mubr.f32.vlgmr.msra.gmra.mrb[162].mxu1 %v28796_v57 }
 0x431   : > { %26468 = vmatpush3.msra.mxu1 %v13024_v30  ;;  %26469 = vmatprep.mubr.msk.f32.mxu1 %vm27325_vm0, %v27316_v0 }
 0x432   : > { %26472 = vmatprep.subr.mxu1 %v27316_v0 }
 0x434   : > { %11792 = vmatmul.mubr.f32.vlgmr.msra.gmra.mrb[2].mxu0 %v28704_v8  ;;  %26470 = vmatmul.mubr.f32.vlgmr.msra.gmra.mrb[164].mxu1 %v28761_v22  ;;  %v13967_v8 = vand.u32 4294901760, %v13966_v14 }
 0x435   : > { %11801 = vmatpush1.msra.mxu0 %v28767_v5  ;;  %26473 = vmatpush3.msra.mxu1 %v28770_v50 }
 0x436   : > { %11877 = vmatprep.subr.mxu0 %v11641_v25  ;;  %26474 = vmatprep.mubr.msk.f32.mxu1 %vm27325_vm0, %v27316_v0  ;;  %v12566_v25 = vand.u32 4294901760, %v28931_v41 }
 0x437   : > { %26477 = vmatprep.subr.mxu1 %v27316_v0  ;;  %11864 = vmatprep.mubr.f32.mxu0 %v27316_v0 }
 0x438   : > { %26475 = vmatmul.mubr.f32.vlgmr.msra.gmra.mrb[166].mxu1 %v28761_v22 }
 0x439   : > { %26478 = vmatpush3.msra.mxu1 %v28841_v15  ;;  %26479 = vmatprep.mubr.msk.f32.mxu1 %vm27325_vm0, %v27316_v0 }
 0x43a   : > { %26482 = vmatprep.subr.mxu1 %v27316_v0 }
 0x43c   : > { %11868 = vmatmul.mubr.f32.vlgmr.msra.gmra.mrb[2].mxu0 %v28716_v42  ;;  %26480 = vmatmul.mubr.f32.vlgmr.msra.gmra.mrb[168].mxu1 %v28876_v12  ;;  %v14347_v42 = vsel %vm5914_vm7, %v28492_v53, %v14344_v49  ;;  %v28919_v53 = vsub.f32 %v14352_v2, %v28905_v46  ;;  %v29055_v49 = vand.u32 4294901760, %v16213_v43 }
 0x43d   : > { %11881 = vmatpush1.msra.mxu0 %v11647_v39  ;;  %26483 = vmatpush3.msra.mxu1 %v13967_v8  ;;  %v28910_v10 = vand.u32 4294901760, %v14347_v42  ;;  %v25720_v39 = vld [vmem:[%s30187_s3 + $0x38] sm:$0xff] }
 0x43e   : > { %11953 = vmatprep.subr.mxu0 %v28744_v52  ;;  %26484 = vmatprep.mubr.msk.f32.mxu1 %vm27325_vm0, %v27316_v0  ;;  %v15285_v47 = vsel %vm331_vm1, %v25720_v39, 0 }
 0x43f   : > { %26487 = vmatprep.subr.mxu1 %v27316_v0  ;;  %11944 = vmatprep.mubr.f32.mxu0 %v27316_v0  ;;  %v14897_v52 = vsub.f32 %v14347_v42, %v28910_v10  ;;  %v16763_v42 = vsub.f32 %v16213_v43, %v29055_v49 }
 0x440   : > { %26485 = vmatmul.mubr.f32.vlgmr.msra.gmra.mrb[170].mxu1 %v28836_v38 }
 0x441   : > { %26488 = vmatpush3.msra.mxu1 %v13964_v37  ;;  %26489 = vmatprep.mubr.msk.f32.mxu1 %vm27325_vm0, %v27316_v0  ;;  %v14898_v50 = vand.u32 4294901760, %v14897_v52  ;;  %v15833_v37 = vand.u32 4294901760, %v15832_v11 }
 0x442   : > { %26492 = vmatprep.subr.mxu1 %v27316_v0 }
 0x443   : > { %v14899_v21 = vsub.f32 %v14897_v52, %v14898_v50 }
 0x444   : > { %11946 = vmatmul.mubr.f32.vlgmr.msra.gmra.mrb[2].mxu0 %v28694_v16  ;;  %26490 = vmatmul.mubr.f32.vlgmr.msra.gmra.mrb[172].mxu1 %v28846_v31 }
 0x445   : > { %11955 = vmatpush1.msra.mxu0 %v28767_v5  ;;  %26493 = vmatpush3.msra.mxu1 %v28841_v15  ;;  %v28938_v5 = vand.u32 4294901760, %v28919_v53  ;;  %v14900_v36 = vand.u32 4294901760, %v14899_v21 }
 0x446   : > { %12481 = vmatprep.subr.mxu0 %v28888_v7  ;;  %26494 = vmatprep.mubr.msk.f32.mxu1 %vm27325_vm0, %v27316_v0 }
 0x447   : > { %26497 = vmatprep.subr.mxu1 %v27316_v0  ;;  %12018 = vmatprep.mubr.f32.mxu0 %v27316_v0  ;;  %v14424_v23 = vsub.f32 %v28919_v53, %v28938_v5 }
 0x448   : > { %26495 = vmatmul.mubr.f32.vlgmr.msra.gmra.mrb[174].mxu1 %v28858_v32 }
 0x449   : > { %26498 = vmatpush3.msra.mxu1 %v13965_v33  ;;  %26499 = vmatprep.mubr.msk.f32.mxu1 %vm27325_vm0, %v27316_v0  ;;  %v28958_v27 = vand.u32 4294901760, %v14424_v23  ;;  %v29028_v33 = vand.u32 4294901760, %v28480_v48  ;;  %v29142_v23 = vand.u32 4294901760, %v28498_v40 }
 0x44a   : > { %26502 = vmatprep.subr.mxu1 %v27316_v0 }
 0x44c   : > { %12020 = vmatmul.mubr.f32.vlgmr.msra.gmra.mrb[2].mxu0 %v28694_v16  ;;  %26500 = vmatmul.mubr.f32.vlgmr.msra.gmra.mrb[176].mxu1 %v28836_v38  ;;  %v12567_v16 = vsub.f32 %v28931_v41, %v12566_v25 }
 0x44d   : > { %12483 = vmatpush1.msra.mxu0 %v28913_v26  ;;  %26503 = vmatpush3.msra.mxu1 %v28841_v15  ;;  %v25721_v15 = vld [vmem:[%s30187_s3 + $0x40] sm:$0xff] }
 0x44e   : > { %12563 = vmatprep.subr.mxu0 %v12562_v13  ;;  %26504 = vmatprep.mubr.msk.f32.mxu1 %vm27325_vm0, %v27316_v0  ;;  %v12568_v30 = vand.u32 4294901760, %v12567_v16  ;;  %v16218_v14 = vsel %vm331_vm1, %v25721_v15, 0 }
 0x44f   : > { %26507 = vmatprep.subr.mxu1 %v27316_v0  ;;  %12546 = vmatprep.mubr.f32.mxu0 %v27316_v0  ;;  %v29047_v8 = vand.u32 4294901760, %v16218_v14 }
 0x450   : > { %26505 = vmatmul.mubr.f32.vlgmr.msra.gmra.mrb[178].mxu1 %v28836_v38 }
 0x451   : > { %26508 = vmatpush3.msra.mxu1 %v28910_v10  ;;  %26509 = vmatprep.mubr.msk.f32.mxu1 %vm27325_vm0, %v27316_v0  ;;  %v29061_v54 = vsub.f32 %v16218_v14, %v29047_v8 }
 0x452   : > { %26512 = vmatprep.subr.mxu1 %v27316_v0 }
 0x454   : > { %12552 = vmatmul.mubr.f32.vlgmr.msra.gmra.mrb[2].mxu0 %v28816_v55  ;;  %26510 = vmatmul.mubr.f32.vlgmr.msra.gmra.mrb[180].mxu1 %v28958_v27  ;;  %v28978_v55 = vand.u32 4294901760, %v15285_v47 }
 0x455   : > { %12569 = vmatpush1.msra.mxu0 %v12568_v30  ;;  %26513 = vmatpush3.msra.mxu1 %v14900_v36  ;;  %v14433_v30 = vsub.f32 %v28498_v40, %v29142_v23 }
 0x456   : > { %12642 = vmatprep.subr.mxu0 %v28903_v51  ;;  %26514 = vmatprep.mubr.msk.f32.mxu1 %vm27325_vm0, %v27316_v0  ;;  %v28988_v4 = vsub.f32 %v15285_v47, %v28978_v55  ;;  %v29150_v47 = vand.u32 4294901760, %v28502_v28 }
 0x457   : > { %26517 = vmatprep.subr.mxu1 %v27316_v0  ;;  %12632 = vmatprep.mubr.f32.mxu0 %v27316_v0 }
 0x458   : > { %26515 = vmatmul.mubr.f32.vlgmr.msra.gmra.mrb[182].mxu1 %v28905_v46  ;;  %v29000_v59 = vand.u32 4294901760, %v28988_v4  ;;  %v14439_v40 = vsub.f32 %v28502_v28, %v29150_v47 }
 0x459   : > { %26518 = vmatpush3.msra.mxu1 %v14897_v52  ;;  %26519 = vmatprep.mubr.msk.f32.mxu1 %vm27325_vm0, %v27316_v0 }
 0x45a   : > { %26522 = vmatprep.subr.mxu1 %v27316_v0  ;;  %v15357_v9 = vsub.f32 %v28988_v4, %v29000_v59 }
 0x45c   : > { %12634 = vmatmul.mubr.f32.vlgmr.msra.gmra.mrb[2].mxu0 %v28761_v22  ;;  %26520 = vmatmul.mubr.f32.vlgmr.msra.gmra.mrb[184].mxu1 %v28919_v53 }
 0x45d   : > { %12645 = vmatpush1.msra.mxu0 %v28931_v41  ;;  %26523 = vmatpush3.msra.mxu1 %v28910_v10 }
 0x45e   : > { %12718 = vmatprep.subr.mxu0 %v28888_v7  ;;  %26524 = vmatprep.mubr.msk.f32.mxu1 %vm27325_vm0, %v27316_v0 }
 0x45f   : > { %26527 = vmatprep.subr.mxu1 %v27316_v0  ;;  %12708 = vmatprep.mubr.f32.mxu0 %v27316_v0 }
 0x460   : > { %26525 = vmatmul.mubr.f32.vlgmr.msra.gmra.mrb[186].mxu1 %v28938_v5 }
 0x461   : > { %26528 = vmatpush3.msra.mxu1 %v14898_v50  ;;  %26529 = vmatprep.mubr.msk.f32.mxu1 %vm27325_vm0, %v27316_v0 }
 0x462   : > { %26532 = vmatprep.subr.mxu1 %v27316_v0 }
 0x464   : > { %12711 = vmatmul.mubr.f32.vlgmr.msra.gmra.mrb[2].mxu0 %v28776_v45  ;;  %26530 = vmatmul.mubr.f32.vlgmr.msra.gmra.mrb[188].mxu1 %v28905_v46  ;;  %v29018_v45 = vand.u32 4294901760, %v15357_v9 }
 0x465   : > { %12720 = vmatpush1.msra.mxu0 %v28913_v26  ;;  %26533 = vmatpush3.msra.mxu1 %v28910_v10  ;;  %v29080_v10 = vand.u32 4294901760, %v29061_v54 }
 0x466   : > { %12796 = vmatprep.subr.mxu0 %v12560_v19  ;;  %26534 = vmatprep.mubr.msk.f32.mxu1 %vm27325_vm0, %v27316_v0 }
 0x467   : > { %26537 = vmatprep.subr.mxu1 %v27316_v0  ;;  %12783 = vmatprep.mubr.f32.mxu0 %v27316_v0  ;;  %v16290_v52 = vsub.f32 %v29061_v54, %v29080_v10 }
 0x468   : > { %26535 = vmatmul.mubr.f32.vlgmr.msra.gmra.mrb[190].mxu1 %v28905_v46 }
 0x469   : > { %26538 = vmatpush3.msra.mxu1 %v28983_v24  ;;  %26539 = vmatprep.mubr.msk.f32.mxu1 %vm27325_vm0, %v27316_v0 }
 0x46a   : > { %26542 = vmatprep.subr.mxu1 %v27316_v0 }
 0x46c   : > { %12787 = vmatmul.mubr.f32.vlgmr.msra.gmra.mrb[2].mxu0 %v28796_v57  ;;  %26540 = vmatmul.mubr.f32.vlgmr.msra.gmra.mrb[192].mxu1 %v29018_v45  ;;  %v29042_v57 = vsub.f32 %v28480_v48, %v29028_v33 }
 0x46d   : > { %12800 = vmatpush1.msra.mxu0 %v12566_v25  ;;  %26543 = vmatpush3.msra.mxu1 %v15833_v37  ;;  %v14440_v37 = vand.u32 4294901760, %v14439_v40 }
 0x46e   : > { %12872 = vmatprep.subr.mxu0 %v28888_v7  ;;  %26544 = vmatprep.mubr.msk.f32.mxu1 %vm27325_vm0, %v27316_v0  ;;  %v29053_v7 = vand.u32 4294901760, %v28485_v44  ;;  %v13501_v48 = vand.u32 4294901760, %v29042_v57 }
 0x46f   : > { %26547 = vmatprep.subr.mxu1 %v27316_v0  ;;  %12863 = vmatprep.mubr.f32.mxu0 %v27316_v0  ;;  %v14441_v43 = vsub.f32 %v14439_v40, %v14440_v37 }
 0x470   : > { %26545 = vmatmul.mubr.f32.vlgmr.msra.gmra.mrb[194].mxu1 %v28978_v55  ;;  %v29070_v2 = vsub.f32 %v28485_v44, %v29053_v7  ;;  %v13502_v51 = vsub.f32 %v29042_v57, %v13501_v48 }
 0x471   : > { %26548 = vmatpush3.msra.mxu1 %v15830_v34  ;;  %26549 = vmatprep.mubr.msk.f32.mxu1 %vm27325_vm0, %v27316_v0 }
 0x472   : > { %26552 = vmatprep.subr.mxu1 %v27316_v0  ;;  %v13507_v44 = vand.u32 4294901760, %v29070_v2  ;;  %v13503_v19 = vand.u32 4294901760, %v13502_v51 }
 0x474   : > { %12865 = vmatmul.mubr.f32.vlgmr.msra.gmra.mrb[2].mxu0 %v28761_v22  ;;  %26550 = vmatmul.mubr.f32.vlgmr.msra.gmra.mrb[196].mxu1 %v28988_v4  ;;  %v13508_v41 = vsub.f32 %v29070_v2, %v13507_v44 }
 0x475   : > { %12874 = vmatpush1.msra.mxu0 %v28913_v26  ;;  %26553 = vmatpush3.msra.mxu1 %v28983_v24  ;;  %v16764_v26 = vand.u32 4294901760, %v16763_v42 }
 0x476   : > { %13422 = vmatprep.subr.mxu0 %v29028_v33  ;;  %26554 = vmatprep.mubr.msk.f32.mxu1 %vm27325_vm0, %v27316_v0  ;;  %v13509_v50 = vand.u32 4294901760, %v13508_v41 }
 0x477   : > { %26557 = vmatprep.subr.mxu1 %v27316_v0  ;;  %12937 = vmatprep.mubr.f32.mxu0 %v27316_v0  ;;  %v16765_v62 = vsub.f32 %v16763_v42, %v16764_v26 }
 0x478   : > { %26555 = vmatmul.mubr.f32.vlgmr.msra.gmra.mrb[198].mxu1 %v29000_v59 }
 0x479   : > { %26558 = vmatpush3.msra.mxu1 %v15831_v60  ;;  %26559 = vmatprep.mubr.msk.f32.mxu1 %vm27325_vm0, %v27316_v0  ;;  %v16766_v25 = vand.u32 4294901760, %v16765_v62 }
 0x47a   : > { %26562 = vmatprep.subr.mxu1 %v27316_v0 }
 0x47c   : > { %12939 = vmatmul.mubr.f32.vlgmr.msra.gmra.mrb[2].mxu0 %v28761_v22  ;;  %26560 = vmatmul.mubr.f32.vlgmr.msra.gmra.mrb[200].mxu1 %v28978_v55  ;;  %v29098_v22 = vand.u32 4294901760, %v16290_v52 }
 0x47d   : > { %13424 = vmatpush1.msra.mxu0 %v29053_v7  ;;  %26563 = vmatpush3.msra.mxu1 %v28983_v24 }
 0x47e   : > { %13504 = vmatprep.subr.mxu0 %v13503_v19  ;;  %26564 = vmatprep.mubr.msk.f32.mxu1 %vm27325_vm0, %v27316_v0 }
 0x47f   : > { %26567 = vmatprep.subr.mxu1 %v27316_v0  ;;  %13487 = vmatprep.mubr.f32.mxu0 %v27316_v0 }
 0x480   : > { %26565 = vmatmul.mubr.f32.vlgmr.msra.gmra.mrb[202].mxu1 %v28978_v55 }
 0x481   : > { %26568 = vmatpush3.msra.mxu1 %v29055_v49  ;;  %26569 = vmatprep.mubr.msk.f32.mxu1 %vm27325_vm0, %v27316_v0 }
 0x482   : > { %26572 = vmatprep.subr.mxu1 %v27316_v0 }
 0x484   : > { %13493 = vmatmul.mubr.f32.vlgmr.msra.gmra.mrb[2].mxu0 %v28876_v12  ;;  %26570 = vmatmul.mubr.f32.vlgmr.msra.gmra.mrb[204].mxu1 %v29098_v22 }
 0x485   : > { %13510 = vmatpush1.msra.mxu0 %v13509_v50  ;;  %26573 = vmatpush3.msra.mxu1 %v16766_v25 }
 0x486   : > { %13583 = vmatprep.subr.mxu0 %v29042_v57  ;;  %26574 = vmatprep.mubr.msk.f32.mxu1 %vm27325_vm0, %v27316_v0 }
 0x487   : > { %26577 = vmatprep.subr.mxu1 %v27316_v0  ;;  %13573 = vmatprep.mubr.f32.mxu0 %v27316_v0 }
 0x488   : > { %26575 = vmatmul.mubr.f32.vlgmr.msra.gmra.mrb[206].mxu1 %v29047_v8 }
 0x489   : > { %26578 = vmatpush3.msra.mxu1 %v16763_v42  ;;  %26579 = vmatprep.mubr.msk.f32.mxu1 %vm27325_vm0, %v27316_v0 }
 0x48a   : > { %26582 = vmatprep.subr.mxu1 %v27316_v0 }
 0x48c   : > { %13575 = vmatmul.mubr.f32.vlgmr.msra.gmra.mrb[2].mxu0 %v28836_v38  ;;  %26580 = vmatmul.mubr.f32.vlgmr.msra.gmra.mrb[208].mxu1 %v29061_v54 }
 0x48d   : > { %13586 = vmatpush1.msra.mxu0 %v29070_v2  ;;  %26583 = vmatpush3.msra.mxu1 %v29055_v49 }
 0x48e   : > { %13659 = vmatprep.subr.mxu0 %v29028_v33  ;;  %26584 = vmatprep.mubr.msk.f32.mxu1 %vm27325_vm0, %v27316_v0 }
 0x48f   : > { %26587 = vmatprep.subr.mxu1 %v27316_v0  ;;  %13649 = vmatprep.mubr.f32.mxu0 %v27316_v0 }
 0x490   : > { %26585 = vmatmul.mubr.f32.vlgmr.msra.gmra.mrb[210].mxu1 %v29080_v10 }
 0x491   : > { %26588 = vmatpush3.msra.mxu1 %v16764_v26  ;;  %26589 = vmatprep.mubr.msk.f32.mxu1 %vm27325_vm0, %v27316_v0 }
 0x492   : > { %26592 = vmatprep.subr.mxu1 %v27316_v0 }
 0x493   : > { %v9307_v12 = vpop.f32.mrb[108].mxu1 }
 0x494   : > { %13652 = vmatmul.mubr.f32.vlgmr.msra.gmra.mrb[2].mxu0 %v28846_v31  ;;  %26590 = vmatmul.mubr.f32.vlgmr.msra.gmra.mrb[212].mxu1 %v29047_v8  ;;  %v26331_v13 = vpop.f32.mrb[109].mxu1 }
 0x495   : > { %13661 = vmatpush1.msra.mxu0 %v29053_v7  ;;  %26593 = vmatpush3.msra.mxu1 %v29055_v49 }
 0x496   : > { %13737 = vmatprep.subr.mxu0 %v13501_v48  ;;  %26594 = vmatprep.mubr.msk.f32.mxu1 %vm27325_vm0, %v27316_v0  ;;  %v14442_v48 = vand.u32 4294901760, %v14441_v43 }
 0x497   : > { %13724 = vmatprep.mubr.f32.mxu0 %v27316_v0  ;;  %26597 = vmatprep.subr.mxu1 %v27316_v0 }
 0x498   : > { %26595 = vmatmul.mubr.f32.vlgmr.msra.gmra.mrb[214].mxu1 %v29047_v8 }
 0x499   : > { %26599 = vmatprep.mubr.msk.f32.mxu1 %vm27325_vm0, %v27316_v0 }
 0x49b   : > { %v9383_v31 = vpop.f32.mrb[110].mxu1 }
 0x49c   : > { %13728 = vmatmul.mubr.f32.vlgmr.msra.gmra.mrb[2].mxu0 %v28858_v32  ;;  %v9384_v21 = vadd.f32 %v9383_v31, %v9307_v12  ;;  %v26336_v16 = vpop.f32.mrb[111].mxu1  ;;  %v14434_v32 = vand.u32 4294901760, %v14433_v30 }
 0x49d   : > { %13741 = vmatpush1.msra.mxu0 %v13507_v44  ;;  %13804 = vmatprep.mubr.f32.mxu0 %v27316_v0 }
 0x49e   : > { %13813 = vmatprep.subr.mxu0 %v29028_v33  ;;  %v14435_v9 = vsub.f32 %v14433_v30, %v14434_v32 }
 0x49f   : > { %v9457_v39 = vpop.f32.mrb[112].mxu1 }
 0x4a0   : > { %v9458_v36 = vadd.f32 %v9457_v39, %v9384_v21  ;;  %v26341_v29 = vpop.f32.mrb[113].mxu1  ;;  %v14436_v61 = vand.u32 4294901760, %v14435_v9  ;;  %v29170_v39 = vand.u32 4294901760, %v28516_v18 }
 0x4a2   : > { %v15366_v29 = vsub.f32 %v28516_v18, %v29170_v39 }
 0x4a3   : > { %v9531_v3 = vpop.f32.mrb[114].mxu1 }
 0x4a4   : > { %13806 = vmatmul.mubr.f32.vlgmr.msra.gmra.mrb[2].mxu0 %v28836_v38  ;;  %v9532_v24 = vadd.f32 %v9531_v3, %v9458_v36  ;;  %v26346_v34 = vpop.f32.mrb[115].mxu1 }
 0x4a5   : > { %13815 = vmatpush1.msra.mxu0 %v29053_v7  ;;  %13878 = vmatprep.mubr.f32.mxu0 %v27316_v0 }
 0x4a6   : > { %14355 = vmatprep.subr.mxu0 %v29142_v23 }
 0x4a7   : > { %v9605_v60 = vpop.f32.mrb[116].mxu1 }
 0x4a8   : > { %v9606_v11 = vadd.f32 %v9605_v60, %v9532_v24  ;;  %v26351_v15 = vpop.f32.mrb[117].mxu1  ;;  %v29178_v24 = vand.u32 4294901760, %v28521_v17 }
 0x4aa   : > { %v15372_v18 = vsub.f32 %v28521_v17, %v29178_v24 }
 0x4ab   : > { %v9677_v33 = vpop.f32.mrb[118].mxu1 }
 0x4ac   : > { %13880 = vmatmul.mubr.f32.vlgmr.msra.gmra.mrb[2].mxu0 %v28836_v38  ;;  %v9678_v14 = vadd.f32 %v9677_v33, %v9606_v11  ;;  %v26356_v57 = vpop.f32.mrb[119].mxu1 }
 0x4ad   : > { %14357 = vmatpush1.msra.mxu0 %v29150_v47  ;;  %14420 = vmatprep.mubr.f32.mxu0 %v27316_v0 }
 0x4ae   : > { %14437 = vmatprep.subr.mxu0 %v14436_v61 }
 0x4af   : > { %v10235_v7 = vpop.f32.mrb[120].mxu1 }
 0x4b0   : > { %v10236_v49 = vadd.f32 %v10235_v7, %v9678_v14  ;;  %v26361_v28 = vpop.f32.mrb[121].mxu1 }
 0x4b3   : > { %v10311_v2 = vpop.f32.mrb[122].mxu1 }
 0x4b4   : > { %14426 = vmatmul.mubr.f32.vlgmr.msra.gmra.mrb[2].mxu0 %v28958_v27  ;;  %v10312_v42 = vadd.f32 %v10311_v2, %v10236_v49  ;;  %v26366_v51 = vpop.f32.mrb[123].mxu1 }
 0x4b5   : > { %14443 = vmatpush1.msra.mxu0 %v14442_v48  ;;  %14506 = vmatprep.mubr.f32.mxu0 %v27316_v0 }
 0x4b6   : > { %14516 = vmatprep.subr.mxu0 %v14433_v30 }
 0x4b7   : > { %v10385_v38 = vpop.f32.mrb[124].mxu1 }
 0x4b8   : > { %v10386_v44 = vadd.f32 %v10385_v38, %v10312_v42  ;;  %v26371_v26 = vpop.f32.mrb[125].mxu1 }
 0x4bb   : > { %v10459_v19 = vpop.f32.mrb[126].mxu1 }
 0x4bc   : > { %14508 = vmatmul.mubr.f32.vlgmr.msra.gmra.mrb[2].mxu0 %v28905_v46  ;;  %v10460_v52 = vadd.f32 %v10459_v19, %v10386_v44  ;;  %v26376_v41 = vpop.f32.mrb[127].mxu1 }
 0x4bd   : > { %14519 = vmatpush1.msra.mxu0 %v14439_v40  ;;  %14582 = vmatprep.mubr.f32.mxu0 %v27316_v0 }
 0x4be   : > { %14592 = vmatprep.subr.mxu0 %v29142_v23 }
 0x4bf   : > { %v10533_v27 = vpop.f32.mrb[128].mxu1 }
 0x4c0   : > { %v10534_v62 = vadd.f32 %v10533_v27, %v10460_v52  ;;  %v26381_v50 = vpop.f32.mrb[129].mxu1 }
 0x4c3   : > { %v10605_v25 = vpop.f32.mrb[130].mxu1 }
 0x4c4   : > { %14585 = vmatmul.mubr.f32.vlgmr.msra.gmra.mrb[2].mxu0 %v28919_v53  ;;  %v10606_v12 = vadd.f32 %v10605_v25, %v10534_v62  ;;  %v26386_v13 = vpop.f32.mrb[131].mxu1 }
 0x4c5   : > { %14594 = vmatpush1.msra.mxu0 %v29150_v47  ;;  %14657 = vmatprep.mubr.f32.mxu0 %v27316_v0 }
 0x4c6   : > { %14670 = vmatprep.subr.mxu0 %v14434_v32 }
 0x4c7   : > { %v11165_v31 = vpop.f32.mrb[132].mxu1 }
 0x4c8   : > { %v26391_v21 = vpop.f32.mrb[133].mxu1 }
 0x4cb   : > { %v11241_v16 = vpop.f32.mrb[134].mxu1 }
 0x4cc   : > { %14661 = vmatmul.mubr.f32.vlgmr.msra.gmra.mrb[2].mxu0 %v28938_v5  ;;  %v11242_v30 = vadd.f32 %v11241_v16, %v11165_v31  ;;  %v26396_v36 = vpop.f32.mrb[135].mxu1  ;;  %v15367_v5 = vand.u32 4294901760, %v15366_v29  ;;  %v29198_v31 = vand.u32 4294901760, %v28538_v1 }
 0x4cd   : > { %14674 = vmatpush1.msra.mxu0 %v14440_v37  ;;  %14737 = vmatprep.mubr.f32.mxu0 %v27316_v0  ;;  %v15373_v37 = vand.u32 4294901760, %v15372_v18 }
 0x4ce   : > { %14746 = vmatprep.subr.mxu0 %v29142_v23  ;;  %v15368_v9 = vsub.f32 %v15366_v29, %v15367_v5 }
 0x4cf   : > { %v11315_v53 = vpop.f32.mrb[136].mxu1  ;;  %v15374_v43 = vsub.f32 %v15372_v18, %v15373_v37 }
 0x4d0   : > { %v11316_v3 = vadd.f32 %v11315_v53, %v11242_v30  ;;  %v26401_v32 = vpop.f32.mrb[137].mxu1  ;;  %v15369_v61 = vand.u32 4294901760, %v15368_v9  ;;  %v16299_v30 = vsub.f32 %v28538_v1, %v29198_v31 }
 0x4d1   : > { %v15375_v49 = vand.u32 4294901760, %v15374_v43 }
 0x4d3   : > { %v11389_v34 = vpop.f32.mrb[138].mxu1 }
 0x4d4   : > { %14739 = vmatmul.mubr.f32.vlgmr.msra.gmra.mrb[2].mxu0 %v28905_v46  ;;  %v11390_v40 = vadd.f32 %v11389_v34, %v11316_v3  ;;  %v26406_v60 = vpop.f32.mrb[139].mxu1 }
 0x4d5   : > { %14748 = vmatpush1.msra.mxu0 %v29150_v47  ;;  %14811 = vmatprep.mubr.f32.mxu0 %v27316_v0 }
 0x4d6   : > { %15288 = vmatprep.subr.mxu0 %v29170_v39 }
 0x4d7   : > { %v11463_v23 = vpop.f32.mrb[140].mxu1 }
 0x4d8   : > { %v11464_v11 = vadd.f32 %v11463_v23, %v11390_v40  ;;  %v26411_v15 = vpop.f32.mrb[141].mxu1 }
 0x4db   : > { %v11535_v33 = vpop.f32.mrb[142].mxu1 }
 0x4dc   : > { %14813 = vmatmul.mubr.f32.vlgmr.msra.gmra.mrb[2].mxu0 %v28905_v46  ;;  %v11536_v14 = vadd.f32 %v11535_v33, %v11464_v11  ;;  %v26416_v57 = vpop.f32.mrb[143].mxu1 }
 0x4dd   : > { %15290 = vmatpush1.msra.mxu0 %v29178_v24  ;;  %15353 = vmatprep.mubr.f32.mxu0 %v27316_v0 }
 0x4de   : > { %15370 = vmatprep.subr.mxu0 %v15369_v61  ;;  %v11541_v47 = vadd.f32 %v11536_v14, %v10606_v12 }
 0x4df   : > { %v12098_v7 = vpop.f32.mrb[144].mxu1 }
 0x4e0   : > { %v26421_v17 = vpop.f32.mrb[145].mxu1 }
 0x4e3   : > { %v12174_v28 = vpop.f32.mrb[146].mxu1 }
 0x4e4   : > { %15359 = vmatmul.mubr.f32.vlgmr.msra.gmra.mrb[2].mxu0 %v29018_v45  ;;  %v12175_v48 = vadd.f32 %v12174_v28, %v12098_v7  ;;  %v26426_v2 = vpop.f32.mrb[147].mxu1 }
 0x4e5   : > { %15376 = vmatpush1.msra.mxu0 %v15375_v49  ;;  %15439 = vmatprep.mubr.f32.mxu0 %v27316_v0 }
 0x4e6   : > { %15449 = vmatprep.subr.mxu0 %v15366_v29  ;;  %v29206_v29 = vand.u32 4294901760, %v28547_v63 }
 0x4e7   : > { %v12248_v46 = vpop.f32.mrb[148].mxu1 }
 0x4e8   : > { %v12249_v42 = vadd.f32 %v12248_v46, %v12175_v48  ;;  %v26431_v51 = vpop.f32.mrb[149].mxu1  ;;  %v16305_v1 = vsub.f32 %v28547_v63, %v29206_v29 }
 0x4eb   : > { %v12322_v38 = vpop.f32.mrb[150].mxu1 }
 0x4ec   : > { %15441 = vmatmul.mubr.f32.vlgmr.msra.gmra.mrb[2].mxu0 %v28978_v55  ;;  %v12323_v44 = vadd.f32 %v12322_v38, %v12249_v42  ;;  %v26436_v26 = vpop.f32.mrb[151].mxu1 }
 0x4ed   : > { %15452 = vmatpush1.msra.mxu0 %v15372_v18  ;;  %15515 = vmatprep.mubr.f32.mxu0 %v27316_v0  ;;  %v16306_v18 = vand.u32 4294901760, %v16305_v1 }
 0x4ee   : > { %15525 = vmatprep.subr.mxu0 %v29170_v39 }
 0x4ef   : > { %v12396_v45 = vpop.f32.mrb[152].mxu1 }
 0x4f0   : > { %v12397_v19 = vadd.f32 %v12396_v45, %v12323_v44  ;;  %v26441_v52 = vpop.f32.mrb[153].mxu1 }
 0x4f3   : > { %v12468_v41 = vpop.f32.mrb[154].mxu1 }
 0x4f4   : > { %15518 = vmatmul.mubr.f32.vlgmr.msra.gmra.mrb[2].mxu0 %v28988_v4  ;;  %v12469_v27 = vadd.f32 %v12468_v41, %v12397_v19  ;;  %v26446_v62 = vpop.f32.mrb[155].mxu1 }
 0x4f5   : > { %15527 = vmatpush1.msra.mxu0 %v29178_v24  ;;  %15590 = vmatprep.mubr.f32.mxu0 %v27316_v0 }
 0x4f6   : > { %15603 = vmatprep.subr.mxu0 %v15367_v5  ;;  %v12474_v50 = vadd.f32 %v12469_v27, %v11541_v47 }
 0x4f7   : > { %v13017_v25 = vpop.f32.mrb[156].mxu1 }
 0x4f8   : > { %v26451_v12 = vpop.f32.mrb[157].mxu1 }
 0x4fb   : > { %v13093_v13 = vpop.f32.mrb[158].mxu1 }
 0x4fc   : > { %15594 = vmatmul.mubr.f32.vlgmr.msra.gmra.mrb[2].mxu0 %v29000_v59  ;;  %v13094_v21 = vadd.f32 %v13093_v13, %v13017_v25  ;;  %v26456_v16 = vpop.f32.mrb[159].mxu1  ;;  %v16300_v59 = vand.u32 4294901760, %v16299_v30 }
 0x4fd   : > { %15607 = vmatpush1.msra.mxu0 %v15373_v37  ;;  %15670 = vmatprep.mubr.f32.mxu0 %v27316_v0  ;;  %v16307_v37 = vsub.f32 %v16305_v1, %v16306_v18 }
 0x4fe   : > { %15679 = vmatprep.subr.mxu0 %v29170_v39  ;;  %v16301_v5 = vsub.f32 %v16299_v30, %v16300_v59 }
 0x4ff   : > { %v13167_v4 = vpop.f32.mrb[160].mxu1  ;;  %v16308_v61 = vand.u32 4294901760, %v16307_v37 }
 0x500   : > { %v13168_v36 = vadd.f32 %v13167_v4, %v13094_v21  ;;  %v26461_v53 = vpop.f32.mrb[161].mxu1  ;;  %v16302_v9 = vand.u32 4294901760, %v16301_v5 }
 0x503   : > { %v13241_v3 = vpop.f32.mrb[162].mxu1 }
 0x504   : > { %15672 = vmatmul.mubr.f32.vlgmr.msra.gmra.mrb[2].mxu0 %v28978_v55  ;;  %v13242_v32 = vadd.f32 %v13241_v3, %v13168_v36  ;;  %v26466_v34 = vpop.f32.mrb[163].mxu1 }
 0x505   : > { %15681 = vmatpush1.msra.mxu0 %v29178_v24  ;;  %15744 = vmatprep.mubr.f32.mxu0 %v27316_v0 }
 0x506   : > { %16221 = vmatprep.subr.mxu0 %v29198_v31 }
 0x507   : > { %v13315_v39 = vpop.f32.mrb[164].mxu1 }
 0x508   : > { %v13316_v40 = vadd.f32 %v13315_v39, %v13242_v32  ;;  %v26471_v60 = vpop.f32.mrb[165].mxu1 }
 0x50b   : > { %v13387_v23 = vpop.f32.mrb[166].mxu1 }
 0x50c   : > { %15746 = vmatmul.mubr.f32.vlgmr.msra.gmra.mrb[2].mxu0 %v28978_v55  ;;  %v13388_v11 = vadd.f32 %v13387_v23, %v13316_v40  ;;  %v26476_v15 = vpop.f32.mrb[167].mxu1 }
 0x50d   : > { %16223 = vmatpush1.msra.mxu0 %v29206_v29  ;;  %16286 = vmatprep.mubr.f32.mxu0 %v27316_v0 }
 0x50e   : > { %16303 = vmatprep.subr.mxu0 %v16302_v9  ;;  %v13393_v24 = vadd.f32 %v13388_v11, %v12474_v50 }
 0x50f   : > { %v13958_v33 = vpop.f32.mrb[168].mxu1 }
 0x510   : > { %v26481_v63 = vpop.f32.mrb[169].mxu1 }
 0x513   : > { %v14034_v14 = vpop.f32.mrb[170].mxu1 }
 0x514   : > { %16292 = vmatmul.mubr.f32.vlgmr.msra.gmra.mrb[2].mxu0 %v29098_v22  ;;  %v14035_v57 = vadd.f32 %v14034_v14, %v13958_v33  ;;  %v26486_v47 = vpop.f32.mrb[171].mxu1 }
 0x515   : > { %16309 = vmatpush1.msra.mxu0 %v16308_v61  ;;  %16372 = vmatprep.mubr.f32.mxu0 %v27316_v0 }
 0x516   : > { %16382 = vmatprep.subr.mxu0 %v16299_v30 }
 0x517   : > { %v14108_v55 = vpop.f32.mrb[172].mxu1 }
 0x518   : > { %v14109_v43 = vadd.f32 %v14108_v55, %v14035_v57  ;;  %v26491_v7 = vpop.f32.mrb[173].mxu1 }
 0x51b   : > { %v14182_v17 = vpop.f32.mrb[174].mxu1 }
 0x51c   : > { %16374 = vmatmul.mubr.f32.vlgmr.msra.gmra.mrb[2].mxu0 %v29047_v8  ;;  %v14183_v49 = vadd.f32 %v14182_v17, %v14109_v43  ;;  %v26496_v28 = vpop.f32.mrb[175].mxu1 }
 0x51d   : > { %16385 = vmatpush1.msra.mxu0 %v16305_v1  ;;  %16448 = vmatprep.mubr.f32.mxu0 %v27316_v0 }
 0x51e   : > { %16458 = vmatprep.subr.mxu0 %v29198_v31 }
 0x51f   : > { %v14256_v22 = vpop.f32.mrb[176].mxu1 }
 0x520   : > { %v14257_v48 = vadd.f32 %v14256_v22, %v14183_v49  ;;  %v26501_v2 = vpop.f32.mrb[177].mxu1 }
 0x523   : > { %v14328_v46 = vpop.f32.mrb[178].mxu1 }
 0x524   : > { %16451 = vmatmul.mubr.f32.vlgmr.msra.gmra.mrb[2].mxu0 %v29061_v54  ;;  %v14329_v42 = vadd.f32 %v14328_v46, %v14257_v48  ;;  %v26506_v51 = vpop.f32.mrb[179].mxu1  ;;  %v17138_v46 = vpop.permute.xlu1 %17137 }
 0x525   : > { %16460 = vmatpush1.msra.mxu0 %v29206_v29  ;;  %16523 = vmatprep.mubr.f32.mxu0 %v27316_v0 }
 0x526   : > { %16536 = vmatprep.subr.mxu0 %v16300_v59  ;;  %v14334_v38 = vadd.f32 %v14329_v42, %v13393_v24 }
 0x527   : > { %v14891_v44 = vpop.f32.mrb[180].mxu1 }
 0x528   : > { %v26511_v26 = vpop.f32.mrb[181].mxu1 }
 0x52b   : > { %v14967_v45 = vpop.f32.mrb[182].mxu1 }
 0x52c   : > { %16527 = vmatmul.mubr.f32.vlgmr.msra.gmra.mrb[2].mxu0 %v29080_v10  ;;  %v14968_v19 = vadd.f32 %v14967_v45, %v14891_v44  ;;  %v26516_v52 = vpop.f32.mrb[183].mxu1 }
 0x52d   : > { %16540 = vmatpush1.msra.mxu0 %v16306_v18  ;;  %16603 = vmatprep.mubr.f32.mxu0 %v27316_v0 }
 0x52e   : > { %16612 = vmatprep.subr.mxu0 %v29198_v31 }
 0x52f   : > { %v15041_v54 = vpop.f32.mrb[184].mxu1 }
 0x530   : > { %v15042_v41 = vadd.f32 %v15041_v54, %v14968_v19  ;;  %v26521_v27 = vpop.f32.mrb[185].mxu1 }
 0x533   : > { %v15115_v62 = vpop.f32.mrb[186].mxu1 }
 0x534   : > { %16605 = vmatmul.mubr.f32.vlgmr.msra.gmra.mrb[2].mxu0 %v29047_v8  ;;  %v15116_v50 = vadd.f32 %v15115_v62, %v15042_v41  ;;  %v26526_v25 = vpop.f32.mrb[187].mxu1 }
 0x535   : > { %16614 = vmatpush1.msra.mxu0 %v29206_v29  ;;  %16677 = vmatprep.mubr.f32.mxu0 %v27316_v0 }
 0x537   : > { %v15189_v10 = vpop.f32.mrb[188].mxu1 }
 0x538   : > { %v15190_v12 = vadd.f32 %v15189_v10, %v15116_v50  ;;  %v26531_v13 = vpop.f32.mrb[189].mxu1 }
 0x53b   : > { %v15261_v21 = vpop.f32.mrb[190].mxu1 }
 0x53c   : > { %16679 = vmatmul.mubr.f32.vlgmr.msra.gmra.mrb[2].mxu0 %v29047_v8  ;;  %v15262_v16 = vadd.f32 %v15261_v21, %v15190_v12  ;;  %v26536_v31 = vpop.f32.mrb[191].mxu1 }
 0x53d   : > { %17248 = vmatprep.mubr.f32.mxu0 %v27316_v0 }
 0x53e   : > { %v15267_v4 = vadd.f32 %v15262_v16, %v14334_v38 }
 0x53f   : > { %v15824_v30 = vpop.f32.mrb[192].mxu1 }
 0x540   : > { %v26541_v36 = vpop.f32.mrb[193].mxu1 }
 0x543   : > { %v15900_v53 = vpop.f32.mrb[194].mxu1 }
 0x544   : > { %v15901_v3 = vadd.f32 %v15900_v53, %v15824_v30  ;;  %v26546_v59 = vpop.f32.mrb[195].mxu1 }
 0x547   : > { %v15974_v32 = vpop.f32.mrb[196].mxu1 }
 0x548   : > { %v15975_v29 = vadd.f32 %v15974_v32, %v15901_v3  ;;  %v26551_v34 = vpop.f32.mrb[197].mxu1 }
 0x54b   : > { %v16048_v1 = vpop.f32.mrb[198].mxu1 }
 0x54c   : > { %v16049_v39 = vadd.f32 %v16048_v1, %v15975_v29  ;;  %v26556_v5 = vpop.f32.mrb[199].mxu1 }
 0x54f   : > { %v16122_v40 = vpop.f32.mrb[200].mxu1 }
 0x550   : > { %v16123_v60 = vadd.f32 %v16122_v40, %v16049_v39  ;;  %v26561_v18 = vpop.f32.mrb[201].mxu1 }
 0x553   : > { %v16194_v8 = vpop.f32.mrb[202].mxu1 }
 0x554   : > { %v16195_v23 = vadd.f32 %v16194_v8, %v16123_v60  ;;  %v26566_v9 = vpop.f32.mrb[203].mxu1 }
 0x556   : > { %v16200_v11 = vadd.f32 %v16195_v23, %v15267_v4 }
 0x557   : > { %v16757_v15 = vpop.f32.mrb[204].mxu1 }
 0x558   : > { %v26571_v24 = vpop.f32.mrb[205].mxu1 }
 0x55b   : > { %v16833_v37 = vpop.f32.mrb[206].mxu1 }
 0x55c   : > { %v16834_v33 = vadd.f32 %v16833_v37, %v16757_v15  ;;  %v26576_v63 = vpop.f32.mrb[207].mxu1 }
 0x55f   : > { %v16907_v61 = vpop.f32.mrb[208].mxu1 }
 0x560   : > { %v16908_v14 = vadd.f32 %v16907_v61, %v16834_v33  ;;  %v26581_v57 = vpop.f32.mrb[209].mxu1 }
 0x563   : > { %v16981_v47 = vpop.f32.mrb[210].mxu1 }
 0x564   : > { %v16982_v55 = vadd.f32 %v16981_v47, %v16908_v14  ;;  %v26586_v43 = vpop.f32.mrb[211].mxu1 }
 0x567   : > { %v17055_v7 = vpop.f32.mrb[212].mxu1 }
 0x568   : > { %v17056_v17 = vadd.f32 %v17055_v7, %v16982_v55  ;;  %v26591_v49 = vpop.f32.mrb[213].mxu1 }
 0x569   : > { %v17158_v49 = vld [vmem:[%s30189_s5] sm:$0xff] }
 0x56b   : > { %v17127_v28 = vpop.f32.mrb[214].mxu1 }
 0x56c   : > { %v17128_v22 = vadd.f32 %v17127_v28, %v17056_v17  ;;  %v26596_v48 = vpop.f32.mrb[215].mxu1 }
 0x56e   : > { %v17133_v2 = vadd.f32 %v17128_v22, %v16200_v11 }
 0x60f   : > { %v16680_v42 = vpop.f32.mrb[2].mxu0 }
 0x610   : > { %v17140_v51 = vadd.f32 %v17138_v46, %v16680_v42  ;;  %v16682_v38 = vpop.f32.mrb[3].mxu0 }
 0x611   : > { %v17141_v44 = vadd.f32 %v17138_v46, %v16682_v38 }
 0x612   : > { %v17143_v26 = vmax.f32 %v17140_v51, 0.0  ;;  %v18108_v51 = vsel %vm331_vm1, %v17158_v49, 0 }
 0x613   : > { %v17144_v45 = vmax.f32 %v17141_v44, 0.0 }
 0x614   : > { %v29234_v19 = vmul.f32 %v17143_v26, %v28344_v20  ;;  %v17142_v20 = vadd.f32 %v17138_v46, %v17133_v2 }
 0x615   : > { %v29237_v52 = vmul.f32 %v17144_v45, %v28347_v6 }
 0x616   : > { %17167 = vrot.lane.b32.xlu0 %v29234_v19, %s27317_s22  ;;  %v17145_v6 = vmax.f32 %v17142_v20, 0.0 }
 0x617   : > { %17169 = vrot.lane.b32.xlu1 %v29237_v52, %s27317_s22 }
 0x618   : > { %v29264_v54 = vmul.f32 %v17145_v6, %v28375_v56  ;;  %v25722_v56 = vld [vmem:[%s30189_s5 + $0x8] sm:$0xff]  ;;  %v29396_v6 = vand.u32 4294901760, %v18108_v51 }
 0x619   : > { %v17180_v41 = vsel %vm331_vm1, %v25722_v56, 0 }
 0x61a   : > { %17165 = vrot.lane.b32.xlu0 %v27316_v0, %s27317_s22  ;;  %v29310_v27 = vand.u32 4294901760, %v17180_v41 }
 0x61b   : > { %18095 = vrot.lane.b32.xlu1 %v29234_v19, %s27318_s23 }
 0x61c   : > { %v29313_v62 = vsub.f32 %v17180_v41, %v29310_v27 }
 0x61e   : > { %18097 = vrot.lane.b32.xlu0 %v29237_v52, %s27318_s23  ;;  %v29316_v50 = vand.u32 4294901760, %v29313_v62 }
 0x61f   : > { %18093 = vrot.lane.b32.xlu1 %v27316_v0, %s27318_s23 }
 0x620   : > { %v17252_v12 = vsub.f32 %v29313_v62, %v29316_v50 }
 0x622   : > { %19025 = vrot.lane.b32.xlu0 %v29234_v19, %s27319_s24  ;;  %v17253_v36 = vand.u32 4294901760, %v17252_v12 }
 0x623   : > { %19027 = vrot.lane.b32.xlu1 %v29237_v52, %s27319_s24 }
 0x626   : > { %19023 = vrot.lane.b32.xlu0 %v27316_v0, %s27319_s24 }
 0x627   : > { %19958 = vrot.lane.b32.xlu1 %v29234_v19, %s27320_s25 }
 0x62a   : > { %19960 = vrot.lane.b32.xlu0 %v29237_v52, %s27320_s25 }
 0x62b   : > { %19956 = vrot.lane.b32.xlu1 %v27316_v0, %s27320_s25 }
 0x62e   : > { %17171 = vrot.lane.b32.xlu0 %v29264_v54, %s27317_s22  ;;  %s25642_s22 = sshll.u32 %s30123_s17, 4  ;;  %s30141_s22 = int_to_ptr.vmem [resolvable:$true] %s25642_s22 }
 0x62f   : > { %18099 = vrot.lane.b32.xlu1 %v29264_v54, %s27318_s23 }
 0x632   : > { %21818 = vrot.lane.b32.xlu0 %v29237_v52, %s27321_s26 }
 0x633   : > { %21820 = vrot.lane.b32.xlu1 %v29264_v54, %s27321_s26 }
 0x636   : > { %21816 = vrot.lane.b32.xlu0 %v29234_v19, %s27321_s26 }
 0x637   : > { %19029 = vrot.lane.b32.xlu1 %v29264_v54, %s27319_s24 }
 0x63a   : > { %19962 = vrot.lane.b32.xlu0 %v29264_v54, %s27320_s25  ;;  %s30139_s25 = scalar_lea.hbm %s30192_s8, %s27187_s18 }
 0x63b   : > { %22751 = vrot.lane.b32.xlu1 %v29237_v52, %s27322_s10 }
 0x63e   : > { %22753 = vrot.lane.b32.xlu0 %v29264_v54, %s27322_s10 }
 0x63f   : > { %22749 = vrot.lane.b32.xlu1 %v29234_v19, %s27322_s10 }
 0x642   : > { %21822 = vrot.lane.b32.xlu0 %v27316_v0, %s27321_s26  ;;  %s27252_s26 = scalar_lea.vmem %s30141_s22, 192 }
 0x643   : > { %23684 = vrot.lane.b32.xlu1 %v29237_v52, %s27323_s12  ;;  %p27253_p11 = scmp.ne.s32.totalorder %s30141_s22, %s27252_s26 }
 0x645   : > { %p27254_p12 = pnand %p27253_p11, %p27411_p5 }
 0x646   : > { %23686 = vrot.lane.b32.xlu0 %v29264_v54, %s27323_s12 }
 0x647   : > { %23682 = vrot.lane.b32.xlu1 %v29234_v19, %s27323_s12  ;;  %p27255_p13 = pneg %p27254_p12 }
 0x64a   : > { %22755 = vrot.lane.b32.xlu0 %v27316_v0, %s27322_s10  ;;  %s27256_s10 = sshll.u32 %s27327_s9, 4  ;;  %s27257_s10 = int_to_ptr.vmem [resolvable:$false] %s27256_s10 }
 0x64b   : > { %23688 = vrot.lane.b32.xlu1 %v27316_v0, %s27323_s12  ;;  %s27258_s12 = scalar_lea.vmem %s27257_s10, 384  ;;  %p27259_p0 = scmp.lt.s32.totalorder %s30141_s22, %s27257_s10 }
 0x64c   : > { %p27260_p1 = scmp.lt.s32.totalorder %s27258_s12, %s27252_s26 }
 0x64e   : > { %24617 = vrot.lane.b32.xlu0 %v29237_v52, %s27324_s13  ;;  %p27261_p2 = por %p27260_p1, %p27259_p0 }
 0x64f   : > { %24619 = vrot.lane.b32.xlu1 %v29264_v54, %s27324_s13 }
 0x650   : > { %p27262_p3 = pnand %p27261_p2, %p27255_p13 }
 0x652   : > { %24615 = vrot.lane.b32.xlu0 %v29234_v19, %s27324_s13 }
 0x653   : > { %24621 = vrot.lane.b32.xlu1 %v27316_v0, %s27324_s13 }
 0x688   : > { %v17168_v25 = vpop.permute.xlu0 %17167 }
 0x689   : > { %v17170_v10 = vpop.permute.xlu1 %17169 }
 0x68a   : > { %v17174_v13 = vsel %vm324_vm2, %v17168_v25, %v17170_v10 }
 0x68b   : > { %v29321_v21 = vand.u32 4294901760, %v17174_v13 }
 0x68c   : > { %v17166_v16 = vpop.permute.xlu0 %17165 }
 0x68d   : > { %v17261_v31 = vsub.f32 %v17174_v13, %v29321_v21  ;;  %v17173_v4 = vsel %vm324_vm2, %v17166_v16, %v17168_v25  ;;  %17183 = vmatprep.subr.mxu0 %v29321_v21  ;;  %v29326_v30 = vpop.permute.xlu1 %18095 }
 0x68e   : > { %v29328_v53 = vand.u32 4294901760, %v17173_v4 }
 0x68f   : > { %v17262_v3 = vand.u32 4294901760, %v17261_v31 }
 0x690   : > { %v17267_v59 = vsub.f32 %v17173_v4, %v29328_v53  ;;  %v18098_v32 = vpop.permute.xlu0 %18097  ;;  %17185 = vmatpush1.msra.mxu0 %v29328_v53 }
 0x691   : > { %17254 = vmatmul.mubr.f32.vlgmr.msra.gmra.mrb[4].mxu0 %v17253_v36  ;;  %v18094_v29 = vpop.permute.xlu1 %18093  ;;  %v17263_v34 = vsub.f32 %v17261_v31, %v17262_v3  ;;  %v18102_v43 = vsel %vm1254_vm5, %v29326_v30, %v18098_v32 }
 0x692   : > { %v17268_v1 = vand.u32 4294901760, %v17267_v59  ;;  %17334 = vmatprep.mubr.f32.mxu0 %v27316_v0  ;;  %v29375_v48 = vand.u32 4294901760, %v18102_v43  ;;  %v18101_v26 = vsel %vm1254_vm5, %v18094_v29, %v29326_v30 }
 0x693   : > { %v17264_v39 = vand.u32 4294901760, %v17263_v34  ;;  %v29401_v56 = vand.u32 4294901760, %v18101_v26 }
 0x694   : > { %v17269_v5 = vsub.f32 %v17267_v59, %v17268_v1  ;;  %v29333_v40 = vpop.permute.xlu0 %19025  ;;  %v29389_v44 = vsub.f32 %v18102_v43, %v29375_v48 }
 0x695   : > { %17265 = vmatprep.subr.mxu0 %v17264_v39  ;;  %v29335_v60 = vpop.permute.xlu1 %19027 }
 0x696   : > { %v17270_v18 = vand.u32 4294901760, %v17269_v5  ;;  %v18190_v13 = vand.u32 4294901760, %v29389_v44 }
 0x698   : > { %v19024_v8 = vpop.permute.xlu0 %19023  ;;  %17271 = vmatpush1.msra.mxu0 %v17270_v18 }
 0x699   : > { %v29339_v23 = vsel %vm2185_vm3, %v19024_v8, %v29333_v40  ;;  %17336 = vmatmul.mubr.f32.vlgmr.msra.gmra.mrb[4].mxu0 %v29310_v27  ;;  %17344 = vmatprep.subr.mxu0 %v17261_v31  ;;  %v19959_v9 = vpop.permute.xlu1 %19958 }
 0x69a   : > { %17347 = vmatpush1.msra.mxu0 %v17267_v59  ;;  %17410 = vmatprep.mubr.f32.mxu0 %v27316_v0 }
 0x69b   : > { %17420 = vmatprep.subr.mxu0 %v29321_v21 }
 0x69c   : > { %v29344_v11 = vpop.permute.xlu0 %19960 }
 0x69d   : > { %v29348_v15 = vsel %vm3119_vm4, %v19959_v9, %v29344_v11  ;;  %v19957_v24 = vpop.permute.xlu1 %19956 }
 0x69e   : > { %v29351_v37 = vsel %vm3119_vm4, %v19957_v24, %v19959_v9  ;;  %v25723_v9 = vld [vmem:[%s30189_s5 + $0x10] sm:$0xff] }
 0x6a0   : > { %v17172_v33 = vpop.permute.xlu0 %17171 }
 0x6a1   : > { %v17175_v63 = vsel %vm324_vm2, %v17170_v10, %v17172_v33  ;;  %17413 = vmatmul.mubr.f32.vlgmr.msra.gmra.mrb[4].mxu0 %v29313_v62  ;;  %v18100_v61 = vpop.permute.xlu1 %18099 }
 0x6a2   : > { %v29355_v14 = vand.u32 4294901760, %v17175_v63  ;;  %17422 = vmatpush1.msra.mxu0 %v29328_v53  ;;  %17485 = vmatprep.mubr.f32.mxu0 %v27316_v0  ;;  %v18103_v45 = vsel %vm1254_vm5, %v18098_v32, %v18100_v61 }
 0x6a3   : > { %17498 = vmatprep.subr.mxu0 %v17262_v3  ;;  %v29403_v41 = vand.u32 4294901760, %v18103_v45 }
 0x6a4   : > { %v17725_v57 = vsub.f32 %v17175_v63, %v29355_v14  ;;  %v21819_v47 = vpop.permute.xlu0 %21818  ;;  %26598 = vmatpush3.msra.mxu1 %v29355_v14 }
 0x6a5   : > { %v29361_v55 = vpop.permute.xlu1 %21820  ;;  %26600 = vmatmul.mubr.f32.vlgmr.msra.gmra.mrb[216].mxu1 %v17253_v36  ;;  %26602 = vmatprep.subr.mxu1 %v27316_v0  ;;  %v29429_v31 = vsub.f32 %v18103_v45, %v29403_v41  ;;  %v18191_v36 = vsub.f32 %v29389_v44, %v18190_v13 }
 0x6a6   : > { %v17726_v7 = vand.u32 4294901760, %v17725_v57  ;;  %v29368_v17 = vsel %vm4980_vm6, %v21819_v47, %v29361_v55  ;;  %26604 = vmatprep.mubr.msk.f32.mxu1 %vm27325_vm0, %v27316_v0 }
 0x6a7   : > { %v18654_v59 = vand.u32 4294901760, %v29429_v31  ;;  %v18192_v34 = vand.u32 4294901760, %v18191_v36 }
 0x6a8   : > { %v17727_v28 = vsub.f32 %v17725_v57, %v17726_v7  ;;  %v21817_v22 = vpop.permute.xlu0 %21816 }
 0x6a9   : > { %v29378_v2 = vsel %vm4980_vm6, %v21817_v22, %v21819_v47  ;;  %17489 = vmatmul.mubr.f32.vlgmr.msra.gmra.mrb[4].mxu0 %v29316_v50  ;;  %v29381_v46 = vpop.permute.xlu1 %19029  ;;  %v18655_v18 = vsub.f32 %v29429_v31, %v18654_v59 }
 0x6aa   : > { %17502 = vmatpush1.msra.mxu0 %v17268_v1  ;;  %v17728_v42 = vand.u32 4294901760, %v17727_v28  ;;  %17565 = vmatprep.mubr.f32.mxu0 %v27316_v0  ;;  %v19033_v63 = vsel %vm2185_vm3, %v29335_v60, %v29381_v46  ;;  %v19032_v46 = vsel %vm2185_vm3, %v29333_v40, %v29335_v60 }
 0x6ab   : > { %17574 = vmatprep.subr.mxu0 %v29321_v21  ;;  %v29415_v21 = vsub.f32 %v18108_v51, %v29396_v6  ;;  %v18656_v33 = vand.u32 4294901760, %v18655_v18 }
 0x6ac   : > { %v29386_v38 = vpop.permute.xlu0 %19962  ;;  %26603 = vmatpush3.msra.mxu1 %v17728_v42  ;;  %v25724_v42 = vld [vmem:[%s30189_s5 + $0x18] sm:$0xff] }
 0x6ad   : > { %26605 = vmatmul.mubr.f32.vlgmr.msra.gmra.mrb[218].mxu1 %v29310_v27  ;;  %26607 = vmatprep.subr.mxu1 %v27316_v0  ;;  %v22752_v20 = vpop.permute.xlu1 %22751  ;;  %v19971_v40 = vsel %vm331_vm1, %v25724_v42, 0 }
 0x6ae   : > { %26608 = vmatpush3.msra.mxu1 %v17725_v57  ;;  %26609 = vmatprep.mubr.msk.f32.mxu1 %vm27325_vm0, %v27316_v0  ;;  %v29560_v45 = vand.u32 4294901760, %v19971_v40 }
 0x6af   : > { %26612 = vmatprep.subr.mxu1 %v27316_v0 }
 0x6b0   : > { %v29405_v25 = vpop.permute.xlu0 %22753 }
 0x6b1   : > { %v29409_v10 = vsel %vm5914_vm7, %v22752_v20, %v29405_v25  ;;  %17567 = vmatmul.mubr.f32.vlgmr.msra.gmra.mrb[4].mxu0 %v29310_v27  ;;  %26610 = vmatmul.mubr.f32.vlgmr.msra.gmra.mrb[220].mxu1 %v29313_v62  ;;  %v22750_v12 = vpop.permute.xlu1 %22749  ;;  %v29426_v62 = vsub.f32 %v18101_v26, %v29401_v56  ;;  %v19966_v26 = vsel %vm3119_vm4, %v29344_v11, %v29386_v38 }
 0x6b2   : > { %17576 = vmatpush1.msra.mxu0 %v29328_v53  ;;  %26613 = vmatpush3.msra.mxu1 %v29355_v14  ;;  %v29420_v16 = vsel %vm5914_vm7, %v22750_v12, %v22752_v20  ;;  %v29440_v53 = vand.u32 4294901760, %v29415_v21  ;;  %v29568_v20 = vand.u32 4294901760, %v19966_v26  ;;  %v29574_v38 = vsub.f32 %v19971_v40, %v29560_v45 }
 0x6b3   : > { %18111 = vmatprep.subr.mxu0 %v29375_v48  ;;  %26614 = vmatprep.mubr.msk.f32.mxu1 %vm27325_vm0, %v27316_v0  ;;  %v18196_v3 = vand.u32 4294901760, %v29426_v62 }
 0x6b4   : > { %v29431_v4 = vpop.permute.xlu0 %21822  ;;  %26617 = vmatprep.subr.mxu1 %v27316_v0  ;;  %17639 = vmatprep.mubr.f32.mxu0 %v27316_v0  ;;  %v18180_v1 = vsub.f32 %v29415_v21, %v29440_v53  ;;  %v20516_v12 = vsub.f32 %v19966_v26, %v29568_v20 }
 0x6b5   : > { %26615 = vmatmul.mubr.f32.vlgmr.msra.gmra.mrb[222].mxu1 %v29316_v50  ;;  %v23685_v30 = vpop.permute.xlu1 %23684  ;;  %v18197_v5 = vsub.f32 %v29426_v62, %v18196_v3 }
 0x6b6   : > { %26618 = vmatpush3.msra.mxu1 %v17726_v7  ;;  %26619 = vmatprep.mubr.msk.f32.mxu1 %vm27325_vm0, %v27316_v0  ;;  %v18181_v8 = vand.u32 4294901760, %v18180_v1  ;;  %v29637_v1 = vand.u32 4294901760, %v29264_v54 }
 0x6b7   : > { %26622 = vmatprep.subr.mxu1 %v27316_v0  ;;  %v18198_v24 = vand.u32 4294901760, %v18197_v5 }
 0x6b8   : > { %v29447_v32 = vpop.permute.xlu0 %23686  ;;  %v21435_v18 = vsub.f32 %v29264_v54, %v29637_v1 }
 0x6b9   : > { %v29451_v50 = vsel %vm6848_vm8, %v23685_v30, %v29447_v32  ;;  %17641 = vmatmul.mubr.f32.vlgmr.msra.gmra.mrb[4].mxu0 %v29310_v27  ;;  %26620 = vmatmul.mubr.f32.vlgmr.msra.gmra.mrb[224].mxu1 %v29310_v27  ;;  %v23683_v29 = vpop.permute.xlu1 %23682 }
 0x6ba   : > { %26623 = vmatpush3.msra.mxu1 %v29355_v14  ;;  %18113 = vmatpush1.msra.mxu0 %v29401_v56  ;;  %v29460_v39 = vsel %vm6848_vm8, %v23683_v29, %v23685_v30  ;;  %v29494_v14 = vand.u32 4294901760, %v19033_v63 }
 0x6bb   : > { %18193 = vmatprep.subr.mxu0 %v18192_v34  ;;  %26624 = vmatprep.mubr.msk.f32.mxu1 %vm27325_vm0, %v27316_v0 }
 0x6bc   : > { %26627 = vmatprep.subr.mxu1 %v27316_v0  ;;  %18176 = vmatprep.mubr.f32.mxu0 %v27316_v0  ;;  %v19583_v47 = vsub.f32 %v19033_v63, %v29494_v14 }
 0x6bd   : > { %26625 = vmatmul.mubr.f32.vlgmr.msra.gmra.mrb[226].mxu1 %v29310_v27  ;;  %v19038_v27 = vsel %vm331_vm1, %v25723_v9, 0  ;;  %v21436_v9 = vand.u32 4294901760, %v21435_v18 }
 0x6be   : > { %26628 = vmatpush3.msra.mxu1 %v29403_v41  ;;  %26629 = vmatprep.mubr.msk.f32.mxu1 %vm27325_vm0, %v27316_v0  ;;  %v29488_v61 = vand.u32 4294901760, %v19038_v27  ;;  %v19584_v7 = vand.u32 4294901760, %v19583_v47 }
 0x6bf   : > { %26632 = vmatprep.subr.mxu1 %v27316_v0  ;;  %v21437_v54 = vsub.f32 %v21435_v18, %v21436_v9 }
 0x6c0   : > { %v29499_v57 = vsub.f32 %v19038_v27, %v29488_v61  ;;  %v19585_v28 = vsub.f32 %v19583_v47, %v19584_v7  ;;  %v25726_v27 = vld [vmem:[%s30189_s5 + $0x28] sm:$0xff] }
 0x6c1   : > { %18182 = vmatmul.mubr.f32.vlgmr.msra.gmra.mrb[4].mxu0 %v18181_v8  ;;  %26630 = vmatmul.mubr.f32.vlgmr.msra.gmra.mrb[228].mxu1 %v18181_v8  ;;  %v21438_v63 = vand.u32 4294901760, %v21437_v54  ;;  %v29853_v54 = vand.u32 4294901760, %v29234_v19 }
 0x6c2   : > { %18199 = vmatpush1.msra.mxu0 %v18198_v24  ;;  %26633 = vmatpush3.msra.mxu1 %v18656_v33  ;;  %v29511_v43 = vand.u32 4294901760, %v29499_v57  ;;  %v19586_v51 = vand.u32 4294901760, %v19585_v28 }
 0x6c3   : > { %18272 = vmatprep.subr.mxu0 %v29389_v44  ;;  %26634 = vmatprep.mubr.msk.f32.mxu1 %vm27325_vm0, %v27316_v0  ;;  %v29541_v44 = vand.u32 4294901760, %v19032_v46 }
 0x6c4   : > { %26637 = vmatprep.subr.mxu1 %v27316_v0  ;;  %18262 = vmatprep.mubr.f32.mxu0 %v27316_v0  ;;  %v19110_v49 = vsub.f32 %v29499_v57, %v29511_v43 }
 0x6c5   : > { %26635 = vmatmul.mubr.f32.vlgmr.msra.gmra.mrb[230].mxu1 %v29396_v6  ;;  %v29554_v60 = vsub.f32 %v19032_v46, %v29541_v44 }
 0x6c6   : > { %26638 = vmatpush3.msra.mxu1 %v29429_v31  ;;  %26639 = vmatprep.mubr.msk.f32.mxu1 %vm27325_vm0, %v27316_v0  ;;  %v29529_v22 = vand.u32 4294901760, %v19110_v49  ;;  %v29709_v49 = vand.u32 4294901760, %v29351_v37 }
 0x6c7   : > { %26642 = vmatprep.subr.mxu1 %v27316_v0  ;;  %v19120_v11 = vand.u32 4294901760, %v29554_v60 }
 0x6c9   : > { %18264 = vmatmul.mubr.f32.vlgmr.msra.gmra.mrb[4].mxu0 %v29396_v6  ;;  %26640 = vmatmul.mubr.f32.vlgmr.msra.gmra.mrb[232].mxu1 %v29415_v21 }
 0x6ca   : > { %18275 = vmatpush1.msra.mxu0 %v29426_v62  ;;  %26643 = vmatpush3.msra.mxu1 %v29403_v41 }
 0x6cb   : > { %18348 = vmatprep.subr.mxu0 %v29375_v48  ;;  %26644 = vmatprep.mubr.msk.f32.mxu1 %vm27325_vm0, %v27316_v0 }
 0x6cc   : > { %26647 = vmatprep.subr.mxu1 %v27316_v0  ;;  %18338 = vmatprep.mubr.f32.mxu0 %v27316_v0 }
 0x6cd   : > { %26645 = vmatmul.mubr.f32.vlgmr.msra.gmra.mrb[234].mxu1 %v29440_v53 }
 0x6ce   : > { %26648 = vmatpush3.msra.mxu1 %v18654_v59  ;;  %26649 = vmatprep.mubr.msk.f32.mxu1 %vm27325_vm0, %v27316_v0 }
 0x6cf   : > { %26652 = vmatprep.subr.mxu1 %v27316_v0 }
 0x6d1   : > { %18341 = vmatmul.mubr.f32.vlgmr.msra.gmra.mrb[4].mxu0 %v29415_v21  ;;  %26650 = vmatmul.mubr.f32.vlgmr.msra.gmra.mrb[236].mxu1 %v29396_v6  ;;  %v20517_v21 = vand.u32 4294901760, %v20516_v12 }
 0x6d2   : > { %18350 = vmatpush1.msra.mxu0 %v29401_v56  ;;  %26653 = vmatpush3.msra.mxu1 %v29403_v41 }
 0x6d3   : > { %18426 = vmatprep.subr.mxu0 %v18190_v13  ;;  %26654 = vmatprep.mubr.msk.f32.mxu1 %vm27325_vm0, %v27316_v0  ;;  %v29593_v13 = vand.u32 4294901760, %v29574_v38  ;;  %v20518_v36 = vsub.f32 %v20516_v12, %v20517_v21 }
 0x6d4   : > { %26657 = vmatprep.subr.mxu1 %v27316_v0  ;;  %18413 = vmatprep.mubr.f32.mxu0 %v27316_v0 }
 0x6d5   : > { %26655 = vmatmul.mubr.f32.vlgmr.msra.gmra.mrb[238].mxu1 %v29396_v6  ;;  %v20043_v31 = vsub.f32 %v29574_v38, %v29593_v13  ;;  %v20519_v59 = vand.u32 4294901760, %v20518_v36 }
 0x6d6   : > { %26658 = vmatpush3.msra.mxu1 %v29494_v14  ;;  %26659 = vmatprep.mubr.msk.f32.mxu1 %vm27325_vm0, %v27316_v0 }
 0x6d7   : > { %26662 = vmatprep.subr.mxu1 %v27316_v0 }
 0x6d9   : > { %18417 = vmatmul.mubr.f32.vlgmr.msra.gmra.mrb[4].mxu0 %v29440_v53  ;;  %26660 = vmatmul.mubr.f32.vlgmr.msra.gmra.mrb[240].mxu1 %v29529_v22  ;;  %v25725_v53 = vld [vmem:[%s30189_s5 + $0x20] sm:$0xff] }
 0x6da   : > { %18430 = vmatpush1.msra.mxu0 %v18196_v3  ;;  %26663 = vmatpush3.msra.mxu1 %v19586_v51  ;;  %v20890_v29 = vsel %vm331_vm1, %v25725_v53, 0  ;;  %v25728_v53 = vld [vmem:[%s30189_s5 + $0x38] sm:$0xff] }
 0x6db   : > { %18502 = vmatprep.subr.mxu0 %v29375_v48  ;;  %26664 = vmatprep.mubr.msk.f32.mxu1 %vm27325_vm0, %v27316_v0  ;;  %v29566_v48 = vand.u32 4294901760, %v29339_v23  ;;  %v29631_v34 = vand.u32 4294901760, %v20890_v29 }
 0x6dc   : > { %26667 = vmatprep.subr.mxu1 %v27316_v0  ;;  %18493 = vmatprep.mubr.f32.mxu0 %v27316_v0 }
 0x6dd   : > { %26665 = vmatmul.mubr.f32.vlgmr.msra.gmra.mrb[242].mxu1 %v29488_v61  ;;  %v29583_v41 = vsub.f32 %v29339_v23, %v29566_v48  ;;  %v29642_v5 = vsub.f32 %v20890_v29, %v29631_v34  ;;  %v23689_v29 = vpop.permute.xlu1 %23688 }
 0x6de   : > { %26668 = vmatpush3.msra.mxu1 %v19583_v47  ;;  %26669 = vmatprep.mubr.msk.f32.mxu1 %vm27325_vm0, %v27316_v0 }
 0x6df   : > { %26672 = vmatprep.subr.mxu1 %v27316_v0  ;;  %v19126_v23 = vand.u32 4294901760, %v29583_v41  ;;  %v29655_v8 = vand.u32 4294901760, %v29642_v5 }
 0x6e1   : > { %18495 = vmatmul.mubr.f32.vlgmr.msra.gmra.mrb[4].mxu0 %v29396_v6  ;;  %26670 = vmatmul.mubr.f32.vlgmr.msra.gmra.mrb[244].mxu1 %v29499_v57  ;;  %v19127_v30 = vsub.f32 %v29583_v41, %v19126_v23  ;;  %v20962_v24 = vsub.f32 %v29642_v5, %v29655_v8 }
 0x6e2   : > { %18504 = vmatpush1.msra.mxu0 %v29401_v56  ;;  %26673 = vmatpush3.msra.mxu1 %v29494_v14  ;;  %v19121_v56 = vsub.f32 %v29554_v60, %v19120_v11 }
 0x6e3   : > { %19041 = vmatprep.subr.mxu0 %v29541_v44  ;;  %26674 = vmatprep.mubr.msk.f32.mxu1 %vm27325_vm0, %v27316_v0  ;;  %v19128_v3 = vand.u32 4294901760, %v19127_v30  ;;  %v29673_v33 = vand.u32 4294901760, %v20962_v24 }
 0x6e4   : > { %26677 = vmatprep.subr.mxu1 %v27316_v0  ;;  %18567 = vmatprep.mubr.f32.mxu0 %v27316_v0  ;;  %v19122_v62 = vand.u32 4294901760, %v19121_v56 }
 0x6e5   : > { %26675 = vmatmul.mubr.f32.vlgmr.msra.gmra.mrb[246].mxu1 %v29511_v43 }
 0x6e6   : > { %26678 = vmatpush3.msra.mxu1 %v19584_v7  ;;  %26679 = vmatprep.mubr.msk.f32.mxu1 %vm27325_vm0, %v27316_v0 }
 0x6e7   : > { %26682 = vmatprep.subr.mxu1 %v27316_v0 }
 0x6e9   : > { %18569 = vmatmul.mubr.f32.vlgmr.msra.gmra.mrb[4].mxu0 %v29396_v6  ;;  %26680 = vmatmul.mubr.f32.vlgmr.msra.gmra.mrb[248].mxu1 %v29488_v61  ;;  %v29613_v6 = vand.u32 4294901760, %v20043_v31 }
 0x6ea   : > { %19043 = vmatpush1.msra.mxu0 %v29566_v48  ;;  %26683 = vmatpush3.msra.mxu1 %v29494_v14  ;;  %v29683_v14 = vand.u32 4294901760, %v29348_v15 }
 0x6eb   : > { %19123 = vmatprep.subr.mxu0 %v19122_v62  ;;  %26684 = vmatprep.mubr.msk.f32.mxu1 %vm27325_vm0, %v27316_v0 }
 0x6ec   : > { %26687 = vmatprep.subr.mxu1 %v27316_v0  ;;  %19106 = vmatprep.mubr.f32.mxu0 %v27316_v0  ;;  %v29697_v47 = vsub.f32 %v29348_v15, %v29683_v14 }
 0x6ed   : > { %26685 = vmatmul.mubr.f32.vlgmr.msra.gmra.mrb[250].mxu1 %v29488_v61 }
 0x6ee   : > { %26688 = vmatpush3.msra.mxu1 %v29568_v20  ;;  %26689 = vmatprep.mubr.msk.f32.mxu1 %vm27325_vm0, %v27316_v0  ;;  %v20053_v15 = vand.u32 4294901760, %v29697_v47 }
 0x6ef   : > { %26692 = vmatprep.subr.mxu1 %v27316_v0 }
 0x6f0   : > { %v20054_v46 = vsub.f32 %v29697_v47, %v20053_v15 }
 0x6f1   : > { %19112 = vmatmul.mubr.f32.vlgmr.msra.gmra.mrb[4].mxu0 %v29529_v22  ;;  %26690 = vmatmul.mubr.f32.vlgmr.msra.gmra.mrb[252].mxu1 %v29613_v6 }
 0x6f2   : > { %19129 = vmatpush1.msra.mxu0 %v19128_v3  ;;  %26693 = vmatpush3.msra.mxu1 %v20519_v59  ;;  %v29828_v59 = vand.u32 4294901760, %v29237_v52 }
 0x6f3   : > { %19202 = vmatprep.subr.mxu0 %v29554_v60  ;;  %26694 = vmatprep.mubr.msk.f32.mxu1 %vm27325_vm0, %v27316_v0 }
 0x6f4   : > { %26697 = vmatprep.subr.mxu1 %v27316_v0  ;;  %19192 = vmatprep.mubr.f32.mxu0 %v27316_v0 }
 0x6f5   : > { %26695 = vmatmul.mubr.f32.vlgmr.msra.gmra.mrb[254].mxu1 %v29560_v45 }
 0x6f6   : > { %26698 = vmatpush3.msra.mxu1 %v20516_v12  ;;  %26699 = vmatprep.mubr.msk.f32.mxu1 %vm27325_vm0, %v27316_v0 }
 0x6f7   : > { %26702 = vmatprep.subr.mxu1 %v27316_v0 }
 0x6f9   : > { %19194 = vmatmul.mubr.f32.vlgmr.msra.gmra.mrb[4].mxu0 %v29488_v61  ;;  %26700 = vmatmul.mubr.f32.vlgmr.msra.gmra.mrb[0].mxu1 %v29574_v38 }
 0x6fa   : > { %19205 = vmatpush1.msra.mxu0 %v29583_v41  ;;  %26703 = vmatpush3.msra.mxu1 %v29568_v20  ;;  %v22756_v41 = vpop.permute.xlu0 %22755 }
 0x6fb   : > { %19278 = vmatprep.subr.mxu0 %v29541_v44  ;;  %26704 = vmatprep.mubr.msk.f32.mxu1 %vm27325_vm0, %v27316_v0  ;;  %v22759_v56 = vsel %vm5914_vm7, %v29405_v25, %v22756_v41 }
 0x6fc   : > { %26707 = vmatprep.subr.mxu1 %v27316_v0  ;;  %19268 = vmatprep.mubr.f32.mxu0 %v27316_v0 }
 0x6fd   : > { %26705 = vmatmul.mubr.f32.vlgmr.msra.gmra.mrb[2].mxu1 %v29593_v13 }
 0x6fe   : > { %26708 = vmatpush3.msra.mxu1 %v20517_v21  ;;  %26709 = vmatprep.mubr.msk.f32.mxu1 %vm27325_vm0, %v27316_v0  ;;  %v29781_v21 = vand.u32 4294901760, %v22759_v56 }
 0x6ff   : > { %26712 = vmatprep.subr.mxu1 %v27316_v0 }
 0x700   : > { %v23309_v25 = vsub.f32 %v22759_v56, %v29781_v21 }
 0x701   : > { %19271 = vmatmul.mubr.f32.vlgmr.msra.gmra.mrb[4].mxu0 %v29499_v57  ;;  %26710 = vmatmul.mubr.f32.vlgmr.msra.gmra.mrb[4].mxu1 %v29560_v45  ;;  %v21831_v57 = vsel %vm331_vm1, %v25726_v27, 0 }
 0x702   : > { %19280 = vmatpush1.msra.mxu0 %v29566_v48  ;;  %26713 = vmatpush3.msra.mxu1 %v29568_v20  ;;  %v29703_v7 = vand.u32 4294901760, %v21831_v57  ;;  %v23310_v30 = vand.u32 4294901760, %v23309_v25 }
 0x703   : > { %19356 = vmatprep.subr.mxu0 %v19120_v11  ;;  %26714 = vmatprep.mubr.msk.f32.mxu1 %vm27325_vm0, %v27316_v0 }
 0x704   : > { %26717 = vmatprep.subr.mxu1 %v27316_v0  ;;  %19343 = vmatprep.mubr.f32.mxu0 %v27316_v0 }
 0x705   : > { %26715 = vmatmul.mubr.f32.vlgmr.msra.gmra.mrb[6].mxu1 %v29560_v45 }
 0x706   : > { %26718 = vmatpush3.msra.mxu1 %v29637_v1  ;;  %26719 = vmatprep.mubr.msk.f32.mxu1 %vm27325_vm0, %v27316_v0 }
 0x707   : > { %26722 = vmatprep.subr.mxu1 %v27316_v0 }
 0x709   : > { %19347 = vmatmul.mubr.f32.vlgmr.msra.gmra.mrb[4].mxu0 %v29511_v43  ;;  %26720 = vmatmul.mubr.f32.vlgmr.msra.gmra.mrb[8].mxu1 %v29673_v33  ;;  %v21826_v43 = vsel %vm4980_vm6, %v29361_v55, %v29431_v4  ;;  %v29717_v55 = vsub.f32 %v21831_v57, %v29703_v7  ;;  %v29726_v4 = vsub.f32 %v29351_v37, %v29709_v49 }
 0x70a   : > { %19360 = vmatpush1.msra.mxu0 %v19126_v23  ;;  %26723 = vmatpush3.msra.mxu1 %v21438_v63  ;;  %v29711_v28 = vand.u32 4294901760, %v21826_v43  ;;  %v29873_v63 = vsub.f32 %v29234_v19, %v29853_v54 }
 0x70b   : > { %19432 = vmatprep.subr.mxu0 %v29541_v44  ;;  %26724 = vmatprep.mubr.msk.f32.mxu1 %vm27325_vm0, %v27316_v0  ;;  %v29736_v42 = vand.u32 4294901760, %v29717_v55  ;;  %v20059_v37 = vand.u32 4294901760, %v29726_v4  ;;  %v20055_v44 = vand.u32 4294901760, %v20054_v46 }
 0x70c   : > { %26727 = vmatprep.subr.mxu1 %v27316_v0  ;;  %19423 = vmatprep.mubr.f32.mxu0 %v27316_v0  ;;  %v22376_v22 = vsub.f32 %v21826_v43, %v29711_v28  ;;  %v20978_v19 = vand.u32 4294901760, %v29873_v63 }
 0x70d   : > { %26725 = vmatmul.mubr.f32.vlgmr.msra.gmra.mrb[10].mxu1 %v29631_v34  ;;  %v21903_v40 = vsub.f32 %v29717_v55, %v29736_v42  ;;  %v20060_v60 = vsub.f32 %v29726_v4, %v20059_v37 }
 0x70e   : > { %26728 = vmatpush3.msra.mxu1 %v21435_v18  ;;  %26729 = vmatprep.mubr.msk.f32.mxu1 %vm27325_vm0, %v27316_v0  ;;  %v22377_v51 = vand.u32 4294901760, %v22376_v22  ;;  %v29843_v18 = vsub.f32 %v29237_v52, %v29828_v59 }
 0x70f   : > { %26732 = vmatprep.subr.mxu1 %v27316_v0  ;;  %v20061_v20 = vand.u32 4294901760, %v20060_v60 }
 0x710   : > { %v22378_v26 = vsub.f32 %v22376_v22, %v22377_v51  ;;  %v20972_v52 = vand.u32 4294901760, %v29843_v18 }
 0x711   : > { %19425 = vmatmul.mubr.f32.vlgmr.msra.gmra.mrb[4].mxu0 %v29488_v61  ;;  %26730 = vmatmul.mubr.f32.vlgmr.msra.gmra.mrb[12].mxu1 %v29642_v5 }
 0x712   : > { %19434 = vmatpush1.msra.mxu0 %v29566_v48  ;;  %26733 = vmatpush3.msra.mxu1 %v29637_v1  ;;  %v25727_v48 = vld [vmem:[%s30189_s5 + $0x30] sm:$0xff]  ;;  %v22379_v11 = vand.u32 4294901760, %v22378_v26 }
 0x713   : > { %19974 = vmatprep.subr.mxu0 %v29683_v14  ;;  %26734 = vmatprep.mubr.msk.f32.mxu1 %vm27325_vm0, %v27316_v0  ;;  %v22764_v12 = vsel %vm331_vm1, %v25727_v48, 0  ;;  %v25546_v48 = vld [vmem:[%s30190_s6] sm:$0xff] }
 0x714   : > { %26737 = vmatprep.subr.mxu1 %v27316_v0  ;;  %19497 = vmatprep.mubr.f32.mxu0 %v27316_v0  ;;  %v29776_v23 = vand.u32 4294901760, %v22764_v12 }
 0x715   : > { %26735 = vmatmul.mubr.f32.vlgmr.msra.gmra.mrb[14].mxu1 %v29655_v8  ;;  %25549 = vperm.xlu0 %27239, %v25546_v48  }
 0x716   : > { %26738 = vmatpush3.msra.mxu1 %v21436_v9  ;;  %26739 = vmatprep.mubr.msk.f32.mxu1 %vm27325_vm0, %v27316_v0  ;;  %v29786_v62 = vsub.f32 %v22764_v12, %v29776_v23 }
 0x717   : > { %26742 = vmatprep.subr.mxu1 %v27316_v0 }
 0x718   : > { %v29798_v31 = vand.u32 4294901760, %v29786_v62 }
 0x719   : > { %19499 = vmatmul.mubr.f32.vlgmr.msra.gmra.mrb[4].mxu0 %v29488_v61  ;;  %26740 = vmatmul.mubr.f32.vlgmr.msra.gmra.mrb[16].mxu1 %v29631_v34  ;;  %v29756_v61 = vand.u32 4294901760, %v21903_v40 }
 0x71a   : > { %19976 = vmatpush1.msra.mxu0 %v29709_v49  ;;  %26743 = vmatpush3.msra.mxu1 %v29637_v1  ;;  %v22836_v36 = vsub.f32 %v29786_v62, %v29798_v31  ;;  %v23697_v1 = vsel %vm331_vm1, %v25728_v53, 0 }
 0x71b   : > { %20056 = vmatprep.subr.mxu0 %v20055_v44  ;;  %26744 = vmatprep.mubr.msk.f32.mxu1 %vm27325_vm0, %v27316_v0  ;;  %v29845_v9 = vand.u32 4294901760, %v23697_v1 }
 0x71c   : > { %26747 = vmatprep.subr.mxu1 %v27316_v0  ;;  %20039 = vmatprep.mubr.f32.mxu0 %v27316_v0 }
 0x71d   : > { %26745 = vmatmul.mubr.f32.vlgmr.msra.gmra.mrb[18].mxu1 %v29631_v34 }
 0x71e   : > { %26748 = vmatpush3.msra.mxu1 %v29711_v28  ;;  %26749 = vmatprep.mubr.msk.f32.mxu1 %vm27325_vm0, %v27316_v0 }
 0x71f   : > { %26752 = vmatprep.subr.mxu1 %v27316_v0 }
 0x721   : > { %20045 = vmatmul.mubr.f32.vlgmr.msra.gmra.mrb[4].mxu0 %v29613_v6  ;;  %26750 = vmatmul.mubr.f32.vlgmr.msra.gmra.mrb[20].mxu1 %v29756_v61  ;;  %v23311_v6 = vsub.f32 %v23309_v25, %v23310_v30 }
 0x722   : > { %20062 = vmatpush1.msra.mxu0 %v20061_v20  ;;  %26753 = vmatpush3.msra.mxu1 %v22379_v11 }
 0x723   : > { %20135 = vmatprep.subr.mxu0 %v29697_v47  ;;  %26754 = vmatprep.mubr.msk.f32.mxu1 %vm27325_vm0, %v27316_v0  ;;  %v23312_v3 = vand.u32 4294901760, %v23311_v6 }
 0x724   : > { %26757 = vmatprep.subr.mxu1 %v27316_v0  ;;  %20125 = vmatprep.mubr.f32.mxu0 %v27316_v0 }
 0x725   : > { %26755 = vmatmul.mubr.f32.vlgmr.msra.gmra.mrb[22].mxu1 %v29703_v7 }
 0x726   : > { %26758 = vmatpush3.msra.mxu1 %v22376_v22  ;;  %26759 = vmatprep.mubr.msk.f32.mxu1 %vm27325_vm0, %v27316_v0  ;;  %v25729_v22 = vld [vmem:[%s30189_s5 + $0x40] sm:$0xff] }
 0x727   : > { %26762 = vmatprep.subr.mxu1 %v27316_v0  ;;  %v24630_v44 = vsel %vm331_vm1, %v25729_v22, 0 }
 0x729   : > { %20127 = vmatmul.mubr.f32.vlgmr.msra.gmra.mrb[4].mxu0 %v29560_v45  ;;  %26760 = vmatmul.mubr.f32.vlgmr.msra.gmra.mrb[24].mxu1 %v29717_v55 }
 0x72a   : > { %20138 = vmatpush1.msra.mxu0 %v29726_v4  ;;  %26763 = vmatpush3.msra.mxu1 %v29711_v28 }
 0x72b   : > { %20211 = vmatprep.subr.mxu0 %v29683_v14  ;;  %26764 = vmatprep.mubr.msk.f32.mxu1 %vm27325_vm0, %v27316_v0 }
 0x72c   : > { %26767 = vmatprep.subr.mxu1 %v27316_v0  ;;  %20201 = vmatprep.mubr.f32.mxu0 %v27316_v0 }
 0x72d   : > { %26765 = vmatmul.mubr.f32.vlgmr.msra.gmra.mrb[26].mxu1 %v29736_v42 }
 0x72e   : > { %26768 = vmatpush3.msra.mxu1 %v22377_v51  ;;  %26769 = vmatprep.mubr.msk.f32.mxu1 %vm27325_vm0, %v27316_v0 }
 0x72f   : > { %26772 = vmatprep.subr.mxu1 %v27316_v0 }
 0x731   : > { %20204 = vmatmul.mubr.f32.vlgmr.msra.gmra.mrb[4].mxu0 %v29574_v38  ;;  %26770 = vmatmul.mubr.f32.vlgmr.msra.gmra.mrb[28].mxu1 %v29703_v7  ;;  %v29816_v38 = vand.u32 4294901760, %v22836_v36 }
 0x732   : > { %20213 = vmatpush1.msra.mxu0 %v29709_v49  ;;  %26773 = vmatpush3.msra.mxu1 %v29711_v28 }
 0x733   : > { %20289 = vmatprep.subr.mxu0 %v20053_v15  ;;  %26774 = vmatprep.mubr.msk.f32.mxu1 %vm27325_vm0, %v27316_v0  ;;  %v29896_v15 = vpop.permute.xlu1 %24619 }
 0x734   : > { %26777 = vmatprep.subr.mxu1 %v27316_v0  ;;  %20276 = vmatprep.mubr.f32.mxu0 %v27316_v0 }
 0x735   : > { %26775 = vmatmul.mubr.f32.vlgmr.msra.gmra.mrb[30].mxu1 %v29703_v7 }
 0x736   : > { %26778 = vmatpush3.msra.mxu1 %v29781_v21  ;;  %26779 = vmatprep.mubr.msk.f32.mxu1 %vm27325_vm0, %v27316_v0 }
 0x737   : > { %26782 = vmatprep.subr.mxu1 %v27316_v0  ;;  %v24622_v51 = vpop.permute.xlu1 %24621 }
 0x738   : > { %v24625_v40 = vsel %vm7782_vm9, %v29896_v15, %v24622_v51  ;;  %v30027_v51 = vand.u32 4294901760, %v29409_v10 }
 0x739   : > { %20280 = vmatmul.mubr.f32.vlgmr.msra.gmra.mrb[4].mxu0 %v29593_v13  ;;  %26780 = vmatmul.mubr.f32.vlgmr.msra.gmra.mrb[32].mxu1 %v29816_v38  ;;  %v23692_v13 = vsel %vm6848_vm8, %v29447_v32, %v23689_v29  ;;  %v29859_v32 = vsub.f32 %v23697_v1, %v29845_v9  ;;  %v29930_v60 = vand.u32 4294901760, %v24625_v40 }
 0x73a   : > { %20293 = vmatpush1.msra.mxu0 %v20059_v37  ;;  %26783 = vmatpush3.msra.mxu1 %v23312_v3  ;;  %v29850_v24 = vand.u32 4294901760, %v23692_v13 }
 0x73b   : > { %20365 = vmatprep.subr.mxu0 %v29683_v14  ;;  %26784 = vmatprep.mubr.msk.f32.mxu1 %vm27325_vm0, %v27316_v0  ;;  %v20973_v14 = vsub.f32 %v29843_v18, %v20972_v52  ;;  %v29880_v57 = vand.u32 4294901760, %v29859_v32  ;;  %v25175_v20 = vsub.f32 %v24625_v40, %v29930_v60 }
 0x73c   : > { %26787 = vmatprep.subr.mxu1 %v27316_v0  ;;  %20356 = vmatprep.mubr.f32.mxu0 %v27316_v0  ;;  %v29867_v27 = vsub.f32 %v23692_v13, %v29850_v24 }
 0x73d   : > { %26785 = vmatmul.mubr.f32.vlgmr.msra.gmra.mrb[34].mxu1 %v29776_v23  ;;  %v20974_v43 = vand.u32 4294901760, %v20973_v14  ;;  %v25176_v41 = vand.u32 4294901760, %v25175_v20 }
 0x73e   : > { %26788 = vmatpush3.msra.mxu1 %v23309_v25  ;;  %26789 = vmatprep.mubr.msk.f32.mxu1 %vm27325_vm0, %v27316_v0  ;;  %v24243_v47 = vand.u32 4294901760, %v29867_v27  ;;  %v29975_v25 = vand.u32 4294901760, %v29368_v17 }
 0x73f   : > { %26792 = vmatprep.subr.mxu1 %v27316_v0  ;;  %v25177_v56 = vsub.f32 %v25175_v20, %v25176_v41 }
 0x740   : > { %v24244_v28 = vsub.f32 %v29867_v27, %v24243_v47 }
 0x741   : > { %20358 = vmatmul.mubr.f32.vlgmr.msra.gmra.mrb[4].mxu0 %v29560_v45  ;;  %26790 = vmatmul.mubr.f32.vlgmr.msra.gmra.mrb[36].mxu1 %v29786_v62 }
 0x742   : > { %20367 = vmatpush1.msra.mxu0 %v29709_v49  ;;  %26793 = vmatpush3.msra.mxu1 %v29781_v21  ;;  %v23769_v49 = vsub.f32 %v29859_v32, %v29880_v57  ;;  %v24245_v37 = vand.u32 4294901760, %v24244_v28 }
 0x743   : > { %20893 = vmatprep.subr.mxu0 %v29828_v59  ;;  %26794 = vmatprep.mubr.msk.f32.mxu1 %vm27325_vm0, %v27316_v0 }
 0x744   : > { %26797 = vmatprep.subr.mxu1 %v27316_v0  ;;  %20430 = vmatprep.mubr.f32.mxu0 %v27316_v0  ;;  %v29904_v4 = vand.u32 4294901760, %v23769_v49 }
 0x745   : > { %26795 = vmatmul.mubr.f32.vlgmr.msra.gmra.mrb[38].mxu1 %v29798_v31 }
 0x746   : > { %26798 = vmatpush3.msra.mxu1 %v23310_v30  ;;  %26799 = vmatprep.mubr.msk.f32.mxu1 %vm27325_vm0, %v27316_v0  ;;  %v21912_v30 = vsub.f32 %v29368_v17, %v29975_v25 }
 0x747   : > { %26802 = vmatprep.subr.mxu1 %v27316_v0 }
 0x748   : > { %v21913_v36 = vand.u32 4294901760, %v21912_v30 }
 0x749   : > { %20432 = vmatmul.mubr.f32.vlgmr.msra.gmra.mrb[4].mxu0 %v29560_v45  ;;  %26800 = vmatmul.mubr.f32.vlgmr.msra.gmra.mrb[40].mxu1 %v29776_v23  ;;  %v20979_v45 = vsub.f32 %v29873_v63, %v20978_v19 }
 0x74a   : > { %20895 = vmatpush1.msra.mxu0 %v29853_v54  ;;  %26803 = vmatpush3.msra.mxu1 %v29781_v21  ;;  %v25178_v21 = vand.u32 4294901760, %v25177_v56  ;;  %v21914_v6 = vsub.f32 %v21912_v30, %v21913_v36 }
 0x74b   : > { %20975 = vmatprep.subr.mxu0 %v20974_v43  ;;  %26804 = vmatprep.mubr.msk.f32.mxu1 %vm27325_vm0, %v27316_v0  ;;  %v20980_v46 = vand.u32 4294901760, %v20979_v45 }
 0x74c   : > { %26807 = vmatprep.subr.mxu1 %v27316_v0  ;;  %20958 = vmatprep.mubr.f32.mxu0 %v27316_v0 }
 0x74d   : > { %26805 = vmatmul.mubr.f32.vlgmr.msra.gmra.mrb[42].mxu1 %v29776_v23 }
 0x74e   : > { %26808 = vmatpush3.msra.mxu1 %v29850_v24  ;;  %26809 = vmatprep.mubr.msk.f32.mxu1 %vm27325_vm0, %v27316_v0 }
 0x74f   : > { %26812 = vmatprep.subr.mxu1 %v27316_v0 }
 0x751   : > { %20964 = vmatmul.mubr.f32.vlgmr.msra.gmra.mrb[4].mxu0 %v29673_v33  ;;  %26810 = vmatmul.mubr.f32.vlgmr.msra.gmra.mrb[44].mxu1 %v29904_v4  ;;  %v29924_v33 = vand.u32 4294901760, %v24630_v44 }
 0x752   : > { %20981 = vmatpush1.msra.mxu0 %v20980_v46  ;;  %26813 = vmatpush3.msra.mxu1 %v24245_v37 }
 0x753   : > { %21054 = vmatprep.subr.mxu0 %v29843_v18  ;;  %26814 = vmatprep.mubr.msk.f32.mxu1 %vm27325_vm0, %v27316_v0  ;;  %v29935_v26 = vsub.f32 %v24630_v44, %v29924_v33 }
 0x754   : > { %26817 = vmatprep.subr.mxu1 %v27316_v0  ;;  %21044 = vmatprep.mubr.f32.mxu0 %v27316_v0 }
 0x755   : > { %26815 = vmatmul.mubr.f32.vlgmr.msra.gmra.mrb[46].mxu1 %v29845_v9  ;;  %v29950_v11 = vand.u32 4294901760, %v29935_v26 }
 0x756   : > { %26818 = vmatpush3.msra.mxu1 %v29867_v27  ;;  %26819 = vmatprep.mubr.msk.f32.mxu1 %vm27325_vm0, %v27316_v0 }
 0x757   : > { %26822 = vmatprep.subr.mxu1 %v27316_v0  ;;  %v24702_v12 = vsub.f32 %v29935_v26, %v29950_v11 }
 0x759   : > { %21046 = vmatmul.mubr.f32.vlgmr.msra.gmra.mrb[4].mxu0 %v29631_v34  ;;  %26820 = vmatmul.mubr.f32.vlgmr.msra.gmra.mrb[48].mxu1 %v29859_v32 }
 0x75a   : > { %21057 = vmatpush1.msra.mxu0 %v29873_v63  ;;  %26823 = vmatpush3.msra.mxu1 %v29850_v24 }
 0x75b   : > { %21130 = vmatprep.subr.mxu0 %v29828_v59  ;;  %26824 = vmatprep.mubr.msk.f32.mxu1 %vm27325_vm0, %v27316_v0 }
 0x75c   : > { %26827 = vmatprep.subr.mxu1 %v27316_v0  ;;  %21120 = vmatprep.mubr.f32.mxu0 %v27316_v0 }
 0x75d   : > { %26825 = vmatmul.mubr.f32.vlgmr.msra.gmra.mrb[50].mxu1 %v29880_v57 }
 0x75e   : > { %26828 = vmatpush3.msra.mxu1 %v24243_v47  ;;  %26829 = vmatprep.mubr.msk.f32.mxu1 %vm27325_vm0, %v27316_v0 }
 0x75f   : > { %26832 = vmatprep.subr.mxu1 %v27316_v0 }
 0x761   : > { %21123 = vmatmul.mubr.f32.vlgmr.msra.gmra.mrb[4].mxu0 %v29642_v5  ;;  %26830 = vmatmul.mubr.f32.vlgmr.msra.gmra.mrb[52].mxu1 %v29845_v9  ;;  %v29968_v5 = vand.u32 4294901760, %v24702_v12 }
 0x762   : > { %21132 = vmatpush1.msra.mxu0 %v29853_v54  ;;  %26833 = vmatpush3.msra.mxu1 %v29850_v24 }
 0x763   : > { %21208 = vmatprep.subr.mxu0 %v20972_v52  ;;  %26834 = vmatprep.mubr.msk.f32.mxu1 %vm27325_vm0, %v27316_v0 }
 0x764   : > { %26837 = vmatprep.subr.mxu1 %v27316_v0  ;;  %21195 = vmatprep.mubr.f32.mxu0 %v27316_v0 }
 0x765   : > { %26835 = vmatmul.mubr.f32.vlgmr.msra.gmra.mrb[54].mxu1 %v29845_v9 }
 0x766   : > { %26838 = vmatpush3.msra.mxu1 %v29930_v60  ;;  %26839 = vmatprep.mubr.msk.f32.mxu1 %vm27325_vm0, %v27316_v0 }
 0x767   : > { %26842 = vmatprep.subr.mxu1 %v27316_v0 }
 0x769   : > { %21199 = vmatmul.mubr.f32.vlgmr.msra.gmra.mrb[4].mxu0 %v29655_v8  ;;  %26840 = vmatmul.mubr.f32.vlgmr.msra.gmra.mrb[56].mxu1 %v29968_v5  ;;  %v29993_v8 = vand.u32 4294901760, %v29378_v2 }
 0x76a   : > { %21212 = vmatpush1.msra.mxu0 %v20978_v19  ;;  %26843 = vmatpush3.msra.mxu1 %v25178_v21 }
 0x76b   : > { %21284 = vmatprep.subr.mxu0 %v29828_v59  ;;  %26844 = vmatprep.mubr.msk.f32.mxu1 %vm27325_vm0, %v27316_v0  ;;  %v21918_v17 = vsub.f32 %v29378_v2, %v29993_v8  ;;  %v21915_v2 = vand.u32 4294901760, %v21914_v6 }
 0x76c   : > { %26847 = vmatprep.subr.mxu1 %v27316_v0  ;;  %21275 = vmatprep.mubr.f32.mxu0 %v27316_v0 }
 0x76d   : > { %26845 = vmatmul.mubr.f32.vlgmr.msra.gmra.mrb[58].mxu1 %v29924_v33  ;;  %v21919_v53 = vand.u32 4294901760, %v21918_v17 }
 0x76e   : > { %26848 = vmatpush3.msra.mxu1 %v25175_v20  ;;  %26849 = vmatprep.mubr.msk.f32.mxu1 %vm27325_vm0, %v27316_v0 }
 0x76f   : > { %26852 = vmatprep.subr.mxu1 %v27316_v0  ;;  %v21920_v29 = vsub.f32 %v21918_v17, %v21919_v53 }
 0x771   : > { %21277 = vmatmul.mubr.f32.vlgmr.msra.gmra.mrb[4].mxu0 %v29631_v34  ;;  %26850 = vmatmul.mubr.f32.vlgmr.msra.gmra.mrb[60].mxu1 %v29935_v26  ;;  %v21921_v1 = vand.u32 4294901760, %v21920_v29 }
 0x772   : > { %21286 = vmatpush1.msra.mxu0 %v29853_v54  ;;  %26853 = vmatpush3.msra.mxu1 %v29930_v60 }
 0x773   : > { %21834 = vmatprep.subr.mxu0 %v29975_v25  ;;  %26854 = vmatprep.mubr.msk.f32.mxu1 %vm27325_vm0, %v27316_v0 }
 0x774   : > { %26857 = vmatprep.subr.mxu1 %v27316_v0  ;;  %21349 = vmatprep.mubr.f32.mxu0 %v27316_v0 }
 0x775   : > { %26855 = vmatmul.mubr.f32.vlgmr.msra.gmra.mrb[62].mxu1 %v29950_v11 }
 0x776   : > { %26858 = vmatpush3.msra.mxu1 %v25176_v41  ;;  %26859 = vmatprep.mubr.msk.f32.mxu1 %vm27325_vm0, %v27316_v0  ;;  %v30035_v41 = vand.u32 4294901760, %v29420_v16 }
 0x777   : > { %26862 = vmatprep.subr.mxu1 %v27316_v0 }
 0x778   : > { %v17719_v3 = vpop.f32.mrb[216].mxu1 }
 0x779   : > { %21351 = vmatmul.mubr.f32.vlgmr.msra.gmra.mrb[4].mxu0 %v29631_v34  ;;  %26860 = vmatmul.mubr.f32.vlgmr.msra.gmra.mrb[64].mxu1 %v29924_v33  ;;  %v26601_v59 = vpop.f32.mrb[217].mxu1 }
 0x77a   : > { %21836 = vmatpush1.msra.mxu0 %v29993_v8  ;;  %26863 = vmatpush3.msra.mxu1 %v29930_v60  ;;  %v22845_v60 = vsub.f32 %v29409_v10, %v30027_v51  ;;  %v22851_v10 = vsub.f32 %v29420_v16, %v30035_v41 }
 0x77b   : > { %21916 = vmatprep.subr.mxu0 %v21915_v2  ;;  %21899 = vmatprep.mubr.f32.mxu0 %v27316_v0 }
 0x77c   : > { %26864 = vmatprep.mubr.msk.f32.mxu1 %vm27325_vm0, %v27316_v0  ;;  %v22852_v6 = vand.u32 4294901760, %v22851_v10 }
 0x77d   : > { %26865 = vmatmul.mubr.f32.vlgmr.msra.gmra.mrb[66].mxu1 %v29924_v33 }
 0x780   : > { %v17795_v13 = vpop.f32.mrb[218].mxu1 }
 0x781   : > { %21905 = vmatmul.mubr.f32.vlgmr.msra.gmra.mrb[4].mxu0 %v29756_v61  ;;  %v17796_v34 = vadd.f32 %v17795_v13, %v17719_v3  ;;  %v26606_v18 = vpop.f32.mrb[219].mxu1 }
 0x782   : > { %21922 = vmatpush1.msra.mxu0 %v21921_v1  ;;  %21985 = vmatprep.mubr.f32.mxu0 %v27316_v0 }
 0x783   : > { %21995 = vmatprep.subr.mxu0 %v21912_v30 }
 0x784   : > { %v17869_v24 = vpop.f32.mrb[220].mxu1 }
 0x785   : > { %v17870_v54 = vadd.f32 %v17869_v24, %v17796_v34  ;;  %v26611_v52 = vpop.f32.mrb[221].mxu1 }
 0x788   : > { %v17943_v27 = vpop.f32.mrb[222].mxu1 }
 0x789   : > { %21987 = vmatmul.mubr.f32.vlgmr.msra.gmra.mrb[4].mxu0 %v29703_v7  ;;  %v17944_v63 = vadd.f32 %v17943_v27, %v17870_v54  ;;  %v26616_v14 = vpop.f32.mrb[223].mxu1 }
 0x78a   : > { %21998 = vmatpush1.msra.mxu0 %v21918_v17  ;;  %22061 = vmatprep.mubr.f32.mxu0 %v27316_v0 }
 0x78b   : > { %22071 = vmatprep.subr.mxu0 %v29975_v25 }
 0x78c   : > { %v18017_v61 = vpop.f32.mrb[224].mxu1 }
 0x78d   : > { %v18018_v47 = vadd.f32 %v18017_v61, %v17944_v63  ;;  %v26621_v19 = vpop.f32.mrb[225].mxu1 }
 0x790   : > { %v18089_v43 = vpop.f32.mrb[226].mxu1 }
 0x791   : > { %22064 = vmatmul.mubr.f32.vlgmr.msra.gmra.mrb[4].mxu0 %v29717_v55  ;;  %v18090_v49 = vadd.f32 %v18089_v43, %v18018_v47  ;;  %v26626_v28 = vpop.f32.mrb[227].mxu1 }
 0x792   : > { %22073 = vmatpush1.msra.mxu0 %v29993_v8  ;;  %22136 = vmatprep.mubr.f32.mxu0 %v27316_v0 }
 0x793   : > { %22149 = vmatprep.subr.mxu0 %v21913_v36 }
 0x794   : > { %v18647_v45 = vpop.f32.mrb[228].mxu1 }
 0x795   : > { %v18648_v22 = vadd.f32 %v18647_v45, %v18090_v49  ;;  %v26631_v46 = vpop.f32.mrb[229].mxu1 }
 0x796   : > { %v30055_v46 = vand.u32 4294901760, %v29451_v50 }
 0x798   : > { %v18723_v37 = vpop.f32.mrb[230].mxu1 }
 0x799   : > { %22140 = vmatmul.mubr.f32.vlgmr.msra.gmra.mrb[4].mxu0 %v29736_v42  ;;  %v18724_v44 = vadd.f32 %v18723_v37, %v18648_v22  ;;  %v26636_v40 = vpop.f32.mrb[231].mxu1  ;;  %v22846_v42 = vand.u32 4294901760, %v22845_v60 }
 0x79a   : > { %22153 = vmatpush1.msra.mxu0 %v21919_v53  ;;  %22216 = vmatprep.mubr.f32.mxu0 %v27316_v0  ;;  %v23778_v40 = vsub.f32 %v29451_v50, %v30055_v46 }
 0x79b   : > { %22225 = vmatprep.subr.mxu0 %v29975_v25  ;;  %v22847_v30 = vsub.f32 %v22845_v60, %v22846_v42 }
 0x79c   : > { %v18797_v55 = vpop.f32.mrb[232].mxu1 }
 0x79d   : > { %v18798_v48 = vadd.f32 %v18797_v55, %v18724_v44  ;;  %v26641_v20 = vpop.f32.mrb[233].mxu1  ;;  %v22848_v3 = vand.u32 4294901760, %v22847_v30 }
 0x7a0   : > { %v18871_v12 = vpop.f32.mrb[234].mxu1 }
 0x7a1   : > { %22218 = vmatmul.mubr.f32.vlgmr.msra.gmra.mrb[4].mxu0 %v29703_v7  ;;  %v18872_v56 = vadd.f32 %v18871_v12, %v18798_v48  ;;  %v26646_v21 = vpop.f32.mrb[235].mxu1  ;;  %v30063_v48 = vand.u32 4294901760, %v29460_v39 }
 0x7a2   : > { %22227 = vmatpush1.msra.mxu0 %v29993_v8  ;;  %22290 = vmatprep.mubr.f32.mxu0 %v27316_v0  ;;  %v22853_v8 = vsub.f32 %v22851_v10, %v22852_v6 }
 0x7a3   : > { %22767 = vmatprep.subr.mxu0 %v30027_v51  ;;  %v23784_v50 = vsub.f32 %v29460_v39, %v30063_v48 }
 0x7a4   : > { %v18945_v25 = vpop.f32.mrb[236].mxu1  ;;  %v22854_v16 = vand.u32 4294901760, %v22853_v8 }
 0x7a5   : > { %v18946_v36 = vadd.f32 %v18945_v25, %v18872_v56  ;;  %v26651_v17 = vpop.f32.mrb[237].mxu1  ;;  %v23785_v25 = vand.u32 4294901760, %v23784_v50 }
 0x7a8   : > { %v19017_v53 = vpop.f32.mrb[238].mxu1 }
 0x7a9   : > { %22292 = vmatmul.mubr.f32.vlgmr.msra.gmra.mrb[4].mxu0 %v29703_v7  ;;  %v19018_v2 = vadd.f32 %v19017_v53, %v18946_v36  ;;  %v26656_v59 = vpop.f32.mrb[239].mxu1  ;;  %v23786_v53 = vsub.f32 %v23784_v50, %v23785_v25 }
 0x7aa   : > { %22769 = vmatpush1.msra.mxu0 %v30035_v41  ;;  %22832 = vmatprep.mubr.f32.mxu0 %v27316_v0 }
 0x7ab   : > { %22849 = vmatprep.subr.mxu0 %v22848_v3 }
 0x7ac   : > { %v19577_v29 = vpop.f32.mrb[240].mxu1 }
 0x7ad   : > { %v26661_v1 = vpop.f32.mrb[241].mxu1 }
 0x7b0   : > { %v19653_v13 = vpop.f32.mrb[242].mxu1 }
 0x7b1   : > { %22838 = vmatmul.mubr.f32.vlgmr.msra.gmra.mrb[4].mxu0 %v29816_v38  ;;  %v19654_v34 = vadd.f32 %v19653_v13, %v19577_v29  ;;  %v26666_v18 = vpop.f32.mrb[243].mxu1 }
 0x7b2   : > { %22855 = vmatpush1.msra.mxu0 %v22854_v16  ;;  %22918 = vmatprep.mubr.f32.mxu0 %v27316_v0 }
 0x7b3   : > { %22928 = vmatprep.subr.mxu0 %v22845_v60 }
 0x7b4   : > { %v19727_v7 = vpop.f32.mrb[244].mxu1 }
 0x7b5   : > { %v19728_v24 = vadd.f32 %v19727_v7, %v19654_v34  ;;  %v26671_v54 = vpop.f32.mrb[245].mxu1 }
 0x7b8   : > { %v19801_v52 = vpop.f32.mrb[246].mxu1 }
 0x7b9   : > { %22920 = vmatmul.mubr.f32.vlgmr.msra.gmra.mrb[4].mxu0 %v29776_v23  ;;  %v19802_v27 = vadd.f32 %v19801_v52, %v19728_v24  ;;  %v26676_v63 = vpop.f32.mrb[247].mxu1 }
 0x7ba   : > { %22931 = vmatpush1.msra.mxu0 %v22851_v10  ;;  %22994 = vmatprep.mubr.f32.mxu0 %v27316_v0  ;;  %v24618_v63 = vpop.permute.xlu0 %24617 }
 0x7bb   : > { %23004 = vmatprep.subr.mxu0 %v30027_v51 }
 0x7bc   : > { %v19875_v38 = vpop.f32.mrb[248].mxu1 }
 0x7bd   : > { %v19876_v14 = vadd.f32 %v19875_v38, %v19802_v27  ;;  %v26681_v61 = vpop.f32.mrb[249].mxu1 }
 0x7c0   : > { %v19947_v47 = vpop.f32.mrb[250].mxu1 }
 0x7c1   : > { %22997 = vmatmul.mubr.f32.vlgmr.msra.gmra.mrb[4].mxu0 %v29786_v62  ;;  %v19948_v19 = vadd.f32 %v19947_v47, %v19876_v14  ;;  %v26686_v43 = vpop.f32.mrb[251].mxu1  ;;  %v24624_v47 = vsel %vm7782_vm9, %v24618_v63, %v29896_v15 }
 0x7c2   : > { %23006 = vmatpush1.msra.mxu0 %v30035_v41  ;;  %23069 = vmatprep.mubr.f32.mxu0 %v27316_v0  ;;  %v30084_v43 = vand.u32 4294901760, %v24624_v47 }
 0x7c3   : > { %23082 = vmatprep.subr.mxu0 %v22846_v42  ;;  %v19953_v49 = vadd.f32 %v19948_v19, %v19018_v2  ;;  %v23787_v2 = vand.u32 4294901760, %v23786_v53 }
 0x7c4   : > { %v20510_v28 = vpop.f32.mrb[252].mxu1 }
 0x7c5   : > { %v26691_v45 = vpop.f32.mrb[253].mxu1 }
 0x7c8   : > { %v20586_v22 = vpop.f32.mrb[254].mxu1 }
 0x7c9   : > { %23073 = vmatmul.mubr.f32.vlgmr.msra.gmra.mrb[4].mxu0 %v29798_v31  ;;  %v20587_v37 = vadd.f32 %v20586_v22, %v20510_v28  ;;  %v26696_v44 = vpop.f32.mrb[255].mxu1  ;;  %v23779_v31 = vand.u32 4294901760, %v23778_v40  ;;  %v24616_v28 = vpop.permute.xlu0 %24615  ;;  %v24711_v22 = vsub.f32 %v24624_v47, %v30084_v43 }
 0x7ca   : > { %23086 = vmatpush1.msra.mxu0 %v22852_v6  ;;  %23149 = vmatprep.mubr.f32.mxu0 %v27316_v0 }
 0x7cb   : > { %23158 = vmatprep.subr.mxu0 %v30027_v51  ;;  %v23780_v56 = vsub.f32 %v23778_v40, %v23779_v31 }
 0x7cc   : > { %v20660_v62 = vpop.f32.mrb[0].mxu1 }
 0x7cd   : > { %v20661_v55 = vadd.f32 %v20660_v62, %v20587_v37  ;;  %v26701_v60 = vpop.f32.mrb[1].mxu1  ;;  %v23781_v36 = vand.u32 4294901760, %v23780_v56  ;;  %v24623_v37 = vsel %vm7782_vm9, %v24616_v28, %v24618_v63 }
 0x7ce   : > { %v30091_v62 = vand.u32 4294901760, %v24623_v37 }
 0x7d0   : > { %v20734_v20 = vpop.f32.mrb[2].mxu1 }
 0x7d1   : > { %23151 = vmatmul.mubr.f32.vlgmr.msra.gmra.mrb[4].mxu0 %v29776_v23  ;;  %v20735_v12 = vadd.f32 %v20734_v20, %v20661_v55  ;;  %v26706_v42 = vpop.f32.mrb[3].mxu1 }
 0x7d2   : > { %23160 = vmatpush1.msra.mxu0 %v30035_v41  ;;  %23223 = vmatprep.mubr.f32.mxu0 %v27316_v0 }
 0x7d3   : > { %23700 = vmatprep.subr.mxu0 %v30055_v46 }
 0x7d4   : > { %v20808_v51 = vpop.f32.mrb[4].mxu1 }
 0x7d5   : > { %v20809_v21 = vadd.f32 %v20808_v51, %v20735_v12  ;;  %v26711_v10 = vpop.f32.mrb[5].mxu1 }
 0x7d8   : > { %v20880_v30 = vpop.f32.mrb[6].mxu1 }
 0x7d9   : > { %23225 = vmatmul.mubr.f32.vlgmr.msra.gmra.mrb[4].mxu0 %v29776_v23  ;;  %v20881_v17 = vadd.f32 %v20880_v30, %v20809_v21  ;;  %v26716_v6 = vpop.f32.mrb[7].mxu1 }
 0x7da   : > { %23702 = vmatpush1.msra.mxu0 %v30063_v48  ;;  %23765 = vmatprep.mubr.f32.mxu0 %v27316_v0 }
 0x7db   : > { %23782 = vmatprep.subr.mxu0 %v23781_v36  ;;  %v20886_v41 = vadd.f32 %v20881_v17, %v19953_v49 }
 0x7dc   : > { %v21429_v3 = vpop.f32.mrb[8].mxu1 }
 0x7dd   : > { %v26721_v39 = vpop.f32.mrb[9].mxu1 }
 0x7e0   : > { %v21505_v59 = vpop.f32.mrb[10].mxu1 }
 0x7e1   : > { %23771 = vmatmul.mubr.f32.vlgmr.msra.gmra.mrb[4].mxu0 %v29904_v4  ;;  %v21506_v8 = vadd.f32 %v21505_v59, %v21429_v3  ;;  %v26726_v29 = vpop.f32.mrb[11].mxu1 }
 0x7e2   : > { %23788 = vmatpush1.msra.mxu0 %v23787_v2  ;;  %23851 = vmatprep.mubr.f32.mxu0 %v27316_v0 }
 0x7e3   : > { %23861 = vmatprep.subr.mxu0 %v23778_v40 }
 0x7e4   : > { %v21579_v23 = vpop.f32.mrb[12].mxu1 }
 0x7e5   : > { %v21580_v1 = vadd.f32 %v21579_v23, %v21506_v8  ;;  %v26731_v16 = vpop.f32.mrb[13].mxu1 }
 0x7e8   : > { %v21653_v13 = vpop.f32.mrb[14].mxu1 }
 0x7e9   : > { %23853 = vmatmul.mubr.f32.vlgmr.msra.gmra.mrb[4].mxu0 %v29845_v9  ;;  %v21654_v34 = vadd.f32 %v21653_v13, %v21580_v1  ;;  %v26736_v18 = vpop.f32.mrb[15].mxu1 }
 0x7ea   : > { %23864 = vmatpush1.msra.mxu0 %v23784_v50  ;;  %23927 = vmatprep.mubr.f32.mxu0 %v27316_v0 }
 0x7eb   : > { %23937 = vmatprep.subr.mxu0 %v30055_v46 }
 0x7ec   : > { %v21727_v4 = vpop.f32.mrb[16].mxu1 }
 0x7ed   : > { %v21728_v7 = vadd.f32 %v21727_v4, %v21654_v34  ;;  %v26741_v24 = vpop.f32.mrb[17].mxu1 }
 0x7f0   : > { %v21799_v54 = vpop.f32.mrb[18].mxu1 }
 0x7f1   : > { %23930 = vmatmul.mubr.f32.vlgmr.msra.gmra.mrb[4].mxu0 %v29859_v32  ;;  %v21800_v52 = vadd.f32 %v21799_v54, %v21728_v7  ;;  %v26746_v27 = vpop.f32.mrb[19].mxu1 }
 0x7f2   : > { %23939 = vmatpush1.msra.mxu0 %v30063_v48  ;;  %24002 = vmatprep.mubr.f32.mxu0 %v27316_v0 }
 0x7f3   : > { %24015 = vmatprep.subr.mxu0 %v23779_v31  ;;  %v21805_v38 = vadd.f32 %v21800_v52, %v20886_v41 }
 0x7f4   : > { %v22370_v14 = vpop.f32.mrb[20].mxu1 }
 0x7f5   : > { %v26751_v61 = vpop.f32.mrb[21].mxu1 }
 0x7f8   : > { %v22446_v19 = vpop.f32.mrb[22].mxu1 }
 0x7f9   : > { %24006 = vmatmul.mubr.f32.vlgmr.msra.gmra.mrb[4].mxu0 %v29880_v57  ;;  %v22447_v32 = vadd.f32 %v22446_v19, %v22370_v14  ;;  %v26756_v49 = vpop.f32.mrb[23].mxu1  ;;  %v24712_v57 = vand.u32 4294901760, %v24711_v22 }
 0x7fa   : > { %24019 = vmatpush1.msra.mxu0 %v23785_v25  ;;  %24082 = vmatprep.mubr.f32.mxu0 %v27316_v0 }
 0x7fb   : > { %24091 = vmatprep.subr.mxu0 %v30055_v46  ;;  %v24717_v46 = vsub.f32 %v24623_v37, %v30091_v62  ;;  %v24713_v31 = vsub.f32 %v24711_v22, %v24712_v57 }
 0x7fc   : > { %v22520_v45 = vpop.f32.mrb[24].mxu1 }
 0x7fd   : > { %v22521_v44 = vadd.f32 %v22520_v45, %v22447_v32  ;;  %v26761_v15 = vpop.f32.mrb[25].mxu1  ;;  %v24718_v50 = vand.u32 4294901760, %v24717_v46  ;;  %v24714_v56 = vand.u32 4294901760, %v24713_v31 }
 0x7ff   : > { %v24719_v25 = vsub.f32 %v24717_v46, %v24718_v50 }
 0x800   : > { %v22594_v40 = vpop.f32.mrb[26].mxu1 }
 0x801   : > { %24084 = vmatmul.mubr.f32.vlgmr.msra.gmra.mrb[4].mxu0 %v29845_v9  ;;  %v22595_v55 = vadd.f32 %v22594_v40, %v22521_v44  ;;  %v26766_v60 = vpop.f32.mrb[27].mxu1  ;;  %v24720_v17 = vand.u32 4294901760, %v24719_v25 }
 0x802   : > { %24093 = vmatpush1.msra.mxu0 %v30063_v48  ;;  %24156 = vmatprep.mubr.f32.mxu0 %v27316_v0 }
 0x803   : > { %24633 = vmatprep.subr.mxu0 %v30084_v43 }
 0x804   : > { %v22668_v20 = vpop.f32.mrb[28].mxu1 }
 0x805   : > { %v22669_v12 = vadd.f32 %v22668_v20, %v22595_v55  ;;  %v26771_v42 = vpop.f32.mrb[29].mxu1 }
 0x806   : > { %v25550_v42 = vpop.permute.xlu0 %25549 }
 0x808   : > { %v22740_v51 = vpop.f32.mrb[30].mxu1 }
 0x809   : > { %24158 = vmatmul.mubr.f32.vlgmr.msra.gmra.mrb[4].mxu0 %v29845_v9  ;;  %v22741_v21 = vadd.f32 %v22740_v51, %v22669_v12  ;;  %v26776_v10 = vpop.f32.mrb[31].mxu1 }
 0x80a   : > { %24635 = vmatpush1.msra.mxu0 %v30091_v62  ;;  %24698 = vmatprep.mubr.f32.mxu0 %v27316_v0 }
 0x80b   : > { %24715 = vmatprep.subr.mxu0 %v24714_v56  ;;  %v22746_v48 = vadd.f32 %v22741_v21, %v21805_v38 }
 0x80c   : > { %v23303_v30 = vpop.f32.mrb[32].mxu1 }
 0x80d   : > { %v26781_v36 = vpop.f32.mrb[33].mxu1 }
 0x80e   : > { %v25578_v36 = vld [vmem:[%s27428_s21 + $0x18] sm:$0xf0] }
 0x810   : > { %v23379_v6 = vpop.f32.mrb[34].mxu1 }
 0x811   : > { %24704 = vmatmul.mubr.f32.vlgmr.msra.gmra.mrb[4].mxu0 %v29968_v5  ;;  %v23380_v41 = vadd.f32 %v23379_v6, %v23303_v30  ;;  %v26786_v53 = vpop.f32.mrb[35].mxu1  ;;  %v25575_v30 = vld [vmem:[%s27428_s21 + $0x18] sm:$0xf] }
 0x812   : > { %24721 = vmatpush1.msra.mxu0 %v24720_v17  ;;  %24784 = vmatprep.mubr.f32.mxu0 %v27316_v0 }
 0x813   : > { %24794 = vmatprep.subr.mxu0 %v24711_v22 }
 0x814   : > { %v23453_v9 = vpop.f32.mrb[36].mxu1 }
 0x815   : > { %v23454_v3 = vadd.f32 %v23453_v9, %v23380_v41  ;;  %v26791_v39 = vpop.f32.mrb[37].mxu1 }
 0x818   : > { %v23527_v2 = vpop.f32.mrb[38].mxu1 }
 0x819   : > { %24786 = vmatmul.mubr.f32.vlgmr.msra.gmra.mrb[4].mxu0 %v29924_v33  ;;  %v23528_v59 = vadd.f32 %v23527_v2, %v23454_v3  ;;  %v26796_v8 = vpop.f32.mrb[39].mxu1 }
 0x81a   : > { %24797 = vmatpush1.msra.mxu0 %v24717_v46  ;;  %24860 = vmatprep.mubr.f32.mxu0 %v27316_v0 }
 0x81b   : > { %24870 = vmatprep.subr.mxu0 %v30084_v43 }
 0x81c   : > { %v23601_v5 = vpop.f32.mrb[40].mxu1 }
 0x81d   : > { %v23602_v29 = vadd.f32 %v23601_v5, %v23528_v59  ;;  %v26801_v23 = vpop.f32.mrb[41].mxu1 }
 0x820   : > { %v23673_v1 = vpop.f32.mrb[42].mxu1 }
 0x821   : > { %24863 = vmatmul.mubr.f32.vlgmr.msra.gmra.mrb[4].mxu0 %v29935_v26  ;;  %v23674_v16 = vadd.f32 %v23673_v1, %v23602_v29  ;;  %v26806_v13 = vpop.f32.mrb[43].mxu1 }
 0x822   : > { %24872 = vmatpush1.msra.mxu0 %v30091_v62  ;;  %24935 = vmatprep.mubr.f32.mxu0 %v27316_v0 }
 0x823   : > { %24948 = vmatprep.subr.mxu0 %v24712_v57  ;;  %v23679_v34 = vadd.f32 %v23674_v16, %v22746_v48 }
 0x824   : > { %v24236_v18 = vpop.f32.mrb[44].mxu1 }
 0x825   : > { %v26811_v4 = vpop.f32.mrb[45].mxu1 }
 0x828   : > { %v24312_v7 = vpop.f32.mrb[46].mxu1 }
 0x829   : > { %24939 = vmatmul.mubr.f32.vlgmr.msra.gmra.mrb[4].mxu0 %v29950_v11  ;;  %v24313_v24 = vadd.f32 %v24312_v7, %v24236_v18  ;;  %v26816_v54 = vpop.f32.mrb[47].mxu1  ;;  %v25576_v7 = vld [vmem:[%s27428_s21 + $0x8] sm:$0xf0] }
 0x82a   : > { %24952 = vmatpush1.msra.mxu0 %v24718_v50  ;;  %25015 = vmatprep.mubr.f32.mxu0 %v27316_v0  ;;  %v25577_v54 = vld [vmem:[%s27428_s21 + $0x10] sm:$0xf0] }
 0x82b   : > { %25024 = vmatprep.subr.mxu0 %v30084_v43 }
 0x82c   : > { %v24386_v26 = vpop.f32.mrb[48].mxu1 }
 0x82d   : > { %v24387_v52 = vadd.f32 %v24386_v26, %v24313_v24  ;;  %v26821_v27 = vpop.f32.mrb[49].mxu1 }
 0x82e   : > { %v25573_v27 = vld [vmem:[%s27428_s21 + $0x8] sm:$0xf] }
 0x830   : > { %v24460_v63 = vpop.f32.mrb[50].mxu1 }
 0x831   : > { %25017 = vmatmul.mubr.f32.vlgmr.msra.gmra.mrb[4].mxu0 %v29924_v33  ;;  %v24461_v38 = vadd.f32 %v24460_v63, %v24387_v52  ;;  %v26826_v14 = vpop.f32.mrb[51].mxu1 }
 0x832   : > { %25026 = vmatpush1.msra.mxu0 %v30091_v62  ;;  %25089 = vmatprep.mubr.f32.mxu0 %v27316_v0  ;;  %v25574_v14 = vld [vmem:[%s27428_s21 + $0x10] sm:$0xf]  ;;  %s25628_s21 = scalar_lea.sflag [#allocation5], %s296_s19 }
 0x834   : > { %v24534_v11 = vpop.f32.mrb[52].mxu1 }
 0x835   : > { %v24535_v61 = vadd.f32 %v24534_v11, %v24461_v38  ;;  %v26831_v47 = vpop.f32.mrb[53].mxu1 }
 0x838   : > { %v24606_v19 = vpop.f32.mrb[54].mxu1 }
 0x839   : > { %25091 = vmatmul.mubr.f32.vlgmr.msra.gmra.mrb[4].mxu0 %v29924_v33  ;;  %v24607_v32 = vadd.f32 %v24606_v19, %v24535_v61  ;;  %v26836_v43 = vpop.f32.mrb[55].mxu1 }
 0x83b   : > { %v24612_v49 = vadd.f32 %v24607_v32, %v23679_v34 }
 0x83c   : > { %v25169_v28 = vpop.f32.mrb[56].mxu1 }
 0x83d   : > { %v26841_v45 = vpop.f32.mrb[57].mxu1 }
 0x840   : > { %v25245_v22 = vpop.f32.mrb[58].mxu1 }
 0x841   : > { %v25246_v37 = vadd.f32 %v25245_v22, %v25169_v28  ;;  %v26846_v44 = vpop.f32.mrb[59].mxu1 }
 0x844   : > { %v25319_v15 = vpop.f32.mrb[60].mxu1 }
 0x845   : > { %v25320_v40 = vadd.f32 %v25319_v15, %v25246_v37  ;;  %v26851_v57 = vpop.f32.mrb[61].mxu1 }
 0x848   : > { %v25393_v62 = vpop.f32.mrb[62].mxu1 }
 0x849   : > { %v25394_v55 = vadd.f32 %v25393_v62, %v25320_v40  ;;  %v26856_v0 = vpop.f32.mrb[63].mxu1 }
 0x84c   : > { %v25467_v60 = vpop.f32.mrb[64].mxu1 }
 0x84d   : > { %v25468_v46 = vadd.f32 %v25467_v60, %v25394_v55  ;;  %v26861_v20 = vpop.f32.mrb[65].mxu1 }
 0x850   : > { %v25539_v33 = vpop.f32.mrb[66].mxu1 }
 0x851   : > { %v25540_v31 = vadd.f32 %v25539_v33, %v25468_v46  ;;  %v26866_v12 = vpop.f32.mrb[67].mxu1 }
 0x853   : > { %v25545_v50 = vadd.f32 %v25540_v31, %v24612_v49 }
 0x855   : > { %v25554_v51 = vadd.f32 %v25550_v42, %v25545_v50 }
 0x857   : > { %v25557_v56 = vsub.f32 0.0, %v25554_v51 }
 0x859   : > { %v25562_v21 = vmul.f32 1.442695, %v25557_v56 }
 0x85b   : > { %27240 = vpow2.f32 %v25562_v21 }
 0x865   : > { %v27241_v10 = vpop.eup %27240 }
 0x866   : > { %v25566_v48 = vadd.f32 1.0, %v27241_v10 }
 0x868   : > { %27242 = vrcp.f32 %v25566_v48 }
 0x872   : > { %v27243_v25 = vpop.eup %27242 }
 0x873   : > { %v25590_v17 = vrot.slane %v27243_v25, %v28336_v35  ;;  %v25605_v6 = vrot.slane %v27243_v25, %v28338_v58 }
 0x875   : > { %v25593_v41 = vmul.f32 %v25590_v17, %v25575_v30  ;;  %v25608_v53 = vmul.f32 %v25605_v6, %v25578_v36 }
 0x877   : > { %v25614_v9 = vrot.slane %v25608_v53, 4 }
 0x879   : > { %v25620_v3 = vadd.f32 %v25614_v9, %v25593_v41 }
 0x87b   : > { %25626 = vst [vmem:[%s30123_s17 + $0x8] sm:$0xf] %v25620_v3 }
 0x90c   : > { %v25092_v39 = vpop.f32.mrb[4].mxu0 }
 0x90d   : > { %v25552_v2 = vadd.f32 %v25550_v42, %v25092_v39  ;;  %v25094_v59 = vpop.f32.mrb[5].mxu0 }
 0x90e   : > { %v25553_v8 = vadd.f32 %v25550_v42, %v25094_v59 }
 0x90f   : > { %v25555_v5 = vsub.f32 0.0, %v25552_v2 }
 0x910   : > { %v25556_v29 = vsub.f32 0.0, %v25553_v8 }
 0x911   : > { %v25558_v23 = vmul.f32 1.442695, %v25555_v5 }
 0x912   : > { %v25560_v1 = vmul.f32 1.442695, %v25556_v29 }
 0x913   : > { %27244 = vpow2.f32 %v25558_v23 }
 0x914   : > { %27246 = vpow2.f32 %v25560_v1 }
 0x91d   : > { %v27245_v16 = vpop.eup %27244 }
 0x91e   : > { %v27247_v13 = vpop.eup %27246  ;;  %v25564_v34 = vadd.f32 1.0, %v27245_v16 }
 0x91f   : > { %v25565_v18 = vadd.f32 1.0, %v27247_v13 }
 0x920   : > { %27248 = vrcp.f32 %v25564_v34 }
 0x921   : > { %27250 = vrcp.f32 %v25565_v18 }
 0x92a   : > { %v27249_v4 = vpop.eup %27248 }
 0x92b   : > { %v27251_v24 = vpop.eup %27250  ;;  %v25582_v26 = vrot.slane %v27249_v4, %v28336_v35  ;;  %v25597_v52 = vrot.slane %v27249_v4, %v28338_v58 }
 0x92c   : > { %v25586_v63 = vrot.slane %v27251_v24, %v28336_v35  ;;  %v25601_v38 = vrot.slane %v27251_v24, %v28338_v58 }
 0x92d   : > { %v25606_v11 = vmul.f32 %v25597_v52, %v25576_v7  ;;  %v25591_v47 = vmul.f32 %v25582_v26, %v25573_v27 }
 0x92e   : > { %v25607_v61 = vmul.f32 %v25601_v38, %v25577_v54  ;;  %v25592_v32 = vmul.f32 %v25586_v63, %v25574_v14 }
 0x92f   : > { %v25612_v19 = vrot.slane %v25606_v11, 4 }
 0x930   : > { %v25613_v43 = vrot.slane %v25607_v61, 4 }
 0x931   : > { %v25618_v49 = vadd.f32 %v25612_v19, %v25591_v47 }
 0x932   : > { %v25619_v28 = vadd.f32 %v25613_v43, %v25592_v32 }
 0x934   : > { %v25623_v45 = vcombine.low %v25618_v49, %v25619_v28 }
 0x936   : > { %25625 = vst [vmem:[%s30123_s17] sm:$0xff] %v25623_v45 }
 0x937   : > { %27265 = shalt.err (!%p27262_p3)
}
 0x938   : > { %s27266_s13 = scalar_lea.hbm %s30139_s25, 192  ;;  %s27270_s17 = scalar_lea.hbm %s30192_s8, 384 }
 0x939   : > { %p27267_p4 = scmp.ne.s32.totalorder %s30139_s25, %s27266_s13  ;;  %p27271_p9 = scmp.lt.u32.totalorder %s30139_s25, %s30192_s8 }
 0x93a   : > { %p27272_p10 = scmp.lt.u32.totalorder %s27270_s17, %s27266_s13  ;;  %p27274_p12 = scmp.lt.u32.totalorder %s27266_s13, %s30139_s25 }
 0x93b   : > { %p27268_p7 = pnand %p27267_p4, %p27411_p5 }
 0x93c   : > { %p27273_p11 = por %p27272_p10, %p27271_p9 }
 0x93d   : > { %p27269_p8 = pneg %p27268_p7 }
 0x93e   : > { %p27275_p13 = por %p27274_p12, %p27273_p11 }
 0x940   : > { %p27276_p0 = pnand %p27275_p13, %p27269_p8 }
 0x942   : > { %27279 = shalt.err (!%p27276_p0)
}
 0x943   : > { %27188 = dma.vmem_to_hbm [thread:$0]  (%p27411_p5), %s30141_s22, 192, %s30139_s25, %s25628_s21  }
 0x944 PF: > { %p27194_p1 = scmp.ge.s32.totalorder %s27314_s30, 2  ;;  %s25654_s24 = sand.u32 1, %s27302_s27  }
 0x945   : > { %s25655_s26 = scalar_lea.sflag [#allocation5], %s25654_s24 }
 0x946   : > { %p27191_p2 = pnand %p27194_p1, %p27415_p6 }
 0x948   : > { %27297 = dma.done.wait (!%p27191_p2), %s25655_s26, 192  }
 0x949   : > { %27299 = vsyncadd (!%p27191_p2), %s25655_s26, 4294967104  ;;  %p18_p3 = scmp.ge.s32.totalorder %s27398_s11, 4   ;;  %s30195_s27 = smov %s27306_s28 }
 0x94a   : > { %s30196_s28 = smov %s27310_s29  ;;  %s30197_s29 = smov %s27409_s14 }
 0x94b   : > { %s30198_s30 = smov %s27398_s11  ;;  %20 = sbr.rel (!%p18_p3) target bundleno = 3 (0x3), region = 111 }
 0x952   :  { %25660 = vsyncpa [#allocation5], 1 }
 0x953   :  { %25662 = vsyncpa [#allocation5 + $0x1], 1 }

</bundles_post_ra>
